<compile_context>
chip_gen: v7x
topology: tpu7x:2x2x1
jax: 0.10.0
libtpu: 0.0.40
codegen_flags: <defaults>
</compile_context>

<pallas_src>
import functools

import jax
import jax.numpy as jnp
from jax import lax
from jax.experimental import pallas as pl
from jax.experimental.pallas import tpu as pltpu


def _round_up(value, multiple):
    return (value + multiple - 1) // multiple * multiple


# ----------------------------------------------------------------------------
# Fused Pallas kernel: conv1+relu, conv2+relu, (free) flatten, fc1+relu, fc2.
# One grid step == one sample.
# ----------------------------------------------------------------------------
def _fused_cnn_kernel(x_ref, w1_ref, b1_ref, w2_ref, b2_ref,
                      wf1_ref, bf1_ref, wf2_ref, bf2_ref,
                      o_ref, a1_ref, a2_ref, *,
                      kh1, kh2, h_out1, h_out2):
    # ---- conv1 + bias + ReLU: kh1 row-tap GEMMs, width/channels folded in K.
    acc1 = None
    for ki in range(kh1):
        part = jnp.dot(x_ref[0, ki:ki + h_out1, :], w1_ref[ki],
                       preferred_element_type=jnp.float32)
        acc1 = part if acc1 is None else acc1 + part
    a1_ref[...] = jnp.maximum(acc1 + b1_ref[...], 0.0).astype(a1_ref.dtype)

    # ---- conv2 + bias + ReLU: kh2 row-tap GEMMs on the width-folded a1.
    acc2 = None
    for ki in range(kh2):
        part = jnp.dot(a1_ref[ki:ki + h_out2, :], w2_ref[ki],
                       preferred_element_type=jnp.float32)
        acc2 = part if acc2 is None else acc2 + part
    a2_ref[...] = jnp.maximum(acc2 + b2_ref[...], 0.0).astype(a2_ref.dtype)

    # ---- fc1 + ReLU: one K=w_out2*c2out GEMM per output row (flatten is
    # absorbed into the pre-permuted fc1 weight slabs; no reshape needed).
    accf = None
    for r in range(h_out2):
        part = jnp.dot(a2_ref[r:r + 1, :], wf1_ref[r],
                       preferred_element_type=jnp.float32)
        accf = part if accf is None else accf + part
    hidden = jnp.maximum(accf + bf1_ref[...], 0.0).astype(wf2_ref.dtype)

    # ---- fc2: lane-dense 128-wide padded output slab.
    logits = jnp.dot(hidden, wf2_ref[...],
                     preferred_element_type=jnp.float32) + bf2_ref[...]
    o_ref[...] = logits.reshape(o_ref.shape).astype(o_ref.dtype)


# ----------------------------------------------------------------------------
# One-time weight preparation (block-Toeplitz packing, bf16 casts, padding).
# ----------------------------------------------------------------------------
def prepare_params(params, height=16, width=16):
    w1 = params["conv1_w"]                       # (c1out, cin, kh1, kw1)
    c1out, cin, kh1, kw1 = w1.shape
    w2 = params["conv2_w"]                       # (c2out, c1out, kh2, kw2)
    c2out, _, kh2, kw2 = w2.shape

    h_out1, w_out1 = height - kh1 + 1, width - kw1 + 1
    h_out2, w_out2 = h_out1 - kh2 + 1, w_out1 - kw2 + 1
    assert min(h_out1, w_out1, h_out2, w_out2) >= 1, "input too small for convs"

    cin_p = _round_up(cin, 8)                    # pad input channels (3 -> 8)
    k1 = width * cin_p                           # conv1 GEMM K  (128 @ 16x16)
    n1 = w_out1 * c1out                          # conv1 GEMM N  (288)
    n2 = w_out2 * c2out                          # conv2 GEMM N  (384)

    # conv1: block-Toeplitz slab per row-tap ki (width-tap & cin folded to K):
    #   w1_big[ki, w*cin_p + ci, c*c1out + co] = w1[co, ci, ki, w - c]
    w1_big = jnp.zeros((kh1, k1, n1), jnp.float32)
    for c in range(w_out1):
        for kj in range(kw1):
            blk = jnp.transpose(w1[:, :, :, kj], (2, 1, 0))   # (kh1, cin, c1out)
            w = c + kj
            w1_big = w1_big.at[:, w * cin_p:w * cin_p + cin,
                               c * c1out:(c + 1) * c1out].set(blk)

    # conv2: same trick on the width-folded conv1 activation.
    #   w2_big[ki, j*c1out + ci, c*c2out + co] = w2[co, ci, ki, j - c]
    w2_big = jnp.zeros((kh2, n1, n2), jnp.float32)
    for c in range(w_out2):
        for kj in range(kw2):
            blk = jnp.transpose(w2[:, :, :, kj], (2, 1, 0))   # (kh2, c1out, c2out)
            j = c + kj
            w2_big = w2_big.at[:, j * c1out:(j + 1) * c1out,
                               c * c2out:(c + 1) * c2out].set(blk)

    # fc1: fold PyTorch's NCHW channel-major flatten into per-row weight
    # slabs matching the width-folded (c, co) lane order of a2.
    f1 = params["fc1_w"]
    nf1 = f1.shape[0]
    assert f1.shape[1] == c2out * h_out2 * w_out2, (
        "fc1 in_features must match the conv output size for this input "
        f"resolution (expected {c2out * h_out2 * w_out2}, got {f1.shape[1]})")
    wf1 = jnp.transpose(f1.reshape(nf1, c2out, h_out2, w_out2), (2, 3, 1, 0))
    wf1 = wf1.reshape(h_out2, w_out2 * c2out, nf1)            # [r, c*c2out+co, j]

    # fc2: transpose and zero-pad the 2 logits to a lane-dense 128-wide slab.
    f2 = params["fc2_w"]
    nout = f2.shape[0]
    npad = _round_up(max(nout, 128), 128)
    wf2 = jnp.zeros((nf1, npad), jnp.float32).at[:, :nout].set(f2.T)
    bf2 = jnp.zeros((1, npad), jnp.float32).at[0, :nout].set(params["fc2_b"])

    arrays = dict(
        w1=w1_big.astype(jnp.bfloat16),
        b1=jnp.tile(params["conv1_b"], w_out1).reshape(1, n1).astype(jnp.float32),
        w2=w2_big.astype(jnp.bfloat16),
        b2=jnp.tile(params["conv2_b"], w_out2).reshape(1, n2).astype(jnp.float32),
        wf1=wf1.astype(jnp.bfloat16),
        bf1=params["fc1_b"].reshape(1, nf1).astype(jnp.float32),
        wf2=wf2.astype(jnp.bfloat16),
        bf2=bf2)
    geom = dict(height=height, width=width, cin=cin, cin_p=cin_p, k1=k1,
                kh1=kh1, kh2=kh2, h_out1=h_out1, h_out2=h_out2,
                n1=n1, n2=n2, nf1=nf1, nout=nout, npad=npad)
    return {"arrays": arrays, "geom": geom}


# ----------------------------------------------------------------------------
# Forward wrapper: tiny input repack + one fused pallas_call over the batch.
# ----------------------------------------------------------------------------
def custom_cnn_forward(x_nchw, prep):
    arr, g = prep["arrays"], prep["geom"]
    n = x_nchw.shape[0]

    # NCHW -> NHWC -> width-folded (N, H, W*cin_p) bf16 rows (a few KB total).
    x = jnp.transpose(x_nchw, (0, 2, 3, 1))
    x = jnp.pad(x, ((0, 0), (0, 0), (0, 0), (0, g["cin_p"] - g["cin"])))
    x = x.reshape(n, g["height"], g["k1"]).astype(jnp.bfloat16)

    kernel = functools.partial(_fused_cnn_kernel,
                               kh1=g["kh1"], kh2=g["kh2"],
                               h_out1=g["h_out1"], h_out2=g["h_out2"])

    def fixed(a):                       # weight/bias: full block, VMEM-resident
        nd = a.ndim
        return pl.BlockSpec(a.shape, lambda i, _nd=nd: (0,) * _nd)

    weights = (arr["w1"], arr["b1"], arr["w2"], arr["b2"],
               arr["wf1"], arr["bf1"], arr["wf2"], arr["bf2"])

    out = pl.pallas_call(
        kernel,
        out_shape=jax.ShapeDtypeStruct((n, 1, g["npad"]), jnp.float32),
        grid=(n,),
        in_specs=[pl.BlockSpec((1, g["height"], g["k1"]), lambda i: (i, 0, 0))]
                 + [fixed(a) for a in weights],
        out_specs=pl.BlockSpec((1, 1, g["npad"]), lambda i: (i, 0, 0)),
        scratch_shapes=[
            pltpu.VMEM((g["h_out1"], g["n1"]), jnp.bfloat16),   # relu(conv1)
            pltpu.VMEM((g["h_out2"], g["n2"]), jnp.bfloat16),   # relu(conv2)
        ],
        compiler_params=pltpu.CompilerParams(
            dimension_semantics=("parallel",)),
    )(x, *weights)

    return out[:, 0, :g["nout"]]


# ----------------------------------------------------------------------------
# Pure-JAX reference (verification only).
# ----------------------------------------------------------------------------
def reference_forward(x_nchw, params):
    dn = ("NCHW", "OIHW", "NCHW")
    y = lax.conv_general_dilated(x_nchw, params["conv1_w"], (1, 1), "VALID",
                                 dimension_numbers=dn)
    y = jnp.maximum(y + params["conv1_b"][None, :, None, None], 0.0)
    y = lax.conv_general_dilated(y, params["conv2_w"], (1, 1), "VALID",
                                 dimension_numbers=dn)
    y = jnp.maximum(y + params["conv2_b"][None, :, None, None], 0.0)
    flat = y.reshape(y.shape[0], -1)
    h = jnp.maximum(flat @ params["fc1_w"].T + params["fc1_b"], 0.0)
    return h @ params["fc2_w"].T + params["fc2_b"]


# ----------------------------------------------------------------------------
# Deterministic parameter init (PyTorch-style uniform(+-1/sqrt(fan_in))).
# fc1 in-features derived from the actual 16x16 test geometry (64*6*6),
# not the 214-based constant hardcoded for 224x224 inputs.
# ----------------------------------------------------------------------------
def init_params(key, h=16, w=16):
    def u(k, shape, fan_in):
        bound = 1.0 / (fan_in ** 0.5)
        return jax.random.uniform(k, shape, jnp.float32, -bound, bound)

    ks = jax.random.split(key, 8)
    h1, w1 = h - 8 + 1, w - 8 + 1          # after conv1 (k=8, s=1)
    h2, w2 = h1 - 4 + 1, w1 - 4 + 1        # after conv2 (k=4, s=1)
    flat = 64 * h2 * w2

    return {
        "conv1_w": u(ks[0], (32, 3, 8, 8), 3 * 8 * 8),
        "conv1_b": u(ks[1], (32,), 3 * 8 * 8),
        "conv2_w": u(ks[2], (64, 32, 4, 4), 32 * 4 * 4),
        "conv2_b": u(ks[3], (64,), 32 * 4 * 4),
        "fc1_w":   u(ks[4], (128, flat), flat),
        "fc1_b":   u(ks[5], (128,), flat),
        "fc2_w":   u(ks[6], (2, 128), 128),
        "fc2_b":   u(ks[7], (2,), 128),
    }


if __name__ == "__main__":
    key = jax.random.PRNGKey(0)
    k_par, k_x = jax.random.split(key)

    params = init_params(k_par, h=16, w=16)
    prep = prepare_params(params, height=16, width=16)   # one-time weight prep
    x = jax.random.normal(k_x, (2, 3, 16, 16), jnp.float32)   # NCHW like PyTorch

    fwd = jax.jit(lambda inp: custom_cnn_forward(inp, prep))
    out = jax.block_until_ready(fwd(x))
    assert out.shape == (2, 2), out.shape

    ref = jax.block_until_ready(reference_forward(x, params))
    max_err = float(jnp.max(jnp.abs(out - ref)))
    assert max_err < 2e-2, f"mismatch vs reference: {max_err}"

    print("KERNEL_OK")
</pallas_src>

<mosaic_0001>
module attributes {stable_mosaic.version = 11 : i64} {
  func.func @_fused_cnn_kernel(%arg0: i32, %arg1: memref<1x16x128xbf16, #tpu.memory_space<vmem>>, %arg2: memref<8x128x288xbf16, #tpu.memory_space<vmem>>, %arg3: memref<1x288xf32, #tpu.memory_space<vmem>>, %arg4: memref<4x288x384xbf16, #tpu.memory_space<vmem>>, %arg5: memref<1x384xf32, #tpu.memory_space<vmem>>, %arg6: memref<6x384x128xbf16, #tpu.memory_space<vmem>>, %arg7: memref<1x128xf32, #tpu.memory_space<vmem>>, %arg8: memref<128x128xbf16, #tpu.memory_space<vmem>>, %arg9: memref<1x128xf32, #tpu.memory_space<vmem>>, %arg10: memref<1x1x128xf32, #tpu.memory_space<vmem>>, %arg11: memref<9x288xbf16, #tpu.memory_space<vmem>>, %arg12: memref<6x384xbf16, #tpu.memory_space<vmem>>) attributes {dimension_semantics = [#tpu.dimension_semantics<parallel>], iteration_bounds = array<i64: 2>, scalar_prefetch = 0 : i64, scratch_operands = 2 : i64, tpu.core_type = #tpu.core_type<tc>, window_params = [{transform_indices = @transform_0, window_bounds = array<i64: 1, 16, 128>}, {pipeline_mode = #tpu.pipeline_mode<synchronous>, transform_indices = @transform_1, window_bounds = array<i64: 8, 128, 288>}, {pipeline_mode = #tpu.pipeline_mode<synchronous>, transform_indices = @transform_2, window_bounds = array<i64: 1, 288>}, {pipeline_mode = #tpu.pipeline_mode<synchronous>, transform_indices = @transform_3, window_bounds = array<i64: 4, 288, 384>}, {pipeline_mode = #tpu.pipeline_mode<synchronous>, transform_indices = @transform_4, window_bounds = array<i64: 1, 384>}, {pipeline_mode = #tpu.pipeline_mode<synchronous>, transform_indices = @transform_5, window_bounds = array<i64: 6, 384, 128>}, {pipeline_mode = #tpu.pipeline_mode<synchronous>, transform_indices = @transform_6, window_bounds = array<i64: 1, 128>}, {pipeline_mode = #tpu.pipeline_mode<synchronous>, transform_indices = @transform_7, window_bounds = array<i64: 128, 128>}, {pipeline_mode = #tpu.pipeline_mode<synchronous>, transform_indices = @transform_8, window_bounds = array<i64: 1, 128>}, {transform_indices = @transform_9, window_bounds = array<i64: 1, 1, 128>}]} {
    %c0 = arith.constant 0 : index
    %c0_0 = arith.constant 0 : index
    %c0_1 = arith.constant 0 : index
    %0 = vector.load %arg1[%c0, %c0_0, %c0_1] : memref<1x16x128xbf16, #tpu.memory_space<vmem>>, vector<1x9x128xbf16>
    %1 = vector.shape_cast %0 : vector<1x9x128xbf16> to vector<9x128xbf16>
    %c0_2 = arith.constant 0 : index
    %c0_3 = arith.constant 0 : index
    %c0_4 = arith.constant 0 : index
    %2 = vector.load %arg2[%c0_2, %c0_3, %c0_4] : memref<8x128x288xbf16, #tpu.memory_space<vmem>>, vector<1x128x288xbf16>
    %3 = vector.shape_cast %2 : vector<1x128x288xbf16> to vector<128x288xbf16>
    %cst = arith.constant dense<0.000000e+00> : vector<9x288xf32>
    %4 = tpu.matmul %1, %3, %cst {dimension_numbers = #tpu.dot_dimension_numbers<[1], [0], [0], [1], [0, 0, 1, 1], [], []>} : vector<9x128xbf16>, vector<128x288xbf16>, vector<9x288xf32> -> vector<9x288xf32>
    %c0_5 = arith.constant 0 : index
    %c1 = arith.constant 1 : index
    %c0_6 = arith.constant 0 : index
    %5 = vector.load %arg1[%c0_5, %c1, %c0_6] : memref<1x16x128xbf16, #tpu.memory_space<vmem>>, vector<1x9x128xbf16>
    %6 = vector.shape_cast %5 : vector<1x9x128xbf16> to vector<9x128xbf16>
    %c1_7 = arith.constant 1 : index
    %c0_8 = arith.constant 0 : index
    %c0_9 = arith.constant 0 : index
    %7 = vector.load %arg2[%c1_7, %c0_8, %c0_9] : memref<8x128x288xbf16, #tpu.memory_space<vmem>>, vector<1x128x288xbf16>
    %8 = vector.shape_cast %7 : vector<1x128x288xbf16> to vector<128x288xbf16>
    %cst_10 = arith.constant dense<0.000000e+00> : vector<9x288xf32>
    %9 = tpu.matmul %6, %8, %cst_10 {dimension_numbers = #tpu.dot_dimension_numbers<[1], [0], [0], [1], [0, 0, 1, 1], [], []>} : vector<9x128xbf16>, vector<128x288xbf16>, vector<9x288xf32> -> vector<9x288xf32>
    %10 = arith.addf %4, %9 : vector<9x288xf32>
    %c0_11 = arith.constant 0 : index
    %c2 = arith.constant 2 : index
    %c0_12 = arith.constant 0 : index
    %11 = vector.load %arg1[%c0_11, %c2, %c0_12] : memref<1x16x128xbf16, #tpu.memory_space<vmem>>, vector<1x9x128xbf16>
    %12 = vector.shape_cast %11 : vector<1x9x128xbf16> to vector<9x128xbf16>
    %c2_13 = arith.constant 2 : index
    %c0_14 = arith.constant 0 : index
    %c0_15 = arith.constant 0 : index
    %13 = vector.load %arg2[%c2_13, %c0_14, %c0_15] : memref<8x128x288xbf16, #tpu.memory_space<vmem>>, vector<1x128x288xbf16>
    %14 = vector.shape_cast %13 : vector<1x128x288xbf16> to vector<128x288xbf16>
    %cst_16 = arith.constant dense<0.000000e+00> : vector<9x288xf32>
    %15 = tpu.matmul %12, %14, %cst_16 {dimension_numbers = #tpu.dot_dimension_numbers<[1], [0], [0], [1], [0, 0, 1, 1], [], []>} : vector<9x128xbf16>, vector<128x288xbf16>, vector<9x288xf32> -> vector<9x288xf32>
    %16 = arith.addf %10, %15 : vector<9x288xf32>
    %c0_17 = arith.constant 0 : index
    %c3 = arith.constant 3 : index
    %c0_18 = arith.constant 0 : index
    %17 = vector.load %arg1[%c0_17, %c3, %c0_18] : memref<1x16x128xbf16, #tpu.memory_space<vmem>>, vector<1x9x128xbf16>
    %18 = vector.shape_cast %17 : vector<1x9x128xbf16> to vector<9x128xbf16>
    %c3_19 = arith.constant 3 : index
    %c0_20 = arith.constant 0 : index
    %c0_21 = arith.constant 0 : index
    %19 = vector.load %arg2[%c3_19, %c0_20, %c0_21] : memref<8x128x288xbf16, #tpu.memory_space<vmem>>, vector<1x128x288xbf16>
    %20 = vector.shape_cast %19 : vector<1x128x288xbf16> to vector<128x288xbf16>
    %cst_22 = arith.constant dense<0.000000e+00> : vector<9x288xf32>
    %21 = tpu.matmul %18, %20, %cst_22 {dimension_numbers = #tpu.dot_dimension_numbers<[1], [0], [0], [1], [0, 0, 1, 1], [], []>} : vector<9x128xbf16>, vector<128x288xbf16>, vector<9x288xf32> -> vector<9x288xf32>
    %22 = arith.addf %16, %21 : vector<9x288xf32>
    %c0_23 = arith.constant 0 : index
    %c4 = arith.constant 4 : index
    %c0_24 = arith.constant 0 : index
    %23 = vector.load %arg1[%c0_23, %c4, %c0_24] : memref<1x16x128xbf16, #tpu.memory_space<vmem>>, vector<1x9x128xbf16>
    %24 = vector.shape_cast %23 : vector<1x9x128xbf16> to vector<9x128xbf16>
    %c4_25 = arith.constant 4 : index
    %c0_26 = arith.constant 0 : index
    %c0_27 = arith.constant 0 : index
    %25 = vector.load %arg2[%c4_25, %c0_26, %c0_27] : memref<8x128x288xbf16, #tpu.memory_space<vmem>>, vector<1x128x288xbf16>
    %26 = vector.shape_cast %25 : vector<1x128x288xbf16> to vector<128x288xbf16>
    %cst_28 = arith.constant dense<0.000000e+00> : vector<9x288xf32>
    %27 = tpu.matmul %24, %26, %cst_28 {dimension_numbers = #tpu.dot_dimension_numbers<[1], [0], [0], [1], [0, 0, 1, 1], [], []>} : vector<9x128xbf16>, vector<128x288xbf16>, vector<9x288xf32> -> vector<9x288xf32>
    %28 = arith.addf %22, %27 : vector<9x288xf32>
    %c0_29 = arith.constant 0 : index
    %c5 = arith.constant 5 : index
    %c0_30 = arith.constant 0 : index
    %29 = vector.load %arg1[%c0_29, %c5, %c0_30] : memref<1x16x128xbf16, #tpu.memory_space<vmem>>, vector<1x9x128xbf16>
    %30 = vector.shape_cast %29 : vector<1x9x128xbf16> to vector<9x128xbf16>
    %c5_31 = arith.constant 5 : index
    %c0_32 = arith.constant 0 : index
    %c0_33 = arith.constant 0 : index
    %31 = vector.load %arg2[%c5_31, %c0_32, %c0_33] : memref<8x128x288xbf16, #tpu.memory_space<vmem>>, vector<1x128x288xbf16>
    %32 = vector.shape_cast %31 : vector<1x128x288xbf16> to vector<128x288xbf16>
    %cst_34 = arith.constant dense<0.000000e+00> : vector<9x288xf32>
    %33 = tpu.matmul %30, %32, %cst_34 {dimension_numbers = #tpu.dot_dimension_numbers<[1], [0], [0], [1], [0, 0, 1, 1], [], []>} : vector<9x128xbf16>, vector<128x288xbf16>, vector<9x288xf32> -> vector<9x288xf32>
    %34 = arith.addf %28, %33 : vector<9x288xf32>
    %c0_35 = arith.constant 0 : index
    %c6 = arith.constant 6 : index
    %c0_36 = arith.constant 0 : index
    %35 = vector.load %arg1[%c0_35, %c6, %c0_36] : memref<1x16x128xbf16, #tpu.memory_space<vmem>>, vector<1x9x128xbf16>
    %36 = vector.shape_cast %35 : vector<1x9x128xbf16> to vector<9x128xbf16>
    %c6_37 = arith.constant 6 : index
    %c0_38 = arith.constant 0 : index
    %c0_39 = arith.constant 0 : index
    %37 = vector.load %arg2[%c6_37, %c0_38, %c0_39] : memref<8x128x288xbf16, #tpu.memory_space<vmem>>, vector<1x128x288xbf16>
    %38 = vector.shape_cast %37 : vector<1x128x288xbf16> to vector<128x288xbf16>
    %cst_40 = arith.constant dense<0.000000e+00> : vector<9x288xf32>
    %39 = tpu.matmul %36, %38, %cst_40 {dimension_numbers = #tpu.dot_dimension_numbers<[1], [0], [0], [1], [0, 0, 1, 1], [], []>} : vector<9x128xbf16>, vector<128x288xbf16>, vector<9x288xf32> -> vector<9x288xf32>
    %40 = arith.addf %34, %39 : vector<9x288xf32>
    %c0_41 = arith.constant 0 : index
    %c7 = arith.constant 7 : index
    %c0_42 = arith.constant 0 : index
    %41 = vector.load %arg1[%c0_41, %c7, %c0_42] : memref<1x16x128xbf16, #tpu.memory_space<vmem>>, vector<1x9x128xbf16>
    %42 = vector.shape_cast %41 : vector<1x9x128xbf16> to vector<9x128xbf16>
    %c7_43 = arith.constant 7 : index
    %c0_44 = arith.constant 0 : index
    %c0_45 = arith.constant 0 : index
    %43 = vector.load %arg2[%c7_43, %c0_44, %c0_45] : memref<8x128x288xbf16, #tpu.memory_space<vmem>>, vector<1x128x288xbf16>
    %44 = vector.shape_cast %43 : vector<1x128x288xbf16> to vector<128x288xbf16>
    %cst_46 = arith.constant dense<0.000000e+00> : vector<9x288xf32>
    %45 = tpu.matmul %42, %44, %cst_46 {dimension_numbers = #tpu.dot_dimension_numbers<[1], [0], [0], [1], [0, 0, 1, 1], [], []>} : vector<9x128xbf16>, vector<128x288xbf16>, vector<9x288xf32> -> vector<9x288xf32>
    %46 = arith.addf %40, %45 : vector<9x288xf32>
    %c0_47 = arith.constant 0 : index
    %c0_48 = arith.constant 0 : index
    %47 = vector.load %arg3[%c0_47, %c0_48] : memref<1x288xf32, #tpu.memory_space<vmem>>, vector<1x288xf32>
    %48 = vector.broadcast %47 : vector<1x288xf32> to vector<9x288xf32>
    %49 = arith.addf %46, %48 : vector<9x288xf32>
    %cst_49 = arith.constant 0.000000e+00 : f32
    %50 = vector.broadcast %cst_49 : f32 to vector<9x288xf32>
    %51 = arith.maximumf %49, %50 : vector<9x288xf32>
    %52 = arith.truncf %51 : vector<9x288xf32> to vector<9x288xbf16>
    %c0_50 = arith.constant 0 : index
    %c0_51 = arith.constant 0 : index
    %53 = vector.load %arg11[%c0_50, %c0_51] : memref<9x288xbf16, #tpu.memory_space<vmem>>, vector<9x288xbf16>
    tpu.vector_store %arg11[%c0_50, %c0_51], %52 {strides = array<i32>} : memref<9x288xbf16, #tpu.memory_space<vmem>>, vector<9x288xbf16>,
    %c0_52 = arith.constant 0 : index
    %c0_53 = arith.constant 0 : index
    %54 = vector.load %arg11[%c0_52, %c0_53] : memref<9x288xbf16, #tpu.memory_space<vmem>>, vector<6x288xbf16>
    %c0_54 = arith.constant 0 : index
    %c0_55 = arith.constant 0 : index
    %c0_56 = arith.constant 0 : index
    %55 = vector.load %arg4[%c0_54, %c0_55, %c0_56] : memref<4x288x384xbf16, #tpu.memory_space<vmem>>, vector<1x288x384xbf16>
    %56 = vector.shape_cast %55 : vector<1x288x384xbf16> to vector<288x384xbf16>
    %cst_57 = arith.constant dense<0.000000e+00> : vector<6x384xf32>
    %57 = tpu.matmul %54, %56, %cst_57 {dimension_numbers = #tpu.dot_dimension_numbers<[1], [0], [0], [1], [0, 0, 1, 1], [], []>} : vector<6x288xbf16>, vector<288x384xbf16>, vector<6x384xf32> -> vector<6x384xf32>
    %c1_58 = arith.constant 1 : index
    %c0_59 = arith.constant 0 : index
    %58 = vector.load %arg11[%c1_58, %c0_59] : memref<9x288xbf16, #tpu.memory_space<vmem>>, vector<6x288xbf16>
    %c1_60 = arith.constant 1 : index
    %c0_61 = arith.constant 0 : index
    %c0_62 = arith.constant 0 : index
    %59 = vector.load %arg4[%c1_60, %c0_61, %c0_62] : memref<4x288x384xbf16, #tpu.memory_space<vmem>>, vector<1x288x384xbf16>
    %60 = vector.shape_cast %59 : vector<1x288x384xbf16> to vector<288x384xbf16>
    %cst_63 = arith.constant dense<0.000000e+00> : vector<6x384xf32>
    %61 = tpu.matmul %58, %60, %cst_63 {dimension_numbers = #tpu.dot_dimension_numbers<[1], [0], [0], [1], [0, 0, 1, 1], [], []>} : vector<6x288xbf16>, vector<288x384xbf16>, vector<6x384xf32> -> vector<6x384xf32>
    %62 = arith.addf %57, %61 : vector<6x384xf32>
    %c2_64 = arith.constant 2 : index
    %c0_65 = arith.constant 0 : index
    %63 = vector.load %arg11[%c2_64, %c0_65] : memref<9x288xbf16, #tpu.memory_space<vmem>>, vector<6x288xbf16>
    %c2_66 = arith.constant 2 : index
    %c0_67 = arith.constant 0 : index
    %c0_68 = arith.constant 0 : index
    %64 = vector.load %arg4[%c2_66, %c0_67, %c0_68] : memref<4x288x384xbf16, #tpu.memory_space<vmem>>, vector<1x288x384xbf16>
    %65 = vector.shape_cast %64 : vector<1x288x384xbf16> to vector<288x384xbf16>
    %cst_69 = arith.constant dense<0.000000e+00> : vector<6x384xf32>
    %66 = tpu.matmul %63, %65, %cst_69 {dimension_numbers = #tpu.dot_dimension_numbers<[1], [0], [0], [1], [0, 0, 1, 1], [], []>} : vector<6x288xbf16>, vector<288x384xbf16>, vector<6x384xf32> -> vector<6x384xf32>
    %67 = arith.addf %62, %66 : vector<6x384xf32>
    %c3_70 = arith.constant 3 : index
    %c0_71 = arith.constant 0 : index
    %68 = vector.load %arg11[%c3_70, %c0_71] : memref<9x288xbf16, #tpu.memory_space<vmem>>, vector<6x288xbf16>
    %c3_72 = arith.constant 3 : index
    %c0_73 = arith.constant 0 : index
    %c0_74 = arith.constant 0 : index
    %69 = vector.load %arg4[%c3_72, %c0_73, %c0_74] : memref<4x288x384xbf16, #tpu.memory_space<vmem>>, vector<1x288x384xbf16>
    %70 = vector.shape_cast %69 : vector<1x288x384xbf16> to vector<288x384xbf16>
    %cst_75 = arith.constant dense<0.000000e+00> : vector<6x384xf32>
    %71 = tpu.matmul %68, %70, %cst_75 {dimension_numbers = #tpu.dot_dimension_numbers<[1], [0], [0], [1], [0, 0, 1, 1], [], []>} : vector<6x288xbf16>, vector<288x384xbf16>, vector<6x384xf32> -> vector<6x384xf32>
    %72 = arith.addf %67, %71 : vector<6x384xf32>
    %c0_76 = arith.constant 0 : index
    %c0_77 = arith.constant 0 : index
    %73 = vector.load %arg5[%c0_76, %c0_77] : memref<1x384xf32, #tpu.memory_space<vmem>>, vector<1x384xf32>
    %74 = vector.broadcast %73 : vector<1x384xf32> to vector<6x384xf32>
    %75 = arith.addf %72, %74 : vector<6x384xf32>
    %cst_78 = arith.constant 0.000000e+00 : f32
    %76 = vector.broadcast %cst_78 : f32 to vector<6x384xf32>
    %77 = arith.maximumf %75, %76 : vector<6x384xf32>
    %78 = arith.truncf %77 : vector<6x384xf32> to vector<6x384xbf16>
    %c0_79 = arith.constant 0 : index
    %c0_80 = arith.constant 0 : index
    %79 = vector.load %arg12[%c0_79, %c0_80] : memref<6x384xbf16, #tpu.memory_space<vmem>>, vector<6x384xbf16>
    tpu.vector_store %arg12[%c0_79, %c0_80], %78 {strides = array<i32>} : memref<6x384xbf16, #tpu.memory_space<vmem>>, vector<6x384xbf16>,
    %c0_81 = arith.constant 0 : index
    %c0_82 = arith.constant 0 : index
    %80 = vector.load %arg12[%c0_81, %c0_82] : memref<6x384xbf16, #tpu.memory_space<vmem>>, vector<1x384xbf16>
    %c0_83 = arith.constant 0 : index
    %c0_84 = arith.constant 0 : index
    %c0_85 = arith.constant 0 : index
    %81 = vector.load %arg6[%c0_83, %c0_84, %c0_85] : memref<6x384x128xbf16, #tpu.memory_space<vmem>>, vector<1x384x128xbf16>
    %82 = vector.shape_cast %81 : vector<1x384x128xbf16> to vector<384x128xbf16>
    %cst_86 = arith.constant dense<0.000000e+00> : vector<1x128xf32>
    %83 = tpu.matmul %80, %82, %cst_86 {dimension_numbers = #tpu.dot_dimension_numbers<[1], [0], [0], [1], [0, 0, 1, 1], [], []>} : vector<1x384xbf16>, vector<384x128xbf16>, vector<1x128xf32> -> vector<1x128xf32>
    %c1_87 = arith.constant 1 : index
    %c0_88 = arith.constant 0 : index
    %84 = vector.load %arg12[%c1_87, %c0_88] : memref<6x384xbf16, #tpu.memory_space<vmem>>, vector<1x384xbf16>
    %c1_89 = arith.constant 1 : index
    %c0_90 = arith.constant 0 : index
    %c0_91 = arith.constant 0 : index
    %85 = vector.load %arg6[%c1_89, %c0_90, %c0_91] : memref<6x384x128xbf16, #tpu.memory_space<vmem>>, vector<1x384x128xbf16>
    %86 = vector.shape_cast %85 : vector<1x384x128xbf16> to vector<384x128xbf16>
    %cst_92 = arith.constant dense<0.000000e+00> : vector<1x128xf32>
    %87 = tpu.matmul %84, %86, %cst_92 {dimension_numbers = #tpu.dot_dimension_numbers<[1], [0], [0], [1], [0, 0, 1, 1], [], []>} : vector<1x384xbf16>, vector<384x128xbf16>, vector<1x128xf32> -> vector<1x128xf32>
    %88 = arith.addf %83, %87 : vector<1x128xf32>
    %c2_93 = arith.constant 2 : index
    %c0_94 = arith.constant 0 : index
    %89 = vector.load %arg12[%c2_93, %c0_94] : memref<6x384xbf16, #tpu.memory_space<vmem>>, vector<1x384xbf16>
    %c2_95 = arith.constant 2 : index
    %c0_96 = arith.constant 0 : index
    %c0_97 = arith.constant 0 : index
    %90 = vector.load %arg6[%c2_95, %c0_96, %c0_97] : memref<6x384x128xbf16, #tpu.memory_space<vmem>>, vector<1x384x128xbf16>
    %91 = vector.shape_cast %90 : vector<1x384x128xbf16> to vector<384x128xbf16>
    %cst_98 = arith.constant dense<0.000000e+00> : vector<1x128xf32>
    %92 = tpu.matmul %89, %91, %cst_98 {dimension_numbers = #tpu.dot_dimension_numbers<[1], [0], [0], [1], [0, 0, 1, 1], [], []>} : vector<1x384xbf16>, vector<384x128xbf16>, vector<1x128xf32> -> vector<1x128xf32>
    %93 = arith.addf %88, %92 : vector<1x128xf32>
    %c3_99 = arith.constant 3 : index
    %c0_100 = arith.constant 0 : index
    %94 = vector.load %arg12[%c3_99, %c0_100] : memref<6x384xbf16, #tpu.memory_space<vmem>>, vector<1x384xbf16>
    %c3_101 = arith.constant 3 : index
    %c0_102 = arith.constant 0 : index
    %c0_103 = arith.constant 0 : index
    %95 = vector.load %arg6[%c3_101, %c0_102, %c0_103] : memref<6x384x128xbf16, #tpu.memory_space<vmem>>, vector<1x384x128xbf16>
    %96 = vector.shape_cast %95 : vector<1x384x128xbf16> to vector<384x128xbf16>
    %cst_104 = arith.constant dense<0.000000e+00> : vector<1x128xf32>
    %97 = tpu.matmul %94, %96, %cst_104 {dimension_numbers = #tpu.dot_dimension_numbers<[1], [0], [0], [1], [0, 0, 1, 1], [], []>} : vector<1x384xbf16>, vector<384x128xbf16>, vector<1x128xf32> -> vector<1x128xf32>
    %98 = arith.addf %93, %97 : vector<1x128xf32>
    %c4_105 = arith.constant 4 : index
    %c0_106 = arith.constant 0 : index
    %99 = vector.load %arg12[%c4_105, %c0_106] : memref<6x384xbf16, #tpu.memory_space<vmem>>, vector<1x384xbf16>
    %c4_107 = arith.constant 4 : index
    %c0_108 = arith.constant 0 : index
    %c0_109 = arith.constant 0 : index
    %100 = vector.load %arg6[%c4_107, %c0_108, %c0_109] : memref<6x384x128xbf16, #tpu.memory_space<vmem>>, vector<1x384x128xbf16>
    %101 = vector.shape_cast %100 : vector<1x384x128xbf16> to vector<384x128xbf16>
    %cst_110 = arith.constant dense<0.000000e+00> : vector<1x128xf32>
    %102 = tpu.matmul %99, %101, %cst_110 {dimension_numbers = #tpu.dot_dimension_numbers<[1], [0], [0], [1], [0, 0, 1, 1], [], []>} : vector<1x384xbf16>, vector<384x128xbf16>, vector<1x128xf32> -> vector<1x128xf32>
    %103 = arith.addf %98, %102 : vector<1x128xf32>
    %c5_111 = arith.constant 5 : index
    %c0_112 = arith.constant 0 : index
    %104 = vector.load %arg12[%c5_111, %c0_112] : memref<6x384xbf16, #tpu.memory_space<vmem>>, vector<1x384xbf16>
    %c5_113 = arith.constant 5 : index
    %c0_114 = arith.constant 0 : index
    %c0_115 = arith.constant 0 : index
    %105 = vector.load %arg6[%c5_113, %c0_114, %c0_115] : memref<6x384x128xbf16, #tpu.memory_space<vmem>>, vector<1x384x128xbf16>
    %106 = vector.shape_cast %105 : vector<1x384x128xbf16> to vector<384x128xbf16>
    %cst_116 = arith.constant dense<0.000000e+00> : vector<1x128xf32>
    %107 = tpu.matmul %104, %106, %cst_116 {dimension_numbers = #tpu.dot_dimension_numbers<[1], [0], [0], [1], [0, 0, 1, 1], [], []>} : vector<1x384xbf16>, vector<384x128xbf16>, vector<1x128xf32> -> vector<1x128xf32>
    %108 = arith.addf %103, %107 : vector<1x128xf32>
    %c0_117 = arith.constant 0 : index
    %c0_118 = arith.constant 0 : index
    %109 = vector.load %arg7[%c0_117, %c0_118] : memref<1x128xf32, #tpu.memory_space<vmem>>, vector<1x128xf32>
    %110 = arith.addf %108, %109 : vector<1x128xf32>
    %cst_119 = arith.constant 0.000000e+00 : f32
    %111 = vector.broadcast %cst_119 : f32 to vector<1x128xf32>
    %112 = arith.maximumf %110, %111 : vector<1x128xf32>
    %113 = arith.truncf %112 : vector<1x128xf32> to vector<1x128xbf16>
    %c0_120 = arith.constant 0 : index
    %c0_121 = arith.constant 0 : index
    %114 = vector.load %arg8[%c0_120, %c0_121] : memref<128x128xbf16, #tpu.memory_space<vmem>>, vector<128x128xbf16>
    %cst_122 = arith.constant dense<0.000000e+00> : vector<1x128xf32>
    %115 = tpu.matmul %113, %114, %cst_122 {dimension_numbers = #tpu.dot_dimension_numbers<[1], [0], [0], [1], [0, 0, 1, 1], [], []>} : vector<1x128xbf16>, vector<128x128xbf16>, vector<1x128xf32> -> vector<1x128xf32>
    %c0_123 = arith.constant 0 : index
    %c0_124 = arith.constant 0 : index
    %116 = vector.load %arg9[%c0_123, %c0_124] : memref<1x128xf32, #tpu.memory_space<vmem>>, vector<1x128xf32>
    %117 = arith.addf %115, %116 : vector<1x128xf32>
    %118 = vector.shape_cast %117 : vector<1x128xf32> to vector<1x1x128xf32>
    %c0_125 = arith.constant 0 : index
    %c0_126 = arith.constant 0 : index
    %c0_127 = arith.constant 0 : index
    %119 = vector.load %arg10[%c0_125, %c0_126, %c0_127] : memref<1x1x128xf32, #tpu.memory_space<vmem>>, vector<1x1x128xf32>
    tpu.vector_store %arg10[%c0_125, %c0_126, %c0_127], %118 {strides = array<i32>} : memref<1x1x128xf32, #tpu.memory_space<vmem>>, vector<1x1x128xf32>,
    return
  }
  func.func @transform_0(%arg0: i32) -> (i32, i32, i32) {
    %c0_i32 = arith.constant 0 : i32
    %c0_i32_0 = arith.constant 0 : i32
    %c0_i32_1 = arith.constant 0 : i32
    return %arg0, %c0_i32, %c0_i32_0 : i32, i32, i32
  }
  func.func @transform_1(%arg0: i32) -> (i32, i32, i32) {
    %c0_i32 = arith.constant 0 : i32
    %c0_i32_0 = arith.constant 0 : i32
    %c0_i32_1 = arith.constant 0 : i32
    %c0_i32_2 = arith.constant 0 : i32
    return %c0_i32, %c0_i32_0, %c0_i32_1 : i32, i32, i32
  }
  func.func @transform_2(%arg0: i32) -> (i32, i32) {
    %c0_i32 = arith.constant 0 : i32
    %c0_i32_0 = arith.constant 0 : i32
    %c0_i32_1 = arith.constant 0 : i32
    return %c0_i32, %c0_i32_0 : i32, i32
  }
  func.func @transform_3(%arg0: i32) -> (i32, i32, i32) {
    %c0_i32 = arith.constant 0 : i32
    %c0_i32_0 = arith.constant 0 : i32
    %c0_i32_1 = arith.constant 0 : i32
    %c0_i32_2 = arith.constant 0 : i32
    return %c0_i32, %c0_i32_0, %c0_i32_1 : i32, i32, i32
  }
  func.func @transform_4(%arg0: i32) -> (i32, i32) {
    %c0_i32 = arith.constant 0 : i32
    %c0_i32_0 = arith.constant 0 : i32
    %c0_i32_1 = arith.constant 0 : i32
    return %c0_i32, %c0_i32_0 : i32, i32
  }
  func.func @transform_5(%arg0: i32) -> (i32, i32, i32) {
    %c0_i32 = arith.constant 0 : i32
    %c0_i32_0 = arith.constant 0 : i32
    %c0_i32_1 = arith.constant 0 : i32
    %c0_i32_2 = arith.constant 0 : i32
    return %c0_i32, %c0_i32_0, %c0_i32_1 : i32, i32, i32
  }
  func.func @transform_6(%arg0: i32) -> (i32, i32) {
    %c0_i32 = arith.constant 0 : i32
    %c0_i32_0 = arith.constant 0 : i32
    %c0_i32_1 = arith.constant 0 : i32
    return %c0_i32, %c0_i32_0 : i32, i32
  }
  func.func @transform_7(%arg0: i32) -> (i32, i32) {
    %c0_i32 = arith.constant 0 : i32
    %c0_i32_0 = arith.constant 0 : i32
    %c0_i32_1 = arith.constant 0 : i32
    return %c0_i32, %c0_i32_0 : i32, i32
  }
  func.func @transform_8(%arg0: i32) -> (i32, i32) {
    %c0_i32 = arith.constant 0 : i32
    %c0_i32_0 = arith.constant 0 : i32
    %c0_i32_1 = arith.constant 0 : i32
    return %c0_i32, %c0_i32_0 : i32, i32
  }
  func.func @transform_9(%arg0: i32) -> (i32, i32, i32) {
    %c0_i32 = arith.constant 0 : i32
    %c0_i32_0 = arith.constant 0 : i32
    %c0_i32_1 = arith.constant 0 : i32
    return %arg0, %c0_i32, %c0_i32_0 : i32, i32, i32
  }
}

</mosaic_0001>

<bundles_post_ra>
// kernel: _lambda_.1
= control target key start
LH: loop header
LB: loop body
LE: loop exit
PB: predicated region body
PF: predicated region fallthrough
CT: control target
= control target key end

     0   :  { %14 = vsyncpa [#allocation5], 0  ;;  %s11653_s0 = inlined_call_operand.vmem [shape: bf16[2,16,128], index: 0, kind: input, shape index: {}]   ;;  %s11654_s1 = inlined_call_operand.vmem [shape: bf16[8,128,288], index: 1, kind: input, shape index: {}]   ;;  %s11655_s2 = inlined_call_operand.vmem [shape: f32[1,288], index: 2, kind: input, shape index: {}]   ;;  %s11656_s3 = inlined_call_operand.vmem [shape: bf16[4,288,384], index: 3, kind: input, shape index: {}]   ;;  %s11657_s4 = inlined_call_operand.vmem [shape: f32[1,384], index: 4, kind: input, shape index: {}]   ;;  %s11658_s5 = inlined_call_operand.vmem [shape: bf16[6,384,128], index: 5, kind: input, shape index: {}]   ;;  %s11659_s6 = inlined_call_operand.vmem [shape: f32[1,128], index: 6, kind: input, shape index: {}]   ;;  %s11660_s7 = inlined_call_operand.vmem [shape: bf16[128,128], index: 7, kind: input, shape index: {}]   ;;  %s11661_s8 = inlined_call_operand.vmem [shape: f32[1,128], index: 8, kind: input, shape index: {}]   ;;  %s11662_s9 = inlined_call_operand.hbm [shape: f32[2,1,128], index: 9, kind: output, shape index: {}]  }
   0x1   :  { %16 = vsyncpa [#allocation5 + $0x1], 0  ;;  %s9524_s30 = smov 0   ;;  %s9526_s10 = smov 0  }
   0x2   :  { %s9528_s11 = smov 0   ;;  %s9530_s12 = smov 0  }
   0x3 LB: > { %s9545_s13 = sadd.s32 4294967295, %s9468_s12   ;;  %s6620_s14 = sadd.s32 4294967294, %s9468_s12   ;;  %s9468_s12 = sphi %s9530_s12, %s11672_s12   ;;  %s9464_s11 = sphi %s9528_s11, %s11671_s11   ;;  %s9460_s10 = sphi %s9526_s10, %s11670_s10   ;;  %s9456_s30 = sphi %s9524_s30, %s11669_s30  }
   0x4   : > { %s9549_s15 = sadd.s32 1, %s9468_s12   ;;  %s223_s16 = sadd.s32 1, %s9464_s11 }
   0x5   : > { %s220_s17 = ssub.s32 %s9468_s12, %s9549_s15  ;;  %p233_p0 = scmp.ne.s32.totalorder %s9464_s11, %s9460_s10 }
   0x6   : > { %p221_p1 = scmp.eq.s32.totalorder %s220_s17, 0  ;;  %p234_p2 = scmp.eq.s32.totalorder %s9545_s13, 1 }
   0x7   : > { %p239_p3 = scmp.ne.s32.totalorder %s9460_s10, %s9456_s30  ;;  %p240_p4 = scmp.eq.s32.totalorder %s6620_s14, 1 }
   0x8   : > { %s9560_s18 = scalar_select %p221_p1, %s9464_s11, %s223_s16  }
   0x9   : > { %p9562_p5 = por %p234_p2, %p233_p0  ;;  %p9566_p6 = por %p240_p4, %p239_p3 }
   0xa   : > { %p6623_p7 = scmp.ge.s32.totalorder %s9468_s12, 1  ;;  %p290_p8 = scmp.lt.s32.totalorder %s9468_s12, 3 }
   0xc   : > { %p291_p9 = pnand %p6623_p7, %p290_p8 }
   0xd   : > { %v8684_v0 = vld [vmem:[%s11654_s1 + $0xc4] ss:$12 sps:$4 sm:$0xff] (!%p291_p9)   ;;  %v9470_v1 = vmov (!%p291_p9), 0.0   ;;  %v8686_v2 = vld [vmem:[%s11654_s1 + $0xc8] ss:$12 sps:$4 sm:$0xff] (!%p291_p9)   ;;  %vm9471_vm0 = vmmov (!%p291_p9), 0  }
   0xe   : > { %294 = sbr.rel (%p291_p9) target bundleno = 1585 (0x631), region = 56  ;;  %8282 = vmatprep.subr.bf16.mxu1 (!%p291_p9), %v9470_v1  ;;  %8298 = vmatprep.mubr.msk.bf16.mxu1 (!%p291_p9), %vm9471_vm0, %v9470_v1  ;;  %v8687_v3 = vld [vmem:[%s11654_s1 + $0xc0] ss:$12 sps:$4 sm:$0xff] (!%p291_p9)   ;;  %v8688_v4 = vld [vmem:[%s11654_s1 + $0xdc] ss:$12 sps:$4 sm:$0xff] (!%p291_p9)   ;;  %v9472_v5 = vmov (!%p291_p9), 0  }
   0xf   : > { %539 = vmatprep.subr.bf16.mxu0 (!%p291_p9), %v8684_v0  ;;  %8283 = vmatpush3.bf16.msra.mxu1 (!%p291_p9), %v8686_v2  ;;  %v8690_v6 = vld [vmem:[%s11654_s1 + $0xe0] ss:$12 sps:$4 sm:$0xff] (!%p291_p9)   ;;  %v8691_v7 = vld [vmem:[%s11654_s1 + $0xd8] ss:$12 sps:$4 sm:$0xff] (!%p291_p9)   ;;  %p325_p10 = scmp.lt.s32.totalorder (!%p291_p9), %s9545_s13, 1  ;;  %vm2448_vm2 = vcmask (!%p291_p9), 1040384  }
  0x10   : > { %571 = vmatprep.mubr.bf16.mxu0 (!%p291_p9), %v9472_v5  ;;  %540 = vmatpush1.bf16.msra.mxu0 (!%p291_p9), %v8687_v3  ;;  %v8692_v8 = vld [vmem:[%s11654_s1 + $0xf4] ss:$12 sps:$4 sm:$0xff] (!%p291_p9)   ;;  %v8694_v9 = vld [vmem:[%s11654_s1 + $0xf8] ss:$12 sps:$4 sm:$0xff] (!%p291_p9)   ;;  %v8695_v10 = vld [vmem:[%s11654_s1 + $0xf0] ss:$12 sps:$4 sm:$0xff] (!%p291_p9)  }
  0x11   : > { %8284 = vmatprep.subr.bf16.mxu1 (!%p291_p9), %v9470_v1  ;;  %541 = vmatprep.subr.bf16.mxu0 (!%p291_p9), %v8688_v4  ;;  %v8696_v11 = vld [vmem:[%s11654_s1 + $0x10c] ss:$12 sps:$4 sm:$0xff] (!%p291_p9)   ;;  %v8698_v12 = vld [vmem:[%s11654_s1 + $0x110] ss:$12 sps:$4 sm:$0xff] (!%p291_p9)   ;;  %v8699_v13 = vld [vmem:[%s11654_s1 + $0x108] ss:$12 sps:$4 sm:$0xff] (!%p291_p9)  }
  0x12   : > { %v8700_v14 = vld [vmem:[%s11654_s1 + $0x124] ss:$12 sps:$4 sm:$0xff] (!%p291_p9)   ;;  %v8702_v15 = vld [vmem:[%s11654_s1 + $0x128] ss:$12 sps:$4 sm:$0xff] (!%p291_p9)   ;;  %v8703_v16 = vld [vmem:[%s11654_s1 + $0x120] ss:$12 sps:$4 sm:$0xff] (!%p291_p9)  }
  0x13   : > { %8285 = vmatpush3.bf16.msra.mxu1 (!%p291_p9), %v8690_v6  ;;  %v8704_v17 = vld [vmem:[%s11654_s1 + $0x13c] ss:$12 sps:$4 sm:$0xff] (!%p291_p9)   ;;  %v8706_v18 = vld [vmem:[%s11654_s1 + $0x140] ss:$12 sps:$4 sm:$0xff] (!%p291_p9)   ;;  %v8707_v20 = vld [vmem:[%s11654_s1 + $0x138] ss:$12 sps:$4 sm:$0xff] (!%p291_p9)  }
  0x14   : > { %542 = vmatpush1.bf16.msra.mxu0 (!%p291_p9), %v8691_v7  ;;  %8286 = vmatprep.subr.bf16.mxu1 (!%p291_p9), %v9470_v1  ;;  %v8708_v21 = vld [vmem:[%s11654_s1 + $0x154] ss:$12 sps:$4 sm:$0xff] (!%p291_p9)   ;;  %v8710_v23 = vld [vmem:[%s11654_s1 + $0x158] ss:$12 sps:$4 sm:$0xff] (!%p291_p9)   ;;  %v8711_v24 = vld [vmem:[%s11654_s1 + $0x150] ss:$12 sps:$4 sm:$0xff] (!%p291_p9)  }
  0x15   : > { %543 = vmatprep.subr.bf16.mxu0 %v8692_v8  ;;  %s326_s29 = scalar_select %p325_p10, %s9545_s13, 1  ;;  %v8712_v25 = vld [vmem:[%s11654_s1 + $0x16c] ss:$12 sps:$4 sm:$0xff]   ;;  %v8714_v28 = vld [vmem:[%s11654_s1 + $0x170] ss:$12 sps:$4 sm:$0xff]   ;;  %vm2451_vm3 = vcmask 1044484  }
  0x16   : > { %v8715_v29 = vld [vmem:[%s11654_s1 + $0x168] ss:$12 sps:$4 sm:$0xff]   ;;  %v8719_v30 = vld [vmem:[%s11654_s1 + $0x4] ss:$12 sps:$4 sm:$0xff]   ;;  %v8717_v33 = vld [vmem:[%s11654_s1] ss:$12 sps:$4 sm:$0xff]  }
  0x17   : > { %8287 = vmatpush3.bf16.msra.mxu1 %v8694_v9  ;;  %s7908_s24 = sshll.u32 %s326_s29, 3  ;;  %v8720_v32 = vld [vmem:[%s11654_s1 + $0x8] ss:$12 sps:$4 sm:$0xff]   ;;  %v8724_v35 = vld [vmem:[%s11654_s1 + $0x20] ss:$12 sps:$4 sm:$0xff]   ;;  %vm2458_vm5 = vcmask 253952  }
  0x18   : > { %544 = vmatpush1.bf16.msra.mxu0 %v8695_v10  ;;  %8288 = vmatprep.subr.bf16.mxu1 %v9470_v1  ;;  %s9630_s17 = scalar_lea.vmem %s11653_s0, %s7908_s24  ;;  %v8723_v34 = vld [vmem:[%s11654_s1 + $0x1c] ss:$12 sps:$4 sm:$0xff]   ;;  %v8721_v36 = vld [vmem:[%s11654_s1 + $0x18] ss:$12 sps:$4 sm:$0xff]   ;;  %v8727_v37 = vld [vmem:[%s11654_s1 + $0x34] ss:$12 sps:$4 sm:$0xff]  }
  0x19   : > { %545 = vmatprep.subr.bf16.mxu0 %v8696_v11  ;;  %v9639_v19 = vld [vmem:[%s9630_s17] sm:$0x1f]   ;;  %v8725_v39 = vld [vmem:[%s11654_s1 + $0x30] ss:$12 sps:$4 sm:$0xff]   ;;  %v8731_v40 = vld [vmem:[%s11654_s1 + $0x4c] ss:$12 sps:$4 sm:$0xff]  }
  0x1a   : > { %v406_v22 = vshll.u32 %v9639_v19, 16  ;;  %v404_v26 = vshrl.u32 %v9639_v19, 16  ;;  %v8728_v38 = vld [vmem:[%s11654_s1 + $0x38] ss:$12 sps:$4 sm:$0xff]   ;;  %v8732_v41 = vld [vmem:[%s11654_s1 + $0x50] ss:$12 sps:$4 sm:$0xff]  }
  0x1b   : > { %8289 = vmatpush3.bf16.msra.mxu1 %v8698_v12  ;;  %v8729_v42 = vld [vmem:[%s11654_s1 + $0x48] ss:$12 sps:$4 sm:$0xff]   ;;  %v8735_v43 = vld [vmem:[%s11654_s1 + $0x64] ss:$12 sps:$4 sm:$0xff]   ;;  %v8733_v45 = vld [vmem:[%s11654_s1 + $0x60] ss:$12 sps:$4 sm:$0xff]  }
  0x1c   : > { %546 = vmatpush1.bf16.msra.mxu0 %v8699_v13  ;;  %8290 = vmatprep.subr.bf16.mxu1 %v9470_v1  ;;  %v408_v27 = vrot.slane %v406_v22, 1  ;;  %v8736_v44 = vld [vmem:[%s11654_s1 + $0x68] ss:$12 sps:$4 sm:$0xff]   ;;  %v8740_v47 = vld [vmem:[%s11654_s1 + $0x80] ss:$12 sps:$4 sm:$0xff]   ;;  %vm2446_vm8 = vcmask 257024  }
  0x1d   : > { %547 = vmatprep.subr.bf16.mxu0 %v8700_v14  ;;  %v8739_v46 = vld [vmem:[%s11654_s1 + $0x7c] ss:$12 sps:$4 sm:$0xff]   ;;  %v8737_v48 = vld [vmem:[%s11654_s1 + $0x78] ss:$12 sps:$4 sm:$0xff]   ;;  %v8743_v49 = vld [vmem:[%s11654_s1 + $0x94] ss:$12 sps:$4 sm:$0xff]  }
  0x1e   : > { %v409_v31 = vor.u32 %v408_v27, %v404_v26  ;;  %v8744_v50 = vld [vmem:[%s11654_s1 + $0x98] ss:$12 sps:$4 sm:$0xff]   ;;  %v8741_v51 = vld [vmem:[%s11654_s1 + $0x90] ss:$12 sps:$4 sm:$0xff]   ;;  %v8745_v54 = vld [vmem:[%s11654_s1 + $0xa8] ss:$12 sps:$4 sm:$0xff]  }
  0x1f   : > { %8291 = vmatpush3.bf16.msra.mxu1 %v8702_v15  ;;  %v8747_v52 = vld [vmem:[%s11654_s1 + $0xac] ss:$12 sps:$4 sm:$0xff]   ;;  %v8748_v53 = vld [vmem:[%s11654_s1 + $0xb0] ss:$12 sps:$4 sm:$0xff]   ;;  %v8752_v56 = vld [vmem:[%s11654_s1 + $0x188] ss:$12 sps:$4 sm:$0xff]  }
  0x20   : > { %548 = vmatpush1.bf16.msra.mxu0 %v8703_v16  ;;  %8292 = vmatprep.subr.bf16.mxu1 %v9470_v1  ;;  %v8751_v55 = vld [vmem:[%s11654_s1 + $0x184] ss:$12 sps:$4 sm:$0xff]   ;;  %v8749_v57 = vld [vmem:[%s11654_s1 + $0x180] ss:$12 sps:$4 sm:$0xff]   ;;  %v8755_v58 = vld [vmem:[%s11654_s1 + $0x19c] ss:$12 sps:$4 sm:$0xff]  }
  0x21   : > { %549 = vmatprep.subr.bf16.mxu0 %v8704_v17  ;;  %v8756_v59 = vld [vmem:[%s11654_s1 + $0x1a0] ss:$12 sps:$4 sm:$0xff]   ;;  %v8753_v60 = vld [vmem:[%s11654_s1 + $0x198] ss:$12 sps:$4 sm:$0xff]   ;;  %v8757_v63 = vld [vmem:[%s11654_s1 + $0x1b0] ss:$12 sps:$4 sm:$0xff]  }
  0x22   : > { %v8759_v61 = vld [vmem:[%s11654_s1 + $0x1b4] ss:$12 sps:$4 sm:$0xff]   ;;  %v8760_v62 = vld [vmem:[%s11654_s1 + $0x1b8] ss:$12 sps:$4 sm:$0xff]   ;;  %v8764_v2 = vld [vmem:[%s11654_s1 + $0x1d0] ss:$12 sps:$4 sm:$0xff]  }
  0x23   : > { %8293 = vmatpush3.bf16.msra.mxu1 %v8706_v18  ;;  %v8763_v0 = vld [vmem:[%s11654_s1 + $0x1cc] ss:$12 sps:$4 sm:$0xff]   ;;  %v8761_v3 = vld [vmem:[%s11654_s1 + $0x1c8] ss:$12 sps:$4 sm:$0xff]   ;;  %v8767_v4 = vld [vmem:[%s11654_s1 + $0x1e4] ss:$12 sps:$4 sm:$0xff]  }
  0x24   : > { %550 = vmatpush1.bf16.msra.mxu0 %v8707_v20  ;;  %8294 = vmatprep.subr.bf16.mxu1 %v9470_v1  ;;  %v8768_v6 = vld [vmem:[%s11654_s1 + $0x1e8] ss:$12 sps:$4 sm:$0xff]   ;;  %v8765_v7 = vld [vmem:[%s11654_s1 + $0x1e0] ss:$12 sps:$4 sm:$0xff]   ;;  %v8769_v10 = vld [vmem:[%s11654_s1 + $0x1f8] ss:$12 sps:$4 sm:$0xff]  }
  0x25   : > { %551 = vmatprep.subr.bf16.mxu0 %v8708_v21  ;;  %v8771_v8 = vld [vmem:[%s11654_s1 + $0x1fc] ss:$12 sps:$4 sm:$0xff]   ;;  %v8772_v9 = vld [vmem:[%s11654_s1 + $0x200] ss:$12 sps:$4 sm:$0xff]   ;;  %v8776_v12 = vld [vmem:[%s11654_s1 + $0x218] ss:$12 sps:$4 sm:$0xff]  }
  0x26   : > { %v8775_v11 = vld [vmem:[%s11654_s1 + $0x214] ss:$12 sps:$4 sm:$0xff]   ;;  %v8773_v13 = vld [vmem:[%s11654_s1 + $0x210] ss:$12 sps:$4 sm:$0xff]   ;;  %v8779_v14 = vld [vmem:[%s11654_s1 + $0x22c] ss:$12 sps:$4 sm:$0xff]  }
  0x27   : > { %8295 = vmatpush3.bf16.msra.mxu1 %v8710_v23  ;;  %v9829_v15 = vld [vmem:[%s9630_s17] sm:$0x3e]   ;;  %v8780_v16 = vld [vmem:[%s11654_s1 + $0x230] ss:$12 sps:$4 sm:$0xff]   ;;  %v8777_v17 = vld [vmem:[%s11654_s1 + $0x228] ss:$12 sps:$4 sm:$0xff]  }
  0x28   : > { %552 = vmatpush1.bf16.msra.mxu0 %v8711_v24  ;;  %8296 = vmatprep.subr.bf16.mxu1 %v9470_v1  ;;  %v8784_v18 = vld [vmem:[%s11654_s1 + $0x244] ss:$12 sps:$4 sm:$0xff]   ;;  %v8785_v20 = vld [vmem:[%s11654_s1 + $0x248] ss:$12 sps:$4 sm:$0xff]   ;;  %v8782_v21 = vld [vmem:[%s11654_s1 + $0x240] ss:$12 sps:$4 sm:$0xff]  }
  0x29   : > { %553 = vmatprep.subr.bf16.mxu0 %v8712_v25  ;;  %v8788_v22 = vld [vmem:[%s11654_s1 + $0x25c] ss:$12 sps:$4 sm:$0xff]   ;;  %v8789_v23 = vld [vmem:[%s11654_s1 + $0x260] ss:$12 sps:$4 sm:$0xff]   ;;  %v8786_v24 = vld [vmem:[%s11654_s1 + $0x258] ss:$12 sps:$4 sm:$0xff]  }
  0x2a   : > { %v8792_v25 = vld [vmem:[%s11654_s1 + $0x274] ss:$12 sps:$4 sm:$0xff]   ;;  %v8793_v26 = vld [vmem:[%s11654_s1 + $0x278] ss:$12 sps:$4 sm:$0xff]   ;;  %v8790_v27 = vld [vmem:[%s11654_s1 + $0x270] ss:$12 sps:$4 sm:$0xff]  }
  0x2b   : > { %8297 = vmatpush3.bf16.msra.mxu1 %v8714_v28  ;;  %v8796_v28 = vld [vmem:[%s11654_s1 + $0x28c] ss:$12 sps:$4 sm:$0xff]   ;;  %vm2449_vm1 = vsmask.f32 256  ;;  %vm2452_vm4 = vsmask.f32 4352 }
  0x2c   : > { %554 = vmatpush1.bf16.msra.mxu0 %v8715_v29  ;;  %8302 = vmatprep.subr.bf16.mxu1 %v9470_v1  ;;  %v8797_v29 = vld [vmem:[%s11654_s1 + $0x290] ss:$12 sps:$4 sm:$0xff]   ;;  %vm10394_vm6 = vmand %vm2448_vm2, %vm2449_vm1  ;;  %vm2931_vm11 = vcmask 261120   ;;  %s323_s27 = sand.u32 1, %s9460_s10   ;;  %s7905_s16 = sshll.u32 %s9545_s13, 4 }
  0x2d   : > { %752 = vmatprep.subr.bf16.mxu0 %v8719_v30  ;;  %v8794_v30 = vld [vmem:[%s11654_s1 + $0x288] ss:$12 sps:$4 sm:$0xff]   ;;  %vm10400_vm7 = vmand %vm2451_vm3, %vm2452_vm4  ;;  %s11611_s23 = scalar_lea.hbm %s11662_s9, %s7905_s16  ;;  %s6553_s25 = scalar_lea.sflag [#allocation5], %s323_s27 }
  0x2e   : > { %8299 = vmatmul.mubr.bf16.vlgmr.msra.gmra.mrb[0].mxu1 %v409_v31  ;;  %vm2459_vm9 = vmand %vm2458_vm5, %vm2449_vm1  ;;  %s9473_s26 = smov [#allocation4]  }
  0x2f   : > { %8303 = vmatpush3.bf16.msra.mxu1 %v8720_v32  ;;  %572 = vmatmul.mubr.bf16.vlgmr.msra.gmra.mrb[0].mxu0 %v409_v31  ;;  %v8800_v31 = vld [vmem:[%s11654_s1 + $0x2a4] ss:$12 sps:$4 sm:$0xff]   ;;  %v8801_v32 = vld [vmem:[%s11654_s1 + $0x2a8] ss:$12 sps:$4 sm:$0xff]   ;;  %vm2454_vm10 = vmor %vm10400_vm7, %vm10394_vm6  ;;  %s9410_s24 = sshll.u32 %s9473_s26, 4  ;;  %s9411_s24 = int_to_ptr.vmem [resolvable:$false] %s9410_s24 }
  0x30   : > { %753 = vmatpush1.bf16.msra.mxu0 %v8717_v33  ;;  %8304 = vmatprep.subr.bf16.mxu1 %v9470_v1  ;;  %v8798_v33 = vld [vmem:[%s11654_s1 + $0x2a0] ss:$12 sps:$4 sm:$0xff]   ;;  %s9412_s28 = scalar_lea.vmem %s9411_s24, 32 }
  0x31   : > { %754 = vmatprep.subr.bf16.mxu0 %v8723_v34  ;;  %8318 = vmatprep.mubr.msk.bf16.mxu1 %vm9471_vm0, %v9470_v1  ;;  %v8804_v34 = vld [vmem:[%s11654_s1 + $0x2bc] ss:$12 sps:$4 sm:$0xff]  }
  0x32   : > { %784 = vmatprep.mubr.bf16.mxu0 %v9472_v5 }
  0x33   : > { %8305 = vmatpush3.bf16.msra.mxu1 %v8724_v35  ;;  %v8805_v35 = vld [vmem:[%s11654_s1 + $0x2c0] ss:$12 sps:$4 sm:$0xff]  }
  0x34   : > { %755 = vmatpush1.bf16.msra.mxu0 %v8721_v36  ;;  %8306 = vmatprep.subr.bf16.mxu1 %v9470_v1  ;;  %v8802_v36 = vld [vmem:[%s11654_s1 + $0x2b8] ss:$12 sps:$4 sm:$0xff]  }
  0x35   : > { %756 = vmatprep.subr.bf16.mxu0 %v8727_v37  ;;  %v8808_v37 = vld [vmem:[%s11654_s1 + $0x2d4] ss:$12 sps:$4 sm:$0xff]  }
  0x37   : > { %8307 = vmatpush3.bf16.msra.mxu1 %v8728_v38  ;;  %v1130_v38 = vshrl.u32 %v9829_v15, 16 }
  0x38   : > { %757 = vmatpush1.bf16.msra.mxu0 %v8725_v39  ;;  %8308 = vmatprep.subr.bf16.mxu1 %v9470_v1  ;;  %v1133_v39 = vshll.u32 %v9829_v15, 16 }
  0x39   : > { %758 = vmatprep.subr.bf16.mxu0 %v8731_v40  ;;  %v8809_v40 = vld [vmem:[%s11654_s1 + $0x2d8] ss:$12 sps:$4 sm:$0xff]  }
  0x3b   : > { %8309 = vmatpush3.bf16.msra.mxu1 %v8732_v41  ;;  %v8806_v41 = vld [vmem:[%s11654_s1 + $0x2d0] ss:$12 sps:$4 sm:$0xff]  }
  0x3c   : > { %759 = vmatpush1.bf16.msra.mxu0 %v8729_v42  ;;  %8310 = vmatprep.subr.bf16.mxu1 %v9470_v1  ;;  %v8812_v42 = vld [vmem:[%s11654_s1 + $0x2ec] ss:$12 sps:$4 sm:$0xff]  }
  0x3d   : > { %760 = vmatprep.subr.bf16.mxu0 %v8735_v43  ;;  %v1132_v43 = vrot.slane %v1130_v38, 1  ;;  %v8878_v38 = vld [vmem:[%s11654_s1 + $0x470] ss:$12 sps:$4 sm:$0xff]  }
  0x3f   : > { %8311 = vmatpush3.bf16.msra.mxu1 %v8736_v44  ;;  %v1135_v44 = vrot.slane %v1133_v39, 2  ;;  %v8875_v39 = vld [vmem:[%s11654_s1 + $0x468] ss:$12 sps:$4 sm:$0xff]  }
  0x40   : > { %761 = vmatpush1.bf16.msra.mxu0 %v8733_v45  ;;  %8312 = vmatprep.subr.bf16.mxu1 %v9470_v1  ;;  %v8813_v45 = vld [vmem:[%s11654_s1 + $0x2f0] ss:$12 sps:$4 sm:$0xff]  }
  0x41   : > { %762 = vmatprep.subr.bf16.mxu0 %v8739_v46  ;;  %v8810_v46 = vld [vmem:[%s11654_s1 + $0x2e8] ss:$12 sps:$4 sm:$0xff]  }
  0x43   : > { %8313 = vmatpush3.bf16.msra.mxu1 %v8740_v47  ;;  %v8816_v47 = vld [vmem:[%s11654_s1 + $0x304] ss:$12 sps:$4 sm:$0xff]  }
  0x44   : > { %763 = vmatpush1.bf16.msra.mxu0 %v8737_v48  ;;  %8314 = vmatprep.subr.bf16.mxu1 %v9470_v1  ;;  %v1136_v48 = vor.u32 %v1135_v44, %v1132_v43  ;;  %v8879_v43 = vld [vmem:[%s11654_s1 + $0x480] ss:$12 sps:$4 sm:$0xff]   ;;  %v8885_v44 = vld [vmem:[%s11654_s1 + $0x49c] ss:$12 sps:$4 sm:$0xff]  }
  0x45   : > { %764 = vmatprep.subr.bf16.mxu0 %v8743_v49  ;;  %v8817_v49 = vld [vmem:[%s11654_s1 + $0x308] ss:$12 sps:$4 sm:$0xff]  }
  0x47   : > { %8315 = vmatpush3.bf16.msra.mxu1 %v8744_v50  ;;  %v8814_v50 = vld [vmem:[%s11654_s1 + $0x300] ss:$12 sps:$4 sm:$0xff]  }
  0x48   : > { %765 = vmatpush1.bf16.msra.mxu0 %v8741_v51  ;;  %8316 = vmatprep.subr.bf16.mxu1 %v9470_v1  ;;  %v8820_v51 = vld [vmem:[%s11654_s1 + $0x31c] ss:$12 sps:$4 sm:$0xff]  }
  0x49   : > { %766 = vmatprep.subr.bf16.mxu0 %v8747_v52  ;;  %v8821_v52 = vld [vmem:[%s11654_s1 + $0x320] ss:$12 sps:$4 sm:$0xff]  }
  0x4b   : > { %8317 = vmatpush3.bf16.msra.mxu1 %v8748_v53  ;;  %v8818_v53 = vld [vmem:[%s11654_s1 + $0x318] ss:$12 sps:$4 sm:$0xff]  }
  0x4c   : > { %767 = vmatpush1.bf16.msra.mxu0 %v8745_v54  ;;  %8322 = vmatprep.subr.bf16.mxu1 %v9470_v1  ;;  %v8824_v54 = vld [vmem:[%s11654_s1 + $0x334] ss:$12 sps:$4 sm:$0xff]  }
  0x4d   : > { %1006 = vmatprep.subr.bf16.mxu0 %v8751_v55  ;;  %v8825_v55 = vld [vmem:[%s11654_s1 + $0x338] ss:$12 sps:$4 sm:$0xff]  }
  0x4e   : > { %8319 = vmatmul.mubr.bf16.vlgmr.msra.gmra.mrb[4].mxu1 %v9639_v19 }
  0x4f   : > { %8323 = vmatpush3.bf16.msra.mxu1 %v8752_v56  ;;  %785 = vmatmul.mubr.bf16.vlgmr.msra.gmra.mrb[0].mxu0 %v9639_v19  ;;  %v876_v19 = vrot.slane %v9829_v15, 1  ;;  %v8822_v56 = vld [vmem:[%s11654_s1 + $0x330] ss:$12 sps:$4 sm:$0xff]  }
  0x50   : > { %1007 = vmatpush1.bf16.msra.mxu0 %v8749_v57  ;;  %8324 = vmatprep.subr.bf16.mxu1 %v9470_v1  ;;  %v8828_v57 = vld [vmem:[%s11654_s1 + $0x34c] ss:$12 sps:$4 sm:$0xff]   ;;  %v8853_v15 = vld [vmem:[%s11654_s1 + $0x3dc] ss:$12 sps:$4 sm:$0xff]  }
  0x51   : > { %1008 = vmatprep.subr.bf16.mxu0 %v8755_v58  ;;  %8338 = vmatprep.mubr.msk.bf16.mxu1 %vm9471_vm0, %v9470_v1  ;;  %v8829_v58 = vld [vmem:[%s11654_s1 + $0x350] ss:$12 sps:$4 sm:$0xff]  }
  0x52   : > { %1038 = vmatprep.mubr.bf16.mxu0 %v9472_v5 }
  0x53   : > { %8325 = vmatpush3.bf16.msra.mxu1 %v8756_v59  ;;  %v8826_v59 = vld [vmem:[%s11654_s1 + $0x348] ss:$12 sps:$4 sm:$0xff]  }
  0x54   : > { %1009 = vmatpush1.bf16.msra.mxu0 %v8753_v60  ;;  %8326 = vmatprep.subr.bf16.mxu1 %v9470_v1  ;;  %v8832_v60 = vld [vmem:[%s11654_s1 + $0x364] ss:$12 sps:$4 sm:$0xff]  }
  0x55   : > { %1010 = vmatprep.subr.bf16.mxu0 %v8759_v61  ;;  %v8833_v61 = vld [vmem:[%s11654_s1 + $0x368] ss:$12 sps:$4 sm:$0xff]  }
  0x57   : > { %8327 = vmatpush3.bf16.msra.mxu1 %v8760_v62  ;;  %v8830_v62 = vld [vmem:[%s11654_s1 + $0x360] ss:$12 sps:$4 sm:$0xff]  }
  0x58   : > { %1011 = vmatpush1.bf16.msra.mxu0 %v8757_v63  ;;  %8328 = vmatprep.subr.bf16.mxu1 %v9470_v1  ;;  %v8836_v63 = vld [vmem:[%s11654_s1 + $0x37c] ss:$12 sps:$4 sm:$0xff]  }
  0x59   : > { %1012 = vmatprep.subr.bf16.mxu0 %v8763_v0  ;;  %v8837_v0 = vld [vmem:[%s11654_s1 + $0x380] ss:$12 sps:$4 sm:$0xff]  }
  0x5b   : > { %8329 = vmatpush3.bf16.msra.mxu1 %v8764_v2  ;;  %v8834_v2 = vld [vmem:[%s11654_s1 + $0x378] ss:$12 sps:$4 sm:$0xff]  }
  0x5c   : > { %1013 = vmatpush1.bf16.msra.mxu0 %v8761_v3  ;;  %8330 = vmatprep.subr.bf16.mxu1 %v9470_v1  ;;  %v8840_v3 = vld [vmem:[%s11654_s1 + $0x394] ss:$12 sps:$4 sm:$0xff]  }
  0x5d   : > { %1014 = vmatprep.subr.bf16.mxu0 %v8767_v4  ;;  %v8841_v4 = vld [vmem:[%s11654_s1 + $0x398] ss:$12 sps:$4 sm:$0xff]  }
  0x5f   : > { %8331 = vmatpush3.bf16.msra.mxu1 %v8768_v6  ;;  %v8838_v6 = vld [vmem:[%s11654_s1 + $0x390] ss:$12 sps:$4 sm:$0xff]  }
  0x60   : > { %1015 = vmatpush1.bf16.msra.mxu0 %v8765_v7  ;;  %8332 = vmatprep.subr.bf16.mxu1 %v9470_v1  ;;  %v8844_v7 = vld [vmem:[%s11654_s1 + $0x3ac] ss:$12 sps:$4 sm:$0xff]  }
  0x61   : > { %1016 = vmatprep.subr.bf16.mxu0 %v8771_v8  ;;  %v8845_v8 = vld [vmem:[%s11654_s1 + $0x3b0] ss:$12 sps:$4 sm:$0xff]  }
  0x63   : > { %8333 = vmatpush3.bf16.msra.mxu1 %v8772_v9  ;;  %v8846_v9 = vld [vmem:[%s9630_s17] sm:$0x7c]  }
  0x64   : > { %1017 = vmatpush1.bf16.msra.mxu0 %v8769_v10  ;;  %8334 = vmatprep.subr.bf16.mxu1 %v9470_v1  ;;  %v8842_v10 = vld [vmem:[%s11654_s1 + $0x3a8] ss:$12 sps:$4 sm:$0xff]  }
  0x65   : > { %1018 = vmatprep.subr.bf16.mxu0 %v8775_v11  ;;  %v8849_v11 = vld [vmem:[%s11654_s1 + $0x3c4] ss:$12 sps:$4 sm:$0xff]  }
  0x67   : > { %8335 = vmatpush3.bf16.msra.mxu1 %v8776_v12  ;;  %v8850_v12 = vld [vmem:[%s11654_s1 + $0x3c8] ss:$12 sps:$4 sm:$0xff]  }
  0x68   : > { %1019 = vmatpush1.bf16.msra.mxu0 %v8773_v13  ;;  %8336 = vmatprep.subr.bf16.mxu1 %v9470_v1  ;;  %v1396_v13 = vrot.slane %v8846_v9, 2 }
  0x69   : > { %1020 = vmatprep.subr.bf16.mxu0 %v8779_v14  ;;  %v8847_v14 = vld [vmem:[%s11654_s1 + $0x3c0] ss:$12 sps:$4 sm:$0xff]  }
  0x6b   : > { %8337 = vmatpush3.bf16.msra.mxu1 %v8780_v16  ;;  %v8854_v16 = vld [vmem:[%s11654_s1 + $0x3e0] ss:$12 sps:$4 sm:$0xff]  }
  0x6c   : > { %1021 = vmatpush1.bf16.msra.mxu0 %v8777_v17  ;;  %8342 = vmatprep.subr.bf16.mxu1 %v9470_v1  ;;  %v1650_v17 = vshrl.u32 %v8846_v9, 16 }
  0x6d   : > { %1266 = vmatprep.subr.bf16.mxu0 %v8784_v18  ;;  %v1653_v18 = vshll.u32 %v8846_v9, 16  ;;  %v8919_v9 = vld [vmem:[%s11654_s1 + $0x560] ss:$12 sps:$4 sm:$0xff]  }
  0x6e   : > { %8339 = vmatmul.mubr.bf16.vlgmr.msra.gmra.mrb[8].mxu1 %v876_v19 }
  0x6f   : > { %8343 = vmatpush3.bf16.msra.mxu1 %v8785_v20  ;;  %1039 = vmatmul.mubr.bf16.vlgmr.msra.gmra.mrb[0].mxu0 %v876_v19  ;;  %v8851_v19 = vld [vmem:[%s11654_s1 + $0x3d8] ss:$12 sps:$4 sm:$0xff]   ;;  %v8857_v20 = vld [vmem:[%s11654_s1 + $0x3f4] ss:$12 sps:$4 sm:$0xff]  }
  0x70   : > { %1267 = vmatpush1.bf16.msra.mxu0 %v8782_v21  ;;  %8344 = vmatprep.subr.bf16.mxu1 %v9470_v1  ;;  %v8858_v21 = vld [vmem:[%s11654_s1 + $0x3f8] ss:$12 sps:$4 sm:$0xff]  }
  0x71   : > { %1268 = vmatprep.subr.bf16.mxu0 %v8788_v22  ;;  %8358 = vmatprep.mubr.msk.bf16.mxu1 %vm9471_vm0, %v9470_v1  ;;  %v1652_v22 = vrot.slane %v1650_v17, 2  ;;  %v8930_v17 = vld [vmem:[%s11654_s1 + $0x5a4] ss:$12 sps:$4 sm:$0xff]  }
  0x72   : > { %1298 = vmatprep.mubr.bf16.mxu0 %v9472_v5 }
  0x73   : > { %8345 = vmatpush3.bf16.msra.mxu1 %v8789_v23  ;;  %v1655_v23 = vrot.slane %v1653_v18, 3  ;;  %v8931_v18 = vld [vmem:[%s11654_s1 + $0x5a8] ss:$12 sps:$4 sm:$0xff]  }
  0x74   : > { %1269 = vmatpush1.bf16.msra.mxu0 %v8786_v24  ;;  %8346 = vmatprep.subr.bf16.mxu1 %v9470_v1  ;;  %v8855_v24 = vld [vmem:[%s11654_s1 + $0x3f0] ss:$12 sps:$4 sm:$0xff]  }
  0x75   : > { %1270 = vmatprep.subr.bf16.mxu0 %v8792_v25  ;;  %v8861_v25 = vld [vmem:[%s11654_s1 + $0x40c] ss:$12 sps:$4 sm:$0xff]  }
  0x77   : > { %8347 = vmatpush3.bf16.msra.mxu1 %v8793_v26  ;;  %v8862_v26 = vld [vmem:[%s11654_s1 + $0x410] ss:$12 sps:$4 sm:$0xff]  }
  0x78   : > { %1271 = vmatpush1.bf16.msra.mxu0 %v8790_v27  ;;  %8348 = vmatprep.subr.bf16.mxu1 %v9470_v1  ;;  %v8859_v27 = vld [vmem:[%s11654_s1 + $0x408] ss:$12 sps:$4 sm:$0xff]  }
  0x79   : > { %1272 = vmatprep.subr.bf16.mxu0 %v8796_v28  ;;  %v8865_v28 = vld [vmem:[%s11654_s1 + $0x424] ss:$12 sps:$4 sm:$0xff]  }
  0x7b   : > { %8349 = vmatpush3.bf16.msra.mxu1 %v8797_v29  ;;  %v8866_v29 = vld [vmem:[%s11654_s1 + $0x428] ss:$12 sps:$4 sm:$0xff]  }
  0x7c   : > { %1273 = vmatpush1.bf16.msra.mxu0 %v8794_v30  ;;  %8350 = vmatprep.subr.bf16.mxu1 %v9470_v1  ;;  %v8863_v30 = vld [vmem:[%s11654_s1 + $0x420] ss:$12 sps:$4 sm:$0xff]  }
  0x7d   : > { %1274 = vmatprep.subr.bf16.mxu0 %v8800_v31  ;;  %v8869_v31 = vld [vmem:[%s11654_s1 + $0x43c] ss:$12 sps:$4 sm:$0xff]  }
  0x7f   : > { %8351 = vmatpush3.bf16.msra.mxu1 %v8801_v32  ;;  %v8870_v32 = vld [vmem:[%s11654_s1 + $0x440] ss:$12 sps:$4 sm:$0xff]  }
  0x80   : > { %1275 = vmatpush1.bf16.msra.mxu0 %v8798_v33  ;;  %8352 = vmatprep.subr.bf16.mxu1 %v9470_v1  ;;  %v8867_v33 = vld [vmem:[%s11654_s1 + $0x438] ss:$12 sps:$4 sm:$0xff]  }
  0x81   : > { %1276 = vmatprep.subr.bf16.mxu0 %v8804_v34  ;;  %v8873_v34 = vld [vmem:[%s11654_s1 + $0x454] ss:$12 sps:$4 sm:$0xff]  }
  0x83   : > { %8353 = vmatpush3.bf16.msra.mxu1 %v8805_v35  ;;  %v8874_v35 = vld [vmem:[%s11654_s1 + $0x458] ss:$12 sps:$4 sm:$0xff]  }
  0x84   : > { %1277 = vmatpush1.bf16.msra.mxu0 %v8802_v36  ;;  %8354 = vmatprep.subr.bf16.mxu1 %v9470_v1  ;;  %v8871_v36 = vld [vmem:[%s11654_s1 + $0x450] ss:$12 sps:$4 sm:$0xff]  }
  0x85   : > { %1278 = vmatprep.subr.bf16.mxu0 %v8808_v37  ;;  %v8877_v37 = vld [vmem:[%s11654_s1 + $0x46c] ss:$12 sps:$4 sm:$0xff]  }
  0x87   : > { %8355 = vmatpush3.bf16.msra.mxu1 %v8809_v40  ;;  %v8881_v40 = vld [vmem:[%s11654_s1 + $0x484] ss:$12 sps:$4 sm:$0xff]  }
  0x88   : > { %1279 = vmatpush1.bf16.msra.mxu0 %v8806_v41  ;;  %8356 = vmatprep.subr.bf16.mxu1 %v9470_v1  ;;  %v8882_v41 = vld [vmem:[%s11654_s1 + $0x488] ss:$12 sps:$4 sm:$0xff]  }
  0x89   : > { %1280 = vmatprep.subr.bf16.mxu0 %v8812_v42  ;;  %v1656_v42 = vor.u32 %v1655_v23, %v1652_v22  ;;  %v8932_v22 = vld [vmem:[%s11654_s1 + $0x5b8] ss:$12 sps:$4 sm:$0xff]   ;;  %v8938_v23 = vld [vmem:[%s11654_s1 + $0x5d4] ss:$12 sps:$4 sm:$0xff]  }
  0x8b   : > { %8357 = vmatpush3.bf16.msra.mxu1 %v8813_v45  ;;  %v8886_v45 = vld [vmem:[%s11654_s1 + $0x4a0] ss:$12 sps:$4 sm:$0xff]  }
  0x8c   : > { %1281 = vmatpush1.bf16.msra.mxu0 %v8810_v46  ;;  %8362 = vmatprep.subr.bf16.mxu1 %v9470_v1  ;;  %v8883_v46 = vld [vmem:[%s11654_s1 + $0x498] ss:$12 sps:$4 sm:$0xff]  }
  0x8d   : > { %1526 = vmatprep.subr.bf16.mxu0 %v8816_v47  ;;  %v8889_v47 = vld [vmem:[%s11654_s1 + $0x4b4] ss:$12 sps:$4 sm:$0xff]  }
  0x8e   : > { %8359 = vmatmul.mubr.bf16.vlgmr.msra.gmra.mrb[12].mxu1 %v1136_v48 }
  0x8f   : > { %8363 = vmatpush3.bf16.msra.mxu1 %v8817_v49  ;;  %1299 = vmatmul.mubr.bf16.vlgmr.msra.gmra.mrb[0].mxu0 %v1136_v48  ;;  %v8890_v48 = vld [vmem:[%s11654_s1 + $0x4b8] ss:$12 sps:$4 sm:$0xff]   ;;  %v8887_v49 = vld [vmem:[%s11654_s1 + $0x4b0] ss:$12 sps:$4 sm:$0xff]  }
  0x90   : > { %1527 = vmatpush1.bf16.msra.mxu0 %v8814_v50  ;;  %8364 = vmatprep.subr.bf16.mxu1 %v9470_v1  ;;  %v8893_v50 = vld [vmem:[%s11654_s1 + $0x4cc] ss:$12 sps:$4 sm:$0xff]  }
  0x91   : > { %1528 = vmatprep.subr.bf16.mxu0 %v8820_v51  ;;  %8378 = vmatprep.mubr.msk.bf16.mxu1 %vm9471_vm0, %v9470_v1  ;;  %v8894_v51 = vld [vmem:[%s11654_s1 + $0x4d0] ss:$12 sps:$4 sm:$0xff]  }
  0x92   : > { %1558 = vmatprep.mubr.bf16.mxu0 %v9472_v5 }
  0x93   : > { %8365 = vmatpush3.bf16.msra.mxu1 %v8821_v52  ;;  %v8891_v52 = vld [vmem:[%s11654_s1 + $0x4c8] ss:$12 sps:$4 sm:$0xff]  }
  0x94   : > { %1529 = vmatpush1.bf16.msra.mxu0 %v8818_v53  ;;  %8366 = vmatprep.subr.bf16.mxu1 %v9470_v1  ;;  %v8897_v53 = vld [vmem:[%s11654_s1 + $0x4e4] ss:$12 sps:$4 sm:$0xff]  }
  0x95   : > { %1530 = vmatprep.subr.bf16.mxu0 %v8824_v54  ;;  %v8898_v54 = vld [vmem:[%s11654_s1 + $0x4e8] ss:$12 sps:$4 sm:$0xff]  }
  0x97   : > { %8367 = vmatpush3.bf16.msra.mxu1 %v8825_v55  ;;  %v8895_v55 = vld [vmem:[%s11654_s1 + $0x4e0] ss:$12 sps:$4 sm:$0xff]  }
  0x98   : > { %1531 = vmatpush1.bf16.msra.mxu0 %v8822_v56  ;;  %8368 = vmatprep.subr.bf16.mxu1 %v9470_v1  ;;  %v8901_v56 = vld [vmem:[%s11654_s1 + $0x4fc] ss:$12 sps:$4 sm:$0xff]  }
  0x99   : > { %1532 = vmatprep.subr.bf16.mxu0 %v8828_v57  ;;  %v8902_v57 = vld [vmem:[%s11654_s1 + $0x500] ss:$12 sps:$4 sm:$0xff]  }
  0x9b   : > { %8369 = vmatpush3.bf16.msra.mxu1 %v8829_v58  ;;  %v8899_v58 = vld [vmem:[%s11654_s1 + $0x4f8] ss:$12 sps:$4 sm:$0xff]  }
  0x9c   : > { %1533 = vmatpush1.bf16.msra.mxu0 %v8826_v59  ;;  %8370 = vmatprep.subr.bf16.mxu1 %v9470_v1  ;;  %v8905_v59 = vld [vmem:[%s11654_s1 + $0x514] ss:$12 sps:$4 sm:$0xff]  }
  0x9d   : > { %1534 = vmatprep.subr.bf16.mxu0 %v8832_v60  ;;  %v8906_v60 = vld [vmem:[%s11654_s1 + $0x518] ss:$12 sps:$4 sm:$0xff]  }
  0x9f   : > { %8371 = vmatpush3.bf16.msra.mxu1 %v8833_v61  ;;  %v8903_v61 = vld [vmem:[%s11654_s1 + $0x510] ss:$12 sps:$4 sm:$0xff]  }
  0xa0   : > { %1535 = vmatpush1.bf16.msra.mxu0 %v8830_v62  ;;  %8372 = vmatprep.subr.bf16.mxu1 %v9470_v1  ;;  %v8909_v62 = vld [vmem:[%s11654_s1 + $0x52c] ss:$12 sps:$4 sm:$0xff]  }
  0xa1   : > { %1536 = vmatprep.subr.bf16.mxu0 %v8836_v63  ;;  %v10167_v63 = vld [vmem:[%s9630_s17] sm:$0xf8]   ;;  %s324_s17 = scalar_lea.vmem [#allocation4], %s323_s27 }
  0xa2   : > { %s6565_s29 = sshll.u32 %s324_s17, 4  ;;  %s11613_s29 = int_to_ptr.vmem [resolvable:$true] %s6565_s29 }
  0xa3   : > { %8373 = vmatpush3.bf16.msra.mxu1 %v8837_v0  ;;  %v8910_v0 = vld [vmem:[%s11654_s1 + $0x530] ss:$12 sps:$4 sm:$0xff]   ;;  %s9406_s13 = scalar_lea.vmem %s11613_s29, 16  ;;  %p9413_p0 = scmp.lt.s32.totalorder %s11613_s29, %s9411_s24 }
  0xa4   : > { %1537 = vmatpush1.bf16.msra.mxu0 %v8834_v2  ;;  %8374 = vmatprep.subr.bf16.mxu1 %v9470_v1  ;;  %v8907_v2 = vld [vmem:[%s11654_s1 + $0x528] ss:$12 sps:$4 sm:$0xff]   ;;  %p9407_p11 = scmp.ne.s32.totalorder %s11613_s29, %s9406_s13  ;;  %p9414_p1 = scmp.lt.s32.totalorder %s9412_s28, %s9406_s13 }
  0xa5   : > { %1538 = vmatprep.subr.bf16.mxu0 %v8840_v3  ;;  %v8914_v3 = vld [vmem:[%s11654_s1 + $0x544] ss:$12 sps:$4 sm:$0xff]  }
  0xa6   : > { %p9408_p12 = pnand %p9407_p11, %p9562_p5  ;;  %p9415_p2 = por %p9414_p1, %p9413_p0 }
  0xa7   : > { %8375 = vmatpush3.bf16.msra.mxu1 %v8841_v4  ;;  %v1916_v4 = vrot.slane %v10167_v63, 3 }
  0xa8   : > { %1539 = vmatpush1.bf16.msra.mxu0 %v8838_v6  ;;  %8376 = vmatprep.subr.bf16.mxu1 %v9470_v1  ;;  %v8915_v6 = vld [vmem:[%s11654_s1 + $0x548] ss:$12 sps:$4 sm:$0xff]   ;;  %p9409_p13 = pneg %p9408_p12 }
  0xa9   : > { %1540 = vmatprep.subr.bf16.mxu0 %v8844_v7  ;;  %v8912_v7 = vld [vmem:[%s11654_s1 + $0x540] ss:$12 sps:$4 sm:$0xff]  }
  0xaa   : > { %p9416_p3 = pnand %p9415_p2, %p9409_p13 }
  0xab   : > { %8377 = vmatpush3.bf16.msra.mxu1 %v8845_v8  ;;  %v8918_v8 = vld [vmem:[%s11654_s1 + $0x55c] ss:$12 sps:$4 sm:$0xff]  }
  0xac   : > { %1541 = vmatpush1.bf16.msra.mxu0 %v8842_v10  ;;  %8382 = vmatprep.subr.bf16.mxu1 %v9470_v1  ;;  %v8916_v10 = vld [vmem:[%s11654_s1 + $0x558] ss:$12 sps:$4 sm:$0xff]  }
  0xad   : > { %1786 = vmatprep.subr.bf16.mxu0 %v8849_v11  ;;  %v8922_v11 = vld [vmem:[%s11654_s1 + $0x574] ss:$12 sps:$4 sm:$0xff]  }
  0xae   : > { %8379 = vmatmul.mubr.bf16.vlgmr.msra.gmra.mrb[16].mxu1 %v1396_v13 }
  0xaf   : > { %8383 = vmatpush3.bf16.msra.mxu1 %v8850_v12  ;;  %1559 = vmatmul.mubr.bf16.vlgmr.msra.gmra.mrb[0].mxu0 %v1396_v13  ;;  %v8923_v12 = vld [vmem:[%s11654_s1 + $0x578] ss:$12 sps:$4 sm:$0xff]   ;;  %v8920_v13 = vld [vmem:[%s11654_s1 + $0x570] ss:$12 sps:$4 sm:$0xff]  }
  0xb0   : > { %1787 = vmatpush1.bf16.msra.mxu0 %v8847_v14  ;;  %8384 = vmatprep.subr.bf16.mxu1 %v9470_v1  ;;  %v8926_v14 = vld [vmem:[%s11654_s1 + $0x58c] ss:$12 sps:$4 sm:$0xff]  }
  0xb1   : > { %1788 = vmatprep.subr.bf16.mxu0 %v8853_v15  ;;  %8398 = vmatprep.mubr.msk.bf16.mxu1 %vm9471_vm0, %v9470_v1  ;;  %v8927_v15 = vld [vmem:[%s11654_s1 + $0x590] ss:$12 sps:$4 sm:$0xff]  }
  0xb2   : > { %1818 = vmatprep.mubr.bf16.mxu0 %v9472_v5 }
  0xb3   : > { %8385 = vmatpush3.bf16.msra.mxu1 %v8854_v16  ;;  %v8924_v16 = vld [vmem:[%s11654_s1 + $0x588] ss:$12 sps:$4 sm:$0xff]  }
  0xb4   : > { %1789 = vmatpush1.bf16.msra.mxu0 %v8851_v19  ;;  %8386 = vmatprep.subr.bf16.mxu1 %v9470_v1  ;;  %v8928_v19 = vld [vmem:[%s11654_s1 + $0x5a0] ss:$12 sps:$4 sm:$0xff]  }
  0xb5   : > { %1790 = vmatprep.subr.bf16.mxu0 %v8857_v20  ;;  %v8934_v20 = vld [vmem:[%s11654_s1 + $0x5bc] ss:$12 sps:$4 sm:$0xff]  }
  0xb7   : > { %8387 = vmatpush3.bf16.msra.mxu1 %v8858_v21  ;;  %v8935_v21 = vld [vmem:[%s11654_s1 + $0x5c0] ss:$12 sps:$4 sm:$0xff]  }
  0xb8   : > { %1791 = vmatpush1.bf16.msra.mxu0 %v8855_v24  ;;  %8388 = vmatprep.subr.bf16.mxu1 %v9470_v1 }
  0xb9   : > { %1792 = vmatprep.subr.bf16.mxu0 %v8861_v25  ;;  %v8939_v25 = vld [vmem:[%s11654_s1 + $0x5d8] ss:$12 sps:$4 sm:$0xff]  }
  0xbb   : > { %8389 = vmatpush3.bf16.msra.mxu1 %v8862_v26  ;;  %v2170_v26 = vshrl.u32 %v10167_v63, 16 }
  0xbc   : > { %1793 = vmatpush1.bf16.msra.mxu0 %v8859_v27  ;;  %8390 = vmatprep.subr.bf16.mxu1 %v9470_v1  ;;  %v2173_v27 = vshll.u32 %v10167_v63, 16  ;;  %v8962_v63 = vld [vmem:[%s11656_s3 + $0x240] ss:$12 sps:$4 sm:$0xff]  }
  0xbd   : > { %1794 = vmatprep.subr.bf16.mxu0 %v8865_v28 }
  0xbf   : > { %8391 = vmatpush3.bf16.msra.mxu1 %v8866_v29  ;;  %v8936_v29 = vld [vmem:[%s11654_s1 + $0x5d0] ss:$12 sps:$4 sm:$0xff]  }
  0xc0   : > { %1795 = vmatpush1.bf16.msra.mxu0 %v8863_v30  ;;  %8392 = vmatprep.subr.bf16.mxu1 %v9470_v1 }
  0xc1   : > { %1796 = vmatprep.subr.bf16.mxu0 %v8869_v31  ;;  %v8942_v31 = vld [vmem:[%s11654_s1 + $0x5ec] ss:$12 sps:$4 sm:$0xff]  }
  0xc3   : > { %8393 = vmatpush3.bf16.msra.mxu1 %v8870_v32 }
  0xc4   : > { %1797 = vmatpush1.bf16.msra.mxu0 %v8867_v33  ;;  %8394 = vmatprep.subr.bf16.mxu1 %v9470_v1  ;;  %v8943_v33 = vld [vmem:[%s11654_s1 + $0x5f0] ss:$12 sps:$4 sm:$0xff]  }
  0xc5   : > { %1798 = vmatprep.subr.bf16.mxu0 %v8873_v34  ;;  %v2172_v34 = vrot.slane %v2170_v26, 3  ;;  %v8988_v26 = vld [vmem:[%s11656_s3 + $0x334] ss:$12 sps:$4 sm:$0xff]  }
  0xc7   : > { %8395 = vmatpush3.bf16.msra.mxu1 %v8874_v35  ;;  %v2175_v35 = vrot.slane %v2173_v27, 4  ;;  %v8992_v27 = vld [vmem:[%s11656_s3 + $0x348] ss:$12 sps:$4 sm:$0xff]  }
  0xc8   : > { %1799 = vmatpush1.bf16.msra.mxu0 %v8871_v36  ;;  %8396 = vmatprep.subr.bf16.mxu1 %v9470_v1  ;;  %v8940_v36 = vld [vmem:[%s11654_s1 + $0x5e8] ss:$12 sps:$4 sm:$0xff]  }
  0xc9   : > { %1800 = vmatprep.subr.bf16.mxu0 %v8877_v37  ;;  %v2176_v37 = vor.u32 %v2175_v35, %v2172_v34 }
  0xcb   : > { %8397 = vmatpush3.bf16.msra.mxu1 %v8878_v38 }
  0xcc   : > { %1801 = vmatpush1.bf16.msra.mxu0 %v8875_v39  ;;  %8402 = vmatprep.subr.bf16.mxu1 %v9470_v1 }
  0xcd   : > { %2046 = vmatprep.subr.bf16.mxu0 %v8881_v40 }
  0xce   : > { %8399 = vmatmul.mubr.bf16.vlgmr.msra.gmra.mrb[20].mxu1 %v1656_v42 }
  0xcf   : > { %8403 = vmatpush3.bf16.msra.mxu1 %v8882_v41  ;;  %1819 = vmatmul.mubr.bf16.vlgmr.msra.gmra.mrb[0].mxu0 %v1656_v42 }
  0xd0   : > { %2047 = vmatpush1.bf16.msra.mxu0 %v8879_v43  ;;  %8404 = vmatprep.subr.bf16.mxu1 %v9470_v1 }
  0xd1   : > { %2048 = vmatprep.subr.bf16.mxu0 %v8885_v44  ;;  %8418 = vmatprep.mubr.msk.bf16.mxu1 %vm9471_vm0, %v9470_v1  ;;  %v8944_v44 = vld [vmem:[%s11656_s3 + $0x1b0] ss:$12 sps:$4 sm:$0xff]  }
  0xd2   : > { %2078 = vmatprep.mubr.bf16.mxu0 %v9472_v5 }
  0xd3   : > { %8405 = vmatpush3.bf16.msra.mxu1 %v8886_v45  ;;  %v8946_v45 = vld [vmem:[%s11656_s3 + $0x1b4] ss:$12 sps:$4 sm:$0xff]  }
  0xd4   : > { %2049 = vmatpush1.bf16.msra.mxu0 %v8883_v46  ;;  %8406 = vmatprep.subr.bf16.mxu1 %v9470_v1  ;;  %v8947_v46 = vld [vmem:[%s11656_s3 + $0x1c8] ss:$12 sps:$4 sm:$0xff]  }
  0xd5   : > { %2050 = vmatprep.subr.bf16.mxu0 %v8889_v47  ;;  %v8949_v47 = vld [vmem:[%s11656_s3 + $0x1cc] ss:$12 sps:$4 sm:$0xff]  }
  0xd7   : > { %8407 = vmatpush3.bf16.msra.mxu1 %v8890_v48  ;;  %v8952_v48 = vld [vmem:[%s11656_s3 + $0x1e4] ss:$12 sps:$4 sm:$0xff]  }
  0xd8   : > { %2051 = vmatpush1.bf16.msra.mxu0 %v8887_v49  ;;  %8408 = vmatprep.subr.bf16.mxu1 %v9470_v1  ;;  %v8950_v49 = vld [vmem:[%s11656_s3 + $0x1e0] ss:$12 sps:$4 sm:$0xff]  }
  0xd9   : > { %2052 = vmatprep.subr.bf16.mxu0 %v8893_v50  ;;  %v8955_v50 = vld [vmem:[%s11656_s3 + $0x1fc] ss:$12 sps:$4 sm:$0xff]  }
  0xdb   : > { %8409 = vmatpush3.bf16.msra.mxu1 %v8894_v51  ;;  %v8953_v51 = vld [vmem:[%s11656_s3 + $0x1f8] ss:$12 sps:$4 sm:$0xff]  }
  0xdc   : > { %2053 = vmatpush1.bf16.msra.mxu0 %v8891_v52  ;;  %8410 = vmatprep.subr.bf16.mxu1 %v9470_v1  ;;  %v8958_v52 = vld [vmem:[%s11656_s3 + $0x214] ss:$12 sps:$4 sm:$0xff]  }
  0xdd   : > { %2054 = vmatprep.subr.bf16.mxu0 %v8897_v53 }
  0xdf   : > { %8411 = vmatpush3.bf16.msra.mxu1 %v8898_v54  ;;  %v8956_v54 = vld [vmem:[%s11656_s3 + $0x210] ss:$12 sps:$4 sm:$0xff]  }
  0xe0   : > { %2055 = vmatpush1.bf16.msra.mxu0 %v8895_v55  ;;  %8412 = vmatprep.subr.bf16.mxu1 %v9470_v1 }
  0xe1   : > { %2056 = vmatprep.subr.bf16.mxu0 %v8901_v56 }
  0xe3   : > { %8413 = vmatpush3.bf16.msra.mxu1 %v8902_v57 }
  0xe4   : > { %2057 = vmatpush1.bf16.msra.mxu0 %v8899_v58  ;;  %8414 = vmatprep.subr.bf16.mxu1 %v9470_v1 }
  0xe5   : > { %2058 = vmatprep.subr.bf16.mxu0 %v8905_v59 }
  0xe7   : > { %8415 = vmatpush3.bf16.msra.mxu1 %v8906_v60  ;;  %v8959_v60 = vld [vmem:[%s11656_s3 + $0x228] ss:$12 sps:$4 sm:$0xff]  }
  0xe8   : > { %2059 = vmatpush1.bf16.msra.mxu0 %v8903_v61  ;;  %8416 = vmatprep.subr.bf16.mxu1 %v9470_v1  ;;  %v8961_v61 = vld [vmem:[%s11656_s3 + $0x22c] ss:$12 sps:$4 sm:$0xff]  }
  0xe9   : > { %2060 = vmatprep.subr.bf16.mxu0 %v8909_v62  ;;  %v8964_v62 = vld [vmem:[%s11656_s3 + $0x244] ss:$12 sps:$4 sm:$0xff]  }
  0xeb   : > { %8417 = vmatpush3.bf16.msra.mxu1 %v8910_v0  ;;  %v8967_v0 = vld [vmem:[%s11656_s3 + $0x25c] ss:$12 sps:$4 sm:$0xff]  }
  0xec   : > { %2061 = vmatpush1.bf16.msra.mxu0 %v8907_v2  ;;  %8422 = vmatprep.subr.bf16.mxu1 %v9470_v1  ;;  %v8965_v2 = vld [vmem:[%s11656_s3 + $0x258] ss:$12 sps:$4 sm:$0xff]  }
  0xed   : > { %2306 = vmatprep.subr.bf16.mxu0 %v8914_v3  ;;  %v8970_v3 = vld [vmem:[%s11656_s3 + $0x274] ss:$12 sps:$4 sm:$0xff]  }
  0xee   : > { %8419 = vmatmul.mubr.bf16.vlgmr.msra.gmra.mrb[24].mxu1 %v1916_v4 }
  0xef   : > { %8423 = vmatpush3.bf16.msra.mxu1 %v8915_v6  ;;  %2079 = vmatmul.mubr.bf16.vlgmr.msra.gmra.mrb[0].mxu0 %v1916_v4  ;;  %v8968_v4 = vld [vmem:[%s11656_s3 + $0x270] ss:$12 sps:$4 sm:$0xff]   ;;  %v8973_v6 = vld [vmem:[%s11656_s3 + $0x28c] ss:$12 sps:$4 sm:$0xff]  }
  0xf0   : > { %2307 = vmatpush1.bf16.msra.mxu0 %v8912_v7  ;;  %8424 = vmatprep.subr.bf16.mxu1 %v9470_v1  ;;  %v8971_v7 = vld [vmem:[%s11656_s3 + $0x288] ss:$12 sps:$4 sm:$0xff]  }
  0xf1   : > { %2308 = vmatprep.subr.bf16.mxu0 %v8918_v8  ;;  %8438 = vmatprep.mubr.msk.bf16.mxu1 %vm9471_vm0, %v9470_v1  ;;  %v8976_v8 = vld [vmem:[%s11656_s3 + $0x2a4] ss:$12 sps:$4 sm:$0xff]  }
  0xf2   : > { %2338 = vmatprep.mubr.bf16.mxu0 %v9472_v5 }
  0xf3   : > { %8425 = vmatpush3.bf16.msra.mxu1 %v8919_v9  ;;  %v8974_v9 = vld [vmem:[%s11656_s3 + $0x2a0] ss:$12 sps:$4 sm:$0xff]  }
  0xf4   : > { %2309 = vmatpush1.bf16.msra.mxu0 %v8916_v10  ;;  %8426 = vmatprep.subr.bf16.mxu1 %v9470_v1  ;;  %v8979_v10 = vld [vmem:[%s11656_s3 + $0x2bc] ss:$12 sps:$4 sm:$0xff]  }
  0xf5   : > { %2310 = vmatprep.subr.bf16.mxu0 %v8922_v11  ;;  %v8977_v11 = vld [vmem:[%s11656_s3 + $0x2b8] ss:$12 sps:$4 sm:$0xff]  }
  0xf7   : > { %8427 = vmatpush3.bf16.msra.mxu1 %v8923_v12  ;;  %v8982_v12 = vld [vmem:[%s11656_s3 + $0x2d4] ss:$12 sps:$4 sm:$0xff]  }
  0xf8   : > { %2311 = vmatpush1.bf16.msra.mxu0 %v8920_v13  ;;  %8428 = vmatprep.subr.bf16.mxu1 %v9470_v1 }
  0xf9   : > { %2312 = vmatprep.subr.bf16.mxu0 %v8926_v14  ;;  %v8980_v14 = vld [vmem:[%s11656_s3 + $0x2d0] ss:$12 sps:$4 sm:$0xff]  }
  0xfb   : > { %8429 = vmatpush3.bf16.msra.mxu1 %v8927_v15 }
  0xfc   : > { %2313 = vmatpush1.bf16.msra.mxu0 %v8924_v16  ;;  %8430 = vmatprep.subr.bf16.mxu1 %v9470_v1 }
  0xfd   : > { %2314 = vmatprep.subr.bf16.mxu0 %v8930_v17 }
  0xff   : > { %8431 = vmatpush3.bf16.msra.mxu1 %v8931_v18 }
 0x100   : > { %2315 = vmatpush1.bf16.msra.mxu0 %v8928_v19  ;;  %8432 = vmatprep.subr.bf16.mxu1 %v9470_v1 }
 0x101   : > { %v616_v24 = vpop.f32.mrb[0].mxu1  ;;  %2316 = vmatprep.subr.bf16.mxu0 %v8934_v20  ;;  %v8985_v20 = vld [vmem:[%s11656_s3 + $0x2ec] ss:$12 sps:$4 sm:$0xff]  }
 0x102   : > { %v8300_v28 = vpop.f32.mrb[1].mxu1 }
 0x103   : > { %v619_v30 = vpop.f32.mrb[2].mxu1  ;;  %8433 = vmatpush3.bf16.msra.mxu1 %v8935_v21  ;;  %v8983_v21 = vld [vmem:[%s11656_s3 + $0x2e8] ss:$12 sps:$4 sm:$0xff]   ;;  %v8994_v28 = vld [vmem:[%s11656_s3 + $0x34c] ss:$12 sps:$4 sm:$0xff]  }
 0x104   : > { %v8301_v32 = vpop.f32.mrb[3].mxu1  ;;  %2317 = vmatpush1.bf16.msra.mxu0 %v8932_v22  ;;  %8434 = vmatprep.subr.bf16.mxu1 %v9470_v1  ;;  %v8991_v22 = vld [vmem:[%s11656_s3 + $0x304] ss:$12 sps:$4 sm:$0xff]  }
 0x105   : > { %2318 = vmatprep.subr.bf16.mxu0 %v8938_v23  ;;  %v8989_v23 = vld [vmem:[%s11656_s3 + $0x300] ss:$12 sps:$4 sm:$0xff]  }
 0x107   : > { %8435 = vmatpush3.bf16.msra.mxu1 %v8939_v25  ;;  %v8986_v25 = vld [vmem:[%s11656_s3 + $0x330] ss:$12 sps:$4 sm:$0xff]  }
 0x108   : > { %2319 = vmatpush1.bf16.msra.mxu0 %v8936_v29  ;;  %8436 = vmatprep.subr.bf16.mxu1 %v9470_v1  ;;  %v8995_v29 = vld [vmem:[%s11656_s3 + $0x318] ss:$12 sps:$4 sm:$0xff]  }
 0x109   : > { %2320 = vmatprep.subr.bf16.mxu0 %v8942_v31  ;;  %v9001_v31 = vld [vmem:[%s11656_s3 + $0xc8] ss:$12 sps:$4 sm:$0xff]  }
 0x10b   : > { %8437 = vmatpush3.bf16.msra.mxu1 %v8943_v33 }
 0x10c   : > { %2321 = vmatpush1.bf16.msra.mxu0 %v8940_v36  ;;  %2976 = vmatprep.subr.bf16.mxu1 %v8988_v26 }
 0x10d   : > { %2935 = vmatprep.subr.bf16.mxu0 %v8946_v45 }
 0x10e   : > { %8439 = vmatmul.mubr.bf16.vlgmr.msra.gmra.mrb[28].mxu1 %v2176_v37 }
 0x10f   : > { %2339 = vmatmul.mubr.bf16.vlgmr.msra.gmra.mrb[0].mxu0 %v2176_v37  ;;  %3008 = vmatprep.mubr.bf16.mxu1 %v9472_v5 }
 0x110   : > { %2936 = vmatpush1.bf16.msra.mxu0 %v8944_v44  ;;  %2977 = vmatpush1.bf16.msra.mxu1 %v8986_v25 }
 0x111   : > { %2937 = vmatprep.subr.bf16.mxu0 %v8949_v47  ;;  %2978 = vmatprep.subr.bf16.mxu1 %v8994_v28 }
 0x114   : > { %2938 = vmatpush1.bf16.msra.mxu0 %v8947_v46  ;;  %2979 = vmatpush1.bf16.msra.mxu1 %v8992_v27 }
 0x115   : > { %2939 = vmatprep.subr.bf16.mxu0 %v8952_v48 }
 0x118   : > { %2940 = vmatpush1.bf16.msra.mxu0 %v8950_v49 }
 0x119   : > { %2941 = vmatprep.subr.bf16.mxu0 %v8955_v50  ;;  %v2398_v50 = vlaneseq }
 0x11c   : > { %2942 = vmatpush1.bf16.msra.mxu0 %v8953_v51  ;;  %v10378_v51 = vshrl.u32 %v2398_v50, 7 }
 0x11d   : > { %2943 = vmatprep.subr.bf16.mxu0 %v8958_v52 }
 0x11e   : > { %v2400_v52 = vsub.s32 0, %v10378_v51 }
 0x120   : > { %2944 = vmatpush1.bf16.msra.mxu0 %v8956_v54  ;;  %v2408_v54 = vsub.s32 2, %v10378_v51 }
 0x121   : > { %v829_v38 = vpop.f32.mrb[4].mxu1  ;;  %2945 = vmatprep.subr.bf16.mxu0 %v8961_v61 }
 0x122   : > { %v830_v39 = vadd.f32 %v829_v38, %v616_v24  ;;  %v8320_v40 = vpop.f32.mrb[5].mxu1  ;;  %v8997_v24 = vld [vmem:[%s11656_s3 + $0x31c] ss:$12 sps:$4 sm:$0xff]  }
 0x123   : > { %v832_v41 = vpop.f32.mrb[6].mxu1 }
 0x124   : > { %v833_v42 = vadd.f32 %v832_v41, %v619_v30  ;;  %v8321_v43 = vpop.f32.mrb[7].mxu1  ;;  %2946 = vmatpush1.bf16.msra.mxu0 %v8959_v60  ;;  %v8998_v30 = vld [vmem:[%s11656_s3 + $0x278] ss:$12 sps:$4 sm:$0xff]  }
 0x125   : > { %2947 = vmatprep.subr.bf16.mxu0 %v8964_v62  ;;  %7987 = vmatprep.subr.bf16.mxu1 %v8998_v30 }
 0x128   : > { %2948 = vmatpush1.bf16.msra.mxu0 %v8962_v63 }
 0x129   : > { %2949 = vmatprep.subr.bf16.mxu0 %v8967_v0 }
 0x12c   : > { %2950 = vmatpush1.bf16.msra.mxu0 %v8965_v2 }
 0x12d   : > { %2951 = vmatprep.subr.bf16.mxu0 %v8970_v3 }
 0x130   : > { %2952 = vmatpush1.bf16.msra.mxu0 %v8968_v4 }
 0x131   : > { %2953 = vmatprep.subr.bf16.mxu0 %v8973_v6 }
 0x134   : > { %2954 = vmatpush1.bf16.msra.mxu0 %v8971_v7 }
 0x135   : > { %2955 = vmatprep.subr.bf16.mxu0 %v8976_v8 }
 0x138   : > { %2956 = vmatpush1.bf16.msra.mxu0 %v8974_v9 }
 0x139   : > { %2957 = vmatprep.subr.bf16.mxu0 %v8979_v10 }
 0x13c   : > { %2958 = vmatpush1.bf16.msra.mxu0 %v8977_v11 }
 0x13d   : > { %2959 = vmatprep.subr.bf16.mxu0 %v8982_v12  ;;  %v9022_v12 = vld [vmem:[%s11656_s3 + $0x230] ss:$12 sps:$4 sm:$0xff]  }
 0x140   : > { %2960 = vmatpush1.bf16.msra.mxu0 %v8980_v14 }
 0x141   : > { %v1083_v53 = vpop.f32.mrb[8].mxu1  ;;  %2961 = vmatprep.subr.bf16.mxu0 %v8985_v20 }
 0x142   : > { %v1092_v55 = vadd.f32 %v1083_v53, %v830_v39  ;;  %v8340_v56 = vpop.f32.mrb[9].mxu1  ;;  %v2396_v53 = vld [vmem:[%s11655_s2] sm:$0x7] }
 0x143   : > { %v1086_v57 = vpop.f32.mrb[10].mxu1  ;;  %v2401_v56 = vrot.slane %v2396_v53, %v2400_v52 }
 0x144   : > { %v1095_v58 = vadd.f32 %v1086_v57, %v833_v42  ;;  %v8341_v59 = vpop.f32.mrb[11].mxu1  ;;  %2962 = vmatpush1.bf16.msra.mxu0 %v8983_v21  ;;  %v2409_v57 = vrot.slane %v2396_v53, %v2408_v54 }
 0x145   : > { %2963 = vmatprep.subr.bf16.mxu0 %v8991_v22 }
 0x148   : > { %2964 = vmatpush1.bf16.msra.mxu0 %v8989_v23  ;;  %v2460_v23 = vld [vmem:[#allocation2 + $0x14] sm:$0x1] }
 0x149   : > { %2965 = vmatprep.subr.bf16.mxu0 %v8997_v24  ;;  %v2455_v24 = vld [vmem:[#allocation2 + $0xc] sm:$0x11] }
 0x14c   : > { %2966 = vmatpush1.bf16.msra.mxu0 %v8995_v29 }
 0x14d   : > { %8012 = vmatprep.subr.bf16.mxu0 %v9001_v31 }
 0x161   : > { %v1343_v13 = vpop.f32.mrb[12].mxu1 }
 0x162   : > { %v1352_v15 = vadd.f32 %v1343_v13, %v1092_v55  ;;  %v8360_v16 = vpop.f32.mrb[13].mxu1  ;;  %v2404_v55 = vsub.s32 1, %v10378_v51 }
 0x163   : > { %v1346_v17 = vpop.f32.mrb[14].mxu1 }
 0x164   : > { %v1355_v18 = vadd.f32 %v1346_v17, %v1095_v58  ;;  %v8361_v19 = vpop.f32.mrb[15].mxu1  ;;  %v2405_v58 = vrot.slane %v2396_v53, %v2404_v55  ;;  %v9005_v53 = vld [vmem:[%s11656_s3 + $0x290] ss:$12 sps:$4 sm:$0xff]   ;;  %v9026_v17 = vld [vmem:[%s11656_s3 + $0x248] ss:$12 sps:$4 sm:$0xff]  }
 0x181   : > { %v1603_v32 = vpop.f32.mrb[16].mxu1 }
 0x182   : > { %v1612_v33 = vadd.f32 %v1603_v32, %v1352_v15  ;;  %v8380_v34 = vpop.f32.mrb[17].mxu1 }
 0x183   : > { %v1606_v35 = vpop.f32.mrb[18].mxu1 }
 0x184   : > { %v1615_v36 = vadd.f32 %v1606_v35, %v1355_v18  ;;  %v8381_v37 = vpop.f32.mrb[19].mxu1 }
 0x1a1   : > { %v1863_v38 = vpop.f32.mrb[20].mxu1 }
 0x1a2   : > { %v1872_v39 = vadd.f32 %v1863_v38, %v1612_v33  ;;  %v8400_v40 = vpop.f32.mrb[21].mxu1  ;;  %v9002_v38 = vld [vmem:[%s11656_s3 + $0x8] ss:$12 sps:$4 sm:$0xff]  }
 0x1a3   : > { %v1866_v41 = vpop.f32.mrb[22].mxu1 }
 0x1a4   : > { %v1875_v42 = vadd.f32 %v1866_v41, %v1615_v36  ;;  %v8401_v43 = vpop.f32.mrb[23].mxu1 }
 0x1c1   : > { %v2123_v44 = vpop.f32.mrb[24].mxu1 }
 0x1c2   : > { %v2132_v45 = vadd.f32 %v2123_v44, %v1872_v39  ;;  %v8420_v46 = vpop.f32.mrb[25].mxu1  ;;  %v9007_v39 = vld [vmem:[%s11656_s3 + $0xe0] ss:$12 sps:$4 sm:$0xff]  }
 0x1c3   : > { %v2126_v47 = vpop.f32.mrb[26].mxu1 }
 0x1c4   : > { %v2135_v48 = vadd.f32 %v2126_v47, %v1875_v42  ;;  %v8421_v49 = vpop.f32.mrb[27].mxu1 }
 0x1c5   : > { %v9000_v49 = vld [vmem:[%s11656_s3 + $0x1b8] ss:$12 sps:$4 sm:$0xff]  }
 0x1e1   : > { %v2383_v59 = vpop.f32.mrb[28].mxu1 }
 0x1e2   : > { %v2392_v60 = vadd.f32 %v2383_v59, %v2132_v45  ;;  %v2340_v61 = vpop.f32.mrb[0].mxu0  ;;  %v8440_v62 = vpop.f32.mrb[29].mxu1  ;;  %v9008_v45 = vld [vmem:[%s11656_s3 + $0x20] ss:$12 sps:$4 sm:$0xff]   ;;  %v9009_v59 = vld [vmem:[%s11656_s3 + $0x2a8] ss:$12 sps:$4 sm:$0xff]  }
 0x1e3   : > { %v2413_v63 = vadd.f32 %v2401_v56, %v2340_v61  ;;  %v2342_v0 = vpop.f32.mrb[1].mxu0  ;;  %v2386_v2 = vpop.f32.mrb[30].mxu1  ;;  %v9019_v61 = vld [vmem:[%s11656_s3 + $0x128] ss:$12 sps:$4 sm:$0xff]  }
 0x1e4   : > { %v2415_v3 = vadd.f32 %v2409_v57, %v2392_v60  ;;  %v2414_v4 = vadd.f32 %v2405_v58, %v2342_v0  ;;  %v2395_v6 = vadd.f32 %v2386_v2, %v2135_v48  ;;  %v2344_v7 = vpop.f32.mrb[2].mxu0  ;;  %v8441_v8 = vpop.f32.mrb[31].mxu1  ;;  %v9011_v48 = vld [vmem:[%s11656_s3 + $0xf8] ss:$12 sps:$4 sm:$0xff]   ;;  %v9016_v60 = vld [vmem:[%s11656_s3 + $0x50] ss:$12 sps:$4 sm:$0xff]  }
 0x1e5   : > { %v2419_v9 = vmax.f32 %v2413_v63, 0.0  ;;  %v2416_v10 = vadd.f32 %v2401_v56, %v2344_v7  ;;  %v2346_v11 = vpop.f32.mrb[3].mxu0  ;;  %v9012_v56 = vld [vmem:[%s11656_s3 + $0x38] ss:$12 sps:$4 sm:$0xff]   ;;  %v9010_v62 = vld [vmem:[%s11656_s3 + $0x1e8] ss:$12 sps:$4 sm:$0xff]  }
 0x1e6   : > { %v2421_v13 = vmax.f32 %v2415_v3, 0.0  ;;  %v2420_v14 = vmax.f32 %v2414_v4, 0.0  ;;  %v2418_v15 = vadd.f32 %v2409_v57, %v2395_v6  ;;  %v2417_v16 = vadd.f32 %v2405_v58, %v2346_v11  ;;  %v9015_v57 = vld [vmem:[%s11656_s3 + $0x110] ss:$12 sps:$4 sm:$0xff]   ;;  %v9013_v63 = vld [vmem:[%s11656_s3 + $0x2c0] ss:$12 sps:$4 sm:$0xff]  }
 0x1e7   : > { %v2422_v18 = vmax.f32 %v2416_v10, 0.0  ;;  %v9404_v27 = vpack.c.bf16 %v2419_v9, %v2419_v9  ;;  %v9006_v58 = vld [vmem:[%s11656_s3 + $0x1d0] ss:$12 sps:$4 sm:$0xff]   ;;  %v9020_v0 = vld [vmem:[%s11656_s3 + $0x68] ss:$12 sps:$4 sm:$0xff]  }
 0x1e8   : > { %v7910_v19 = vpack.c.bf16 %v2421_v13, %v2421_v13  ;;  %v7909_v20 = vpack.c.bf16 %v2420_v14, %v2419_v9  ;;  %v2424_v21 = vmax.f32 %v2418_v15, 0.0  ;;  %v2423_v22 = vmax.f32 %v2417_v16, 0.0  ;;  %v9023_v2 = vld [vmem:[%s11656_s3 + $0x140] ss:$12 sps:$4 sm:$0xff]   ;;  %v9017_v4 = vld [vmem:[%s11656_s3 + $0x2d8] ss:$12 sps:$4 sm:$0xff]  }
 0x1e9   : > { %v9405_v28 = vpack.c.bf16 %v2420_v14, %v2420_v14  ;;  %v2623_v32 = vshll.u32 %v9404_v27, 16  ;;  %v2621_v35 = vshrl.u32 %v9404_v27, 16  ;;  %v9014_v3 = vld [vmem:[%s11656_s3 + $0x200] ss:$12 sps:$4 sm:$0xff]   ;;  %v9027_v7 = vld [vmem:[%s11656_s3 + $0x158] ss:$12 sps:$4 sm:$0xff]  }
 0x1ea   : > { %2447 = vst.msk [vmem:[#allocation2 + $0x8] sm:$0xf] %vm2446_vm8, %v7910_v19  ;;  %2445 = vst [vmem:[#allocation2] sm:$0xff] %v7909_v20  ;;  %v7912_v25 = vpack.c.bf16 %v2424_v21, %v2424_v21  ;;  %v7911_v26 = vpack.c.bf16 %v2423_v22, %v2422_v18  ;;  %v9024_v6 = vld [vmem:[%s11656_s3 + $0x80] ss:$12 sps:$4 sm:$0xff]  }
 0x1eb   : > { %v2630_v31 = vshll.u32 %v9405_v28, 16  ;;  %v2628_v33 = vshrl.u32 %v9405_v28, 16  ;;  %v2625_v36 = vrot.slane %v2623_v32, 1  ;;  %v9018_v8 = vld [vmem:[%s11656_s3 + $0x218] ss:$12 sps:$4 sm:$0xff]  }
 0x1ec   : > { %v2461_v29 = vsel %vm2459_vm9, %v7912_v25, %v2460_v23  ;;  %v2456_v30 = vsel %vm2454_vm10, %v7911_v26, %v2455_v24  ;;  %v9021_v9 = vld [vmem:[%s11656_s3 + $0x2f0] ss:$12 sps:$4 sm:$0xff]   ;;  %v9028_v10 = vld [vmem:[%s11656_s3 + $0x98] ss:$12 sps:$4 sm:$0xff]   ;;  %v9025_v13 = vld [vmem:[%s11656_s3 + $0x308] ss:$12 sps:$4 sm:$0xff]  }
 0x1ed   : > { %2462 = vst [vmem:[#allocation2 + $0x14] sm:$0x1] %v2461_v29  ;;  %2457 = vst [vmem:[#allocation2 + $0xc] sm:$0x11] %v2456_v30  ;;  %v2632_v34 = vrot.slane %v2630_v31, 1  ;;  %v10415_v41 = vor.u32 %v2625_v36, %v2621_v35 }
 0x1ee   : > { %v9031_v11 = vld [vmem:[%s11656_s3 + $0x170] ss:$12 sps:$4 sm:$0xff]   ;;  %v9029_v19 = vld [vmem:[%s11656_s3 + $0x320] ss:$12 sps:$4 sm:$0xff]   ;;  %v9040_v25 = vld [vmem:[%s11656_s3 + $0x378] ss:$12 sps:$4 sm:$0xff]  }
 0x1ef   : > { %v2633_v37 = vor.u32 %v2632_v34, %v2628_v33  ;;  %v9032_v15 = vld [vmem:[%s11656_s3 + $0xb0] ss:$12 sps:$4 sm:$0xff]   ;;  %v9034_v20 = vld [vmem:[%s11656_s3 + $0x360] ss:$12 sps:$4 sm:$0xff]   ;;  %v9033_v27 = vld [vmem:[%s11656_s3 + $0x338] ss:$12 sps:$4 sm:$0xff]  }
 0x1f0   : > { %v9036_v16 = vld [vmem:[%s11656_s3 + $0x364] ss:$12 sps:$4 sm:$0xff]   ;;  %v9042_v22 = vld [vmem:[%s11656_s3 + $0x37c] ss:$12 sps:$4 sm:$0xff]   ;;  %v9030_v23 = vld [vmem:[%s11656_s3 + $0x260] ss:$12 sps:$4 sm:$0xff]  }
 0x1f1   : > { %v8999_v40 = vld [vmem:[#allocation2 + $0x8] ss:$0 sps:$4 sm:$0xff]   ;;  %v10417_v42 = vld [vmem:[#allocation2] sm:$0x77]  ;;  %2967 = vmatprep.mubr.bf16.mxu0 %v2633_v37  ;;  %v9046_v28 = vld [vmem:[%s11656_s3 + $0x390] ss:$12 sps:$4 sm:$0xff]  }
 0x1f2   : > { %v10421_v43 = vcombine.high %v10417_v42, %v10417_v42  ;;  %v2637_v44 = vshll.u32 %v8999_v40, 16  ;;  %2968 = vmatmul.mubr.bf16.vlgmr.msra.gmra.mrb[4].mxu0 %v10415_v41  ;;  %v2635_v46 = vshrl.u32 %v8999_v40, 16  ;;  %v10501_v14 = vld [vmem:[#allocation2] sm:$0xee]  ;;  %v10522_v21 = vcombine.low %v10417_v42, %v10417_v42  ;;  %v9054_v29 = vld [vmem:[%s11656_s3 + $0x3ac] ss:$12 sps:$4 sm:$0xff]  }
 0x1f3   : > { %8013 = vmatpush3.bf16.msra.mxu0 %v9002_v38  ;;  %v7313_v18 = vcombine.high %v10501_v14, %v10501_v14  ;;  %v9048_v26 = vld [vmem:[%s11656_s3 + $0x394] ss:$12 sps:$4 sm:$0xff]   ;;  %v9039_v30 = vld [vmem:[%s11656_s3 + $0x350] ss:$12 sps:$4 sm:$0xff]   ;;  %v9049_v38 = vld [vmem:[%s11656_s3 + $0x18] ss:$12 sps:$4 sm:$0xff]  }
 0x1f4   : > { %3512 = vmatprep.mubr.bf16.mxu0 %v10421_v43  ;;  %v2639_v47 = vrot.slane %v2637_v44, 1  ;;  %8014 = vmatprep.subr.bf16.mxu0 %v9007_v39  ;;  %v9045_v31 = vld [vmem:[%s11656_s3 + $0x4] ss:$12 sps:$4 sm:$0xff]   ;;  %v9052_v32 = vld [vmem:[%s11656_s3 + $0x3a8] ss:$12 sps:$4 sm:$0xff]  }
 0x1f5   : > { %v10530_v24 = vrot.slane %v7313_v18, 1  ;;  %v9060_v33 = vld [vmem:[%s11656_s3 + $0x3c4] ss:$12 sps:$4 sm:$0xff]   ;;  %v9043_v34 = vld [vmem:[%s11656_s3] ss:$12 sps:$4 sm:$0xff]  }
 0x1f6   : > { %v10434_v50 = vor.u32 %v2639_v47, %v2635_v46  ;;  %v9051_v35 = vld [vmem:[%s11656_s3 + $0x1c] ss:$12 sps:$4 sm:$0xff]   ;;  %v9058_v36 = vld [vmem:[%s11656_s3 + $0x3c0] ss:$12 sps:$4 sm:$0xff]   ;;  %v9064_v40 = vld [vmem:[%s11656_s3 + $0x3d8] ss:$12 sps:$4 sm:$0xff]  }
 0x1f7   : > { %8015 = vmatpush3.bf16.msra.mxu0 %v9008_v45  ;;  %v9057_v39 = vld [vmem:[%s11656_s3 + $0x34] ss:$12 sps:$4 sm:$0xff]   ;;  %v9055_v42 = vld [vmem:[%s11656_s3 + $0x30] ss:$12 sps:$4 sm:$0xff]   ;;  %v9078_v45 = vld [vmem:[%s11656_s3 + $0x40c] ss:$12 sps:$4 sm:$0xff]  }
 0x1f8   : > { %7179 = vmatmul.mubr.msk.bf16.vlgmr.msra.gmra.mrb[32].mxu1 %vm2931_vm11, %v10434_v50  ;;  %8016 = vmatprep.subr.bf16.mxu0 %v9011_v48  ;;  %v9070_v44 = vld [vmem:[%s11656_s3 + $0x3f0] ss:$12 sps:$4 sm:$0xff]   ;;  %v9061_v46 = vld [vmem:[%s11656_s3 + $0x48] ss:$12 sps:$4 sm:$0xff]   ;;  %v9111_v18 = vld [vmem:[%s11656_s3 + $0x10c] ss:$12 sps:$4 sm:$0xff]  }
 0x1f9   : > { %7988 = vmatpush3.bf16.msra.mxu1 %v9000_v49  ;;  %3049 = vmatprep.mubr.bf16.mxu1 %v2633_v37  ;;  %v9066_v37 = vld [vmem:[%s11656_s3 + $0x3dc] ss:$12 sps:$4 sm:$0xff]   ;;  %v9069_v47 = vld [vmem:[%s11656_s3 + $0x64] ss:$12 sps:$4 sm:$0xff]  }
 0x1fa   : > { %7989 = vmatprep.subr.bf16.mxu1 %v9005_v53  ;;  %v9076_v48 = vld [vmem:[%s11656_s3 + $0x408] ss:$12 sps:$4 sm:$0xff]   ;;  %v9084_v49 = vld [vmem:[%s11656_s3 + $0x424] ss:$12 sps:$4 sm:$0xff]  }
 0x1fb   : > { %8017 = vmatpush3.bf16.msra.mxu0 %v9012_v56  ;;  %v9075_v53 = vld [vmem:[%s11656_s3 + $0x7c] ss:$12 sps:$4 sm:$0xff]   ;;  %v9082_v56 = vld [vmem:[%s11656_s3 + $0x420] ss:$12 sps:$4 sm:$0xff]  }
 0x1fc   : > { %8018 = vmatprep.subr.bf16.mxu0 %v9015_v57  ;;  %v9090_v57 = vld [vmem:[%s11656_s3 + $0x43c] ss:$12 sps:$4 sm:$0xff]  }
 0x1fd   : > { %7990 = vmatpush3.bf16.msra.mxu1 %v9006_v58  ;;  %v9073_v58 = vld [vmem:[%s11656_s3 + $0x78] ss:$12 sps:$4 sm:$0xff]  }
 0x1fe   : > { %7991 = vmatprep.subr.bf16.mxu1 %v9009_v59  ;;  %v9081_v59 = vld [vmem:[%s11656_s3 + $0x94] ss:$12 sps:$4 sm:$0xff]  }
 0x1ff   : > { %8019 = vmatpush3.bf16.msra.mxu0 %v9016_v60  ;;  %v9088_v60 = vld [vmem:[%s11656_s3 + $0x438] ss:$12 sps:$4 sm:$0xff]  }
 0x200   : > { %8020 = vmatprep.subr.bf16.mxu0 %v9019_v61  ;;  %v9096_v61 = vld [vmem:[%s11656_s3 + $0x454] ss:$12 sps:$4 sm:$0xff]  }
 0x201   : > { %7992 = vmatpush3.bf16.msra.mxu1 %v9010_v62  ;;  %v9079_v62 = vld [vmem:[%s11656_s3 + $0x90] ss:$12 sps:$4 sm:$0xff]  }
 0x202   : > { %7993 = vmatprep.subr.bf16.mxu1 %v9013_v63  ;;  %v9087_v63 = vld [vmem:[%s11656_s3 + $0xac] ss:$12 sps:$4 sm:$0xff]  }
 0x203   : > { %8021 = vmatpush3.bf16.msra.mxu0 %v9020_v0  ;;  %v9094_v0 = vld [vmem:[%s11656_s3 + $0x450] ss:$12 sps:$4 sm:$0xff]  }
 0x204   : > { %8022 = vmatprep.subr.bf16.mxu0 %v9023_v2  ;;  %v9102_v2 = vld [vmem:[%s11656_s3 + $0x46c] ss:$12 sps:$4 sm:$0xff]  }
 0x205   : > { %7994 = vmatpush3.bf16.msra.mxu1 %v9014_v3  ;;  %v9085_v3 = vld [vmem:[%s11656_s3 + $0xa8] ss:$12 sps:$4 sm:$0xff]  }
 0x206   : > { %7995 = vmatprep.subr.bf16.mxu1 %v9017_v4  ;;  %v9093_v4 = vld [vmem:[%s11656_s3 + $0xc4] ss:$12 sps:$4 sm:$0xff]  }
 0x207   : > { %8023 = vmatpush3.bf16.msra.mxu0 %v9024_v6  ;;  %v9100_v6 = vld [vmem:[%s11656_s3 + $0x468] ss:$12 sps:$4 sm:$0xff]  }
 0x208   : > { %8024 = vmatprep.subr.bf16.mxu0 %v9027_v7  ;;  %v9108_v7 = vld [vmem:[%s11656_s3 + $0x484] ss:$12 sps:$4 sm:$0xff]  }
 0x209   : > { %7996 = vmatpush3.bf16.msra.mxu1 %v9018_v8  ;;  %v9091_v8 = vld [vmem:[%s11656_s3 + $0xc0] ss:$12 sps:$4 sm:$0xff]  }
 0x20a   : > { %7997 = vmatprep.subr.bf16.mxu1 %v9021_v9  ;;  %v9099_v9 = vld [vmem:[%s11656_s3 + $0xdc] ss:$12 sps:$4 sm:$0xff]  }
 0x20b   : > { %8025 = vmatpush3.bf16.msra.mxu0 %v9028_v10  ;;  %v9106_v10 = vld [vmem:[%s11656_s3 + $0x480] ss:$12 sps:$4 sm:$0xff]  }
 0x20c   : > { %8026 = vmatprep.subr.bf16.mxu0 %v9031_v11  ;;  %v9114_v11 = vld [vmem:[%s11656_s3 + $0x49c] ss:$12 sps:$4 sm:$0xff]  }
 0x20d   : > { %7998 = vmatpush3.bf16.msra.mxu1 %v9022_v12  ;;  %v9097_v12 = vld [vmem:[%s11656_s3 + $0xd8] ss:$12 sps:$4 sm:$0xff]  }
 0x20e   : > { %7999 = vmatprep.subr.bf16.mxu1 %v9025_v13  ;;  %v9105_v13 = vld [vmem:[%s11656_s3 + $0xf4] ss:$12 sps:$4 sm:$0xff]  }
 0x20f   : > { %8027 = vmatpush3.bf16.msra.mxu0 %v9032_v15  ;;  %v9112_v15 = vld [vmem:[%s11656_s3 + $0x498] ss:$12 sps:$4 sm:$0xff]  }
 0x210   : > { %3939 = vmatprep.subr.bf16.mxu0 %v9036_v16  ;;  %v9120_v16 = vld [vmem:[%s11656_s3 + $0x4b4] ss:$12 sps:$4 sm:$0xff]  }
 0x211   : > { %8000 = vmatpush3.bf16.msra.mxu1 %v9026_v17  ;;  %v9103_v17 = vld [vmem:[%s11656_s3 + $0xf0] ss:$12 sps:$4 sm:$0xff]  }
 0x212   : > { %8001 = vmatprep.subr.bf16.mxu1 %v9029_v19  ;;  %3513 = vmatmul.mubr.bf16.vlgmr.msra.gmra.mrb[8].mxu0 %v10522_v21  ;;  %v9118_v19 = vld [vmem:[%s11656_s3 + $0x4b0] ss:$12 sps:$4 sm:$0xff]  }
 0x213   : > { %3940 = vmatpush1.bf16.msra.mxu0 %v9034_v20  ;;  %3971 = vmatprep.mubr.bf16.mxu0 %v10530_v24  ;;  %v9126_v20 = vld [vmem:[%s11656_s3 + $0x4cc] ss:$12 sps:$4 sm:$0xff]  }
 0x214   : > { %3941 = vmatprep.subr.bf16.mxu0 %v9042_v22  ;;  %v9109_v22 = vld [vmem:[%s11656_s3 + $0x108] ss:$12 sps:$4 sm:$0xff]  }
 0x215   : > { %8002 = vmatpush3.bf16.msra.mxu1 %v9030_v23  ;;  %v9117_v23 = vld [vmem:[%s11656_s3 + $0x124] ss:$12 sps:$4 sm:$0xff]  }
 0x216   : > { %8442 = vmatprep.subr.bf16.mxu1 %v9470_v1 }
 0x217   : > { %3942 = vmatpush1.bf16.msra.mxu0 %v9040_v25  ;;  %v9124_v25 = vld [vmem:[%s11656_s3 + $0x4c8] ss:$12 sps:$4 sm:$0xff]  }
 0x218   : > { %3050 = vmatmul.mubr.bf16.vlgmr.msra.gmra.mrb[36].mxu1 %v10415_v41  ;;  %3943 = vmatprep.subr.bf16.mxu0 %v9048_v26  ;;  %v9072_v41 = vld [vmem:[%s11656_s3 + $0x3f4] ss:$12 sps:$4 sm:$0xff]   ;;  %v7312_v26 = vcombine.low %v10501_v14, %v10501_v14  ;;  %v9130_v14 = vld [vmem:[%s11656_s3 + $0x690] ss:$12 sps:$4 sm:$0xff]  }
 0x219   : > { %8443 = vmatpush3.bf16.msra.mxu1 %v9033_v27  ;;  %8446 = vmatprep.mubr.msk.bf16.mxu1 %vm9471_vm0, %v9470_v1  ;;  %v9132_v27 = vld [vmem:[%s11656_s3 + $0x694] ss:$12 sps:$4 sm:$0xff]  }
 0x21a   : > { %8444 = vmatprep.subr.bf16.mxu1 %v9470_v1 }
 0x21b   : > { %3944 = vmatpush1.bf16.msra.mxu0 %v9046_v28  ;;  %v9142_v28 = vld [vmem:[#allocation2 + $0x8] ss:$12 sps:$4 sm:$0x1e]  }
 0x21c   : > { %3945 = vmatprep.subr.bf16.mxu0 %v9054_v29  ;;  %v9115_v29 = vld [vmem:[%s11656_s3 + $0x120] ss:$12 sps:$4 sm:$0xff]  }
 0x21d   : > { %8445 = vmatpush3.bf16.msra.mxu1 %v9039_v30  ;;  %v9147_v30 = vld [vmem:[#allocation2 + $0x4] ss:$12 sps:$4 sm:$0x1e]  }
 0x21e   : > { %3398 = vmatprep.subr.bf16.mxu1 %v9045_v31  ;;  %v9123_v31 = vld [vmem:[%s11656_s3 + $0x13c] ss:$12 sps:$4 sm:$0xff]  }
 0x21f   : > { %3946 = vmatpush1.bf16.msra.mxu0 %v9052_v32  ;;  %v10724_v32 = vrot.slane %v7312_v26, 1 }
 0x220   : > { %8447 = vmatmul.mubr.msk.bf16.vlgmr.msra.gmra.mrb[40].mxu1 %vm2931_vm11, %v10434_v50  ;;  %3947 = vmatprep.subr.bf16.mxu0 %v9060_v33  ;;  %v9067_v50 = vld [vmem:[%s11656_s3 + $0x60] ss:$12 sps:$4 sm:$0xff]  }
 0x221   : > { %3399 = vmatpush1.bf16.msra.mxu1 %v9043_v34  ;;  %3430 = vmatprep.mubr.bf16.mxu1 %v10421_v43  ;;  %v9063_v43 = vld [vmem:[%s11656_s3 + $0x4c] ss:$12 sps:$4 sm:$0xff]   ;;  %v4211_v34 = vshrl.u32 %v9142_v28, 16 }
 0x222   : > { %3400 = vmatprep.subr.bf16.mxu1 %v9051_v35  ;;  %v9138_v33 = vld [vmem:[%s11656_s3 + $0x6ac] ss:$12 sps:$4 sm:$0xff]   ;;  %v4214_v35 = vshll.u32 %v9142_v28, 16 }
 0x223   : > { %3948 = vmatpush1.bf16.msra.mxu0 %v9058_v36  ;;  %v9121_v36 = vld [vmem:[%s11656_s3 + $0x138] ss:$12 sps:$4 sm:$0xff]  }
 0x224   : > { %3949 = vmatprep.subr.bf16.mxu0 %v9066_v37  ;;  %v4203_v37 = vshrl.u32 %v9147_v30, 16 }
 0x225   : > { %3401 = vmatpush1.bf16.msra.mxu1 %v9049_v38  ;;  %v4206_v38 = vshll.u32 %v9147_v30, 16  ;;  %v9181_v30 = vld [vmem:[%s11656_s3 + $0x698] ss:$12 sps:$4 sm:$0xff]  }
 0x226   : > { %3402 = vmatprep.subr.bf16.mxu1 %v9057_v39  ;;  %v9129_v39 = vld [vmem:[%s11656_s3 + $0x154] ss:$12 sps:$4 sm:$0xff]  }
 0x227   : > { %3950 = vmatpush1.bf16.msra.mxu0 %v9064_v40  ;;  %v9136_v40 = vld [vmem:[%s11656_s3 + $0x6a8] ss:$12 sps:$4 sm:$0xff]  }
 0x228   : > { %3951 = vmatprep.subr.bf16.mxu0 %v9072_v41  ;;  %v4213_v41 = vrot.slane %v4211_v34, 1  ;;  %v9184_v34 = vld [vmem:[%s11656_s3 + $0x6b0] ss:$12 sps:$4 sm:$0xff]  }
 0x229   : > { %3403 = vmatpush1.bf16.msra.mxu1 %v9055_v42  ;;  %v4216_v42 = vrot.slane %v4214_v35, 2  ;;  %v9182_v35 = vld [vmem:[%s11656_s3 + $0x470] ss:$12 sps:$4 sm:$0xff]  }
 0x22a   : > { %3404 = vmatprep.subr.bf16.mxu1 %v9063_v43  ;;  %v9143_v43 = vld [vmem:[%s11656_s3 + $0x5d8] ss:$12 sps:$4 sm:$0xff]  }
 0x22b   : > { %3952 = vmatpush1.bf16.msra.mxu0 %v9070_v44  ;;  %v9127_v44 = vld [vmem:[%s11656_s3 + $0x150] ss:$12 sps:$4 sm:$0xff]  }
 0x22c   : > { %3953 = vmatprep.subr.bf16.mxu0 %v9078_v45  ;;  %v4205_v45 = vrot.slane %v4203_v37, 1  ;;  %v9185_v37 = vld [vmem:[%s11656_s3 + $0x488] ss:$12 sps:$4 sm:$0xff]  }
 0x22d   : > { %3405 = vmatpush1.bf16.msra.mxu1 %v9061_v46  ;;  %v4208_v46 = vrot.slane %v4206_v38, 2  ;;  %v9186_v38 = vld [vmem:[%s11656_s3 + $0x3c8] ss:$12 sps:$4 sm:$0xff]  }
 0x22e   : > { %3406 = vmatprep.subr.bf16.mxu1 %v9069_v47  ;;  %v9135_v47 = vld [vmem:[%s11656_s3 + $0x16c] ss:$12 sps:$4 sm:$0xff]  }
 0x22f   : > { %3954 = vmatpush1.bf16.msra.mxu0 %v9076_v48  ;;  %v9144_v48 = vld [vmem:[%s11656_s3 + $0x518] ss:$12 sps:$4 sm:$0xff]  }
 0x230   : > { %3955 = vmatprep.subr.bf16.mxu0 %v9084_v49  ;;  %v10752_v49 = vor.u32 %v4216_v42, %v4213_v41  ;;  %v9189_v41 = vld [vmem:[%s11656_s3 + $0x4b8] ss:$12 sps:$4 sm:$0xff]  }
 0x231   : > { %3407 = vmatpush1.bf16.msra.mxu1 %v9067_v50  ;;  %v9151_v50 = vld [vmem:[%s11656_s3 + $0x5f0] ss:$12 sps:$4 sm:$0xff]   ;;  %v9190_v42 = vld [vmem:[%s11656_s3 + $0x3f8] ss:$12 sps:$4 sm:$0xff]  }
 0x232   : > { %3408 = vmatprep.subr.bf16.mxu1 %v9075_v53  ;;  %v9133_v53 = vld [vmem:[%s11656_s3 + $0x168] ss:$12 sps:$4 sm:$0xff]  }
 0x233   : > { %3956 = vmatpush1.bf16.msra.mxu0 %v9082_v56  ;;  %v10760_v56 = vor.u32 %v4208_v46, %v4205_v45  ;;  %v9193_v45 = vld [vmem:[%s11656_s3 + $0x4e8] ss:$12 sps:$4 sm:$0xff]   ;;  %v9194_v46 = vld [vmem:[%s11656_s3 + $0x500] ss:$12 sps:$4 sm:$0xff]  }
 0x234   : > { %3957 = vmatprep.subr.bf16.mxu0 %v9090_v57  ;;  %v9141_v57 = vld [vmem:[%s11656_s3 + $0x184] ss:$12 sps:$4 sm:$0xff]  }
 0x235   : > { %3409 = vmatpush1.bf16.msra.mxu1 %v9073_v58  ;;  %v9152_v58 = vld [vmem:[%s11656_s3 + $0x530] ss:$12 sps:$4 sm:$0xff]  }
 0x236   : > { %3410 = vmatprep.subr.bf16.mxu1 %v9081_v59  ;;  %v9155_v59 = vld [vmem:[%s11656_s3 + $0x608] ss:$12 sps:$4 sm:$0xff]  }
 0x237   : > { %3958 = vmatpush1.bf16.msra.mxu0 %v9088_v60  ;;  %v9139_v60 = vld [vmem:[%s11656_s3 + $0x180] ss:$12 sps:$4 sm:$0xff]  }
 0x238   : > { %3959 = vmatprep.subr.bf16.mxu0 %v9096_v61  ;;  %v9150_v61 = vld [vmem:[%s11656_s3 + $0x19c] ss:$12 sps:$4 sm:$0xff]  }
 0x239   : > { %3411 = vmatpush1.bf16.msra.mxu1 %v9079_v62  ;;  %v9156_v62 = vld [vmem:[%s11656_s3 + $0x548] ss:$12 sps:$4 sm:$0xff]  }
 0x23a   : > { %3412 = vmatprep.subr.bf16.mxu1 %v9087_v63  ;;  %v9158_v63 = vld [vmem:[%s11656_s3 + $0x620] ss:$12 sps:$4 sm:$0xff]  }
 0x23b   : > { %3960 = vmatpush1.bf16.msra.mxu0 %v9094_v0  ;;  %v9148_v0 = vld [vmem:[%s11656_s3 + $0x198] ss:$12 sps:$4 sm:$0xff]  }
 0x23c   : > { %3961 = vmatprep.subr.bf16.mxu0 %v9102_v2  ;;  %v9159_v2 = vld [vmem:[%s11656_s3 + $0x560] ss:$12 sps:$4 sm:$0xff]  }
 0x23d   : > { %3413 = vmatpush1.bf16.msra.mxu1 %v9085_v3  ;;  %v9154_v3 = vld [vmem:[%s11656_s3 + $0x188] ss:$12 sps:$4 sm:$0xff]  }
 0x23e   : > { %3414 = vmatprep.subr.bf16.mxu1 %v9093_v4  ;;  %v9153_v4 = vld [vmem:[#allocation2 + $0x8] ss:$0 sps:$4 sm:$0x77]  }
 0x23f   : > { %3962 = vmatpush1.bf16.msra.mxu0 %v9100_v6  ;;  %v9164_v6 = vld [vmem:[%s11656_s3 + $0x578] ss:$12 sps:$4 sm:$0xff]  }
 0x240   : > { %3963 = vmatprep.subr.bf16.mxu0 %v9108_v7  ;;  %v9168_v7 = vld [vmem:[%s11656_s3 + $0x650] ss:$12 sps:$4 sm:$0xff]  }
 0x241   : > { %3415 = vmatpush1.bf16.msra.mxu1 %v9091_v8  ;;  %v9157_v8 = vld [vmem:[%s11656_s3 + $0x1a0] ss:$12 sps:$4 sm:$0xff]  }
 0x242   : > { %3416 = vmatprep.subr.bf16.mxu1 %v9099_v9  ;;  %v9162_v9 = vld [vmem:[%s11656_s3 + $0x4e4] ss:$12 sps:$4 sm:$0xff]  }
 0x243   : > { %3964 = vmatpush1.bf16.msra.mxu0 %v9106_v10  ;;  %v9169_v10 = vld [vmem:[%s11656_s3 + $0x590] ss:$12 sps:$4 sm:$0xff]  }
 0x244   : > { %3965 = vmatprep.subr.bf16.mxu0 %v9114_v11  ;;  %v9145_v11 = vld [vmem:[#allocation2] ss:$12 sps:$4 sm:$0x1e]  }
 0x245   : > { %3417 = vmatpush1.bf16.msra.mxu1 %v9097_v12  ;;  %v9173_v12 = vld [vmem:[%s11656_s3 + $0x668] ss:$12 sps:$4 sm:$0xff]  }
 0x246   : > { %3418 = vmatprep.subr.bf16.mxu1 %v9105_v13  ;;  %v9160_v13 = vld [vmem:[%s11656_s3 + $0x4e0] ss:$12 sps:$4 sm:$0xff]  }
 0x247   : > { %3966 = vmatpush1.bf16.msra.mxu0 %v9112_v15  ;;  %v9167_v15 = vld [vmem:[%s11656_s3 + $0x4fc] ss:$12 sps:$4 sm:$0xff]  }
 0x248   : > { %3967 = vmatprep.subr.bf16.mxu0 %v9120_v16  ;;  %v9174_v16 = vld [vmem:[%s11656_s3 + $0x5a8] ss:$12 sps:$4 sm:$0xff]  }
 0x249   : > { %3419 = vmatpush1.bf16.msra.mxu1 %v9103_v17  ;;  %v9177_v17 = vld [vmem:[%s11656_s3 + $0x680] ss:$12 sps:$4 sm:$0xff]  }
 0x24a   : > { %3420 = vmatprep.subr.bf16.mxu1 %v9111_v18  ;;  %v4195_v18 = vshrl.u32 %v9145_v11, 16 }
 0x24b   : > { %3968 = vmatpush1.bf16.msra.mxu0 %v9118_v19  ;;  %v4198_v19 = vshll.u32 %v9145_v11, 16 }
 0x24c   : > { %3969 = vmatprep.subr.bf16.mxu0 %v9126_v20  ;;  %v9165_v20 = vld [vmem:[%s11656_s3 + $0x4f8] ss:$12 sps:$4 sm:$0xff]   ;;  %v4197_v26 = vrot.slane %v4195_v18, 1 }
 0x24d   : > { %3421 = vmatpush1.bf16.msra.mxu1 %v9109_v22  ;;  %v10840_v22 = vld [vmem:[#allocation2 + $0x8] ss:$0 sps:$4 sm:$0xee]  }
 0x24e   : > { %3422 = vmatprep.subr.bf16.mxu1 %v9117_v23  ;;  %v9171_v23 = vld [vmem:[%s11656_s3 + $0x428] ss:$12 sps:$4 sm:$0xff]   ;;  %v3645_v28 = vrot.slane %v10840_v22, 1 }
 0x24f   : > { %3970 = vmatpush1.bf16.msra.mxu0 %v9124_v25  ;;  %v9178_v25 = vld [vmem:[%s11656_s3 + $0x5c0] ss:$12 sps:$4 sm:$0xff]  }
 0x250   : > { %4552 = vmatprep.subr.bf16.mxu0 %v9132_v27  ;;  %v4200_v27 = vrot.slane %v4198_v19, 2 }
 0x251   : > { %3423 = vmatpush1.bf16.msra.mxu1 %v9115_v29  ;;  %v9175_v29 = vld [vmem:[%s11656_s3 + $0x440] ss:$12 sps:$4 sm:$0xff]  }
 0x252   : > { %3424 = vmatprep.subr.bf16.mxu1 %v9123_v31  ;;  %3972 = vmatmul.mubr.bf16.vlgmr.msra.gmra.mrb[12].mxu0 %v10724_v32  ;;  %v10859_v31 = vor.u32 %v4200_v27, %v4197_v26  ;;  %v9236_v26 = vld [vmem:[%s11656_s3 + $0x64c] ss:$12 sps:$4 sm:$0xff]   ;;  %v9234_v27 = vld [vmem:[%s11656_s3 + $0x648] ss:$12 sps:$4 sm:$0xff]  }
 0x253   : > { %4553 = vmatpush1.bf16.msra.mxu0 %v9130_v14  ;;  %4584 = vmatprep.mubr.bf16.mxu0 %v9472_v5  ;;  %v9176_v14 = vld [vmem:[%s11656_s3 + $0x380] ss:$12 sps:$4 sm:$0xff]  }
 0x254   : > { %4554 = vmatprep.subr.bf16.mxu0 %v9138_v33  ;;  %v9179_v33 = vld [vmem:[%s11656_s3 + $0x458] ss:$12 sps:$4 sm:$0xff]  }
 0x255   : > { %3425 = vmatpush1.bf16.msra.mxu1 %v9121_v36  ;;  %v9183_v36 = vld [vmem:[%s11656_s3 + $0x3b0] ss:$12 sps:$4 sm:$0xff]  }
 0x256   : > { %3426 = vmatprep.subr.bf16.mxu1 %v9129_v39  ;;  %v9187_v39 = vld [vmem:[%s11656_s3 + $0x4a0] ss:$12 sps:$4 sm:$0xff]  }
 0x257   : > { %4555 = vmatpush1.bf16.msra.mxu0 %v9136_v40  ;;  %v9188_v40 = vld [vmem:[%s11656_s3 + $0x3e0] ss:$12 sps:$4 sm:$0xff]  }
 0x258   : > { %8062 = vmatprep.subr.bf16.mxu0 %v9143_v43  ;;  %v9191_v43 = vld [vmem:[%s11656_s3 + $0x4d0] ss:$12 sps:$4 sm:$0xff]  }
 0x259   : > { %3427 = vmatpush1.bf16.msra.mxu1 %v9127_v44  ;;  %v9192_v44 = vld [vmem:[%s11656_s3 + $0x410] ss:$12 sps:$4 sm:$0xff]  }
 0x25a   : > { %3428 = vmatprep.subr.bf16.mxu1 %v9135_v47  ;;  %7500 = vmatmul.mubr.msk.bf16.vlgmr.msra.gmra.mrb[16].mxu0 %vm2931_vm11, %v10752_v49  ;;  %v9197_v47 = vld [vmem:[%s11656_s3 + $0x514] ss:$12 sps:$4 sm:$0xff]  }
 0x25b   : > { %8063 = vmatpush3.bf16.msra.mxu0 %v9144_v48  ;;  %4625 = vmatprep.mubr.bf16.mxu0 %v10760_v56  ;;  %v9195_v48 = vld [vmem:[%s11656_s3 + $0x510] ss:$12 sps:$4 sm:$0xff]  }
 0x25c   : > { %8064 = vmatprep.subr.bf16.mxu0 %v9151_v50  ;;  %v9203_v50 = vld [vmem:[%s11656_s3 + $0x544] ss:$12 sps:$4 sm:$0xff]  }
 0x25d   : > { %3429 = vmatpush1.bf16.msra.mxu1 %v9133_v53  ;;  %v9201_v53 = vld [vmem:[%s11656_s3 + $0x540] ss:$12 sps:$4 sm:$0xff]  }
 0x25e   : > { %3439 = vmatprep.subr.bf16.mxu1 %v9141_v57  ;;  %v9206_v57 = vld [vmem:[%s11656_s3 + $0x55c] ss:$12 sps:$4 sm:$0xff]  }
 0x25f   : > { %8065 = vmatpush3.bf16.msra.mxu0 %v9152_v58  ;;  %v9209_v58 = vld [vmem:[%s11656_s3 + $0x574] ss:$12 sps:$4 sm:$0xff]  }
 0x260   : > { %3431 = vmatmul.mubr.bf16.vlgmr.msra.gmra.mrb[44].mxu1 %v10522_v21  ;;  %8066 = vmatprep.subr.bf16.mxu0 %v9155_v59  ;;  %v9163_v21 = vld [vmem:[%s11656_s3 + $0x638] ss:$12 sps:$4 sm:$0xff]   ;;  %v9207_v59 = vld [vmem:[%s11656_s3 + $0x570] ss:$12 sps:$4 sm:$0xff]  }
 0x261   : > { %3440 = vmatpush1.bf16.msra.mxu1 %v9139_v60  ;;  %3471 = vmatprep.mubr.bf16.mxu1 %v9472_v5  ;;  %v9212_v60 = vld [vmem:[%s11656_s3 + $0x58c] ss:$12 sps:$4 sm:$0xff]  }
 0x262   : > { %3441 = vmatprep.subr.bf16.mxu1 %v9150_v61  ;;  %v9210_v61 = vld [vmem:[%s11656_s3 + $0x588] ss:$12 sps:$4 sm:$0xff]  }
 0x263   : > { %8067 = vmatpush3.bf16.msra.mxu0 %v9156_v62  ;;  %v9215_v62 = vld [vmem:[%s11656_s3 + $0x5a4] ss:$12 sps:$4 sm:$0xff]  }
 0x264   : > { %8068 = vmatprep.subr.bf16.mxu0 %v9158_v63  ;;  %v9213_v63 = vld [vmem:[%s11656_s3 + $0x5a0] ss:$12 sps:$4 sm:$0xff]  }
 0x265   : > { %3442 = vmatpush1.bf16.msra.mxu1 %v9148_v0  ;;  %v9218_v0 = vld [vmem:[%s11656_s3 + $0x5bc] ss:$12 sps:$4 sm:$0xff]  }
 0x266   : > { %8450 = vmatprep.subr.bf16.mxu1 %v9470_v1 }
 0x267   : > { %8069 = vmatpush3.bf16.msra.mxu0 %v9159_v2  ;;  %v9216_v2 = vld [vmem:[%s11656_s3 + $0x5b8] ss:$12 sps:$4 sm:$0xff]  }
 0x268   : > { %7238 = vmatmul.mubr.msk.bf16.vlgmr.msra.gmra.mrb[48].mxu1 %vm2931_vm11, %v9153_v4  ;;  %8070 = vmatprep.subr.bf16.mxu0 %v9163_v21  ;;  %v9221_v21 = vld [vmem:[%s11656_s3 + $0x5d4] ss:$12 sps:$4 sm:$0xff]  }
 0x269   : > { %8451 = vmatpush3.bf16.msra.mxu1 %v9154_v3  ;;  %8454 = vmatprep.mubr.msk.bf16.mxu1 %vm9471_vm0, %v9470_v1  ;;  %v9219_v3 = vld [vmem:[%s11656_s3 + $0x5d0] ss:$12 sps:$4 sm:$0xff]  }
 0x26a   : > { %8452 = vmatprep.subr.bf16.mxu1 %v9470_v1 }
 0x26b   : > { %8071 = vmatpush3.bf16.msra.mxu0 %v9164_v6  ;;  %v9222_v6 = vld [vmem:[%s11656_s3 + $0x5e8] ss:$12 sps:$4 sm:$0xff]  }
 0x26c   : > { %8072 = vmatprep.subr.bf16.mxu0 %v9168_v7  ;;  %v9227_v7 = vld [vmem:[%s11656_s3 + $0x604] ss:$12 sps:$4 sm:$0xff]  }
 0x26d   : > { %8453 = vmatpush3.bf16.msra.mxu1 %v9157_v8  ;;  %v9225_v8 = vld [vmem:[%s11656_s3 + $0x600] ss:$12 sps:$4 sm:$0xff]  }
 0x26e   : > { %3980 = vmatprep.subr.bf16.mxu1 %v9162_v9 }
 0x26f   : > { %8073 = vmatpush3.bf16.msra.mxu0 %v9169_v10  ;;  %v9230_v10 = vld [vmem:[%s11656_s3 + $0x61c] ss:$12 sps:$4 sm:$0xff]  }
 0x270   : > { %8455 = vmatmul.mubr.msk.bf16.vlgmr.msra.gmra.mrb[52].mxu1 %vm2931_vm11, %v9153_v4  ;;  %8074 = vmatprep.subr.bf16.mxu0 %v9173_v12  ;;  %v9224_v4 = vld [vmem:[%s11656_s3 + $0x5ec] ss:$12 sps:$4 sm:$0xff]  }
 0x271   : > { %3981 = vmatpush1.bf16.msra.mxu1 %v9160_v13  ;;  %4012 = vmatprep.mubr.bf16.mxu1 %v9472_v5  ;;  %v9172_v5 = vld [vmem:[%s11656_s3 + $0x368] ss:$12 sps:$4 sm:$0xff]  }
 0x272   : > { %3982 = vmatprep.subr.bf16.mxu1 %v9167_v15  ;;  %v9228_v15 = vld [vmem:[%s11656_s3 + $0x618] ss:$12 sps:$4 sm:$0xff]  }
 0x273   : > { %8075 = vmatpush3.bf16.msra.mxu0 %v9174_v16  ;;  %v9233_v16 = vld [vmem:[%s11656_s3 + $0x634] ss:$12 sps:$4 sm:$0xff]  }
 0x274   : > { %8076 = vmatprep.subr.bf16.mxu0 %v9177_v17 }
 0x275   : > { %3983 = vmatpush1.bf16.msra.mxu1 %v9165_v20 }
 0x276   : > { %8037 = vmatprep.subr.bf16.mxu1 %v9171_v23  ;;  %v9231_v23 = vld [vmem:[%s11656_s3 + $0x630] ss:$12 sps:$4 sm:$0xff]  }
 0x277   : > { %8077 = vmatpush3.bf16.msra.mxu0 %v9178_v25 }
 0x278   : > { %7369 = vmatmul.mubr.msk.bf16.vlgmr.msra.gmra.mrb[56].mxu1 %vm2931_vm11, %v3645_v28  ;;  %8466 = vmatprep.subr.bf16.mxu0 %v9470_v1 }
 0x279   : > { %8038 = vmatpush3.bf16.msra.mxu1 %v9172_v5  ;;  %4053 = vmatprep.mubr.bf16.mxu1 %v10530_v24  ;;  %v9180_v24 = vld [vmem:[%s11656_s3 + $0x398] ss:$12 sps:$4 sm:$0xff]  }
 0x27a   : > { %8039 = vmatprep.subr.bf16.mxu1 %v9175_v29  ;;  %4626 = vmatmul.mubr.bf16.vlgmr.msra.gmra.mrb[20].mxu0 %v10859_v31  ;;  %v9239_v5 = vld [vmem:[%s11656_s3 + $0x664] ss:$12 sps:$4 sm:$0xff]   ;;  %v9242_v29 = vld [vmem:[%s11656_s3 + $0x67c] ss:$12 sps:$4 sm:$0xff]  }
 0x27b   : > { %8467 = vmatpush3.bf16.msra.mxu0 %v9181_v30  ;;  %8470 = vmatprep.mubr.msk.bf16.mxu0 %vm9471_vm0, %v9470_v1  ;;  %v9240_v30 = vld [vmem:[%s11656_s3 + $0x678] ss:$12 sps:$4 sm:$0xff]  }
 0x27c   : > { %8468 = vmatprep.subr.bf16.mxu0 %v9470_v1 }
 0x27d   : > { %8040 = vmatpush3.bf16.msra.mxu1 %v9176_v14 }
 0x27e   : > { %8041 = vmatprep.subr.bf16.mxu1 %v9179_v33 }
 0x27f   : > { %8469 = vmatpush3.bf16.msra.mxu0 %v9184_v34 }
 0x281   : > { %8042 = vmatpush3.bf16.msra.mxu1 %v9180_v24 }
 0x282   : > { %8043 = vmatprep.subr.bf16.mxu1 %v9182_v35  ;;  %8471 = vmatmul.mubr.msk.bf16.vlgmr.msra.gmra.mrb[24].mxu0 %vm2931_vm11, %v10752_v49  ;;  %v9198_v49 = vld [vmem:[%s11656_s3 + $0x528] ss:$12 sps:$4 sm:$0xff]  }
 0x285   : > { %8044 = vmatpush3.bf16.msra.mxu1 %v9183_v36 }
 0x286   : > { %8045 = vmatprep.subr.bf16.mxu1 %v9185_v37 }
 0x289   : > { %8046 = vmatpush3.bf16.msra.mxu1 %v9186_v38 }
 0x28a   : > { %8047 = vmatprep.subr.bf16.mxu1 %v9187_v39 }
 0x28d   : > { %8048 = vmatpush3.bf16.msra.mxu1 %v9188_v40  ;;  %v9243_v40 = vld [vmem:[%s11658_s5 + $0x140] sm:$0xff]  }
 0x28e   : > { %8049 = vmatprep.subr.bf16.mxu1 %v9189_v41 }
 0x291   : > { %8050 = vmatpush3.bf16.msra.mxu1 %v9190_v42 }
 0x292   : > { %8051 = vmatprep.subr.bf16.mxu1 %v9191_v43 }
 0x295   : > { %8052 = vmatpush3.bf16.msra.mxu1 %v9192_v44 }
 0x296   : > { %8458 = vmatprep.subr.bf16.mxu1 %v9470_v1 }
 0x298   : > { %4054 = vmatmul.mubr.bf16.vlgmr.msra.gmra.mrb[60].mxu1 %v10724_v32  ;;  %v9200_v32 = vld [vmem:[%s11656_s3 + $0x52c] ss:$12 sps:$4 sm:$0xff]  }
 0x299   : > { %8459 = vmatpush3.bf16.msra.mxu1 %v9193_v45  ;;  %8462 = vmatprep.mubr.msk.bf16.mxu1 %vm9471_vm0, %v9470_v1 }
 0x29a   : > { %8460 = vmatprep.subr.bf16.mxu1 %v9470_v1 }
 0x29d   : > { %8461 = vmatpush3.bf16.msra.mxu1 %v9194_v46 }
 0x29e   : > { %4511 = vmatprep.subr.bf16.mxu1 %v9197_v47 }
 0x2a0   : > { %8463 = vmatmul.mubr.msk.bf16.vlgmr.msra.gmra.mrb[64].mxu1 %vm2931_vm11, %v3645_v28  ;;  %v9237_v28 = vld [vmem:[%s11656_s3 + $0x660] ss:$12 sps:$4 sm:$0xff]  }
 0x2a1   : > { %4512 = vmatpush1.bf16.msra.mxu1 %v9195_v48  ;;  %4543 = vmatprep.mubr.bf16.mxu1 %v10760_v56  ;;  %v9204_v56 = vld [vmem:[%s11656_s3 + $0x558] ss:$12 sps:$4 sm:$0xff]   ;;  %v9245_v48 = vld [vmem:[%s11658_s5 + $0x150] sm:$0xff]  }
 0x2a2   : > { %4513 = vmatprep.subr.bf16.mxu1 %v9200_v32  ;;  %v9246_v32 = vld [vmem:[%s11658_s5 + $0x158] sm:$0xff]  }
 0x2a5   : > { %4514 = vmatpush1.bf16.msra.mxu1 %v9198_v49  ;;  %v9247_v49 = vld [vmem:[%s11658_s5 + $0x160] sm:$0xff]  }
 0x2a6   : > { %4515 = vmatprep.subr.bf16.mxu1 %v9203_v50  ;;  %v9248_v50 = vld [vmem:[%s11658_s5 + $0x168] sm:$0xff]  }
 0x2a9   : > { %4516 = vmatpush1.bf16.msra.mxu1 %v9201_v53  ;;  %v9249_v53 = vld [vmem:[%s11658_s5 + $0x170] sm:$0xff]  }
 0x2aa   : > { %4517 = vmatprep.subr.bf16.mxu1 %v9206_v57  ;;  %v9250_v57 = vld [vmem:[%s11658_s5 + $0x178] sm:$0xff]  }
 0x2ad   : > { %4518 = vmatpush1.bf16.msra.mxu1 %v9204_v56 }
 0x2ae   : > { %4519 = vmatprep.subr.bf16.mxu1 %v9209_v58 }
 0x2b1   : > { %4520 = vmatpush1.bf16.msra.mxu1 %v9207_v59 }
 0x2b2   : > { %4521 = vmatprep.subr.bf16.mxu1 %v9212_v60 }
 0x2b5   : > { %4522 = vmatpush1.bf16.msra.mxu1 %v9210_v61  ;;  %v9260_v61 = vld [vmem:[%s11658_s5 + $0x100] sm:$0xff]  }
 0x2b6   : > { %4523 = vmatprep.subr.bf16.mxu1 %v9215_v62  ;;  %8087 = vmatprep.subr.bf16.mxu0 %v9260_v61  ;;  %v9261_v62 = vld [vmem:[%s11658_s5 + $0xc0] sm:$0xff]  }
 0x2b7   : > { %8088 = vmatpush3.bf16.msra.mxu0 %v9261_v62 }
 0x2b9   : > { %4524 = vmatpush1.bf16.msra.mxu1 %v9213_v63  ;;  %v9263_v63 = vld [vmem:[%s11658_s5 + $0x108] sm:$0xff]  }
 0x2ba   : > { %4525 = vmatprep.subr.bf16.mxu1 %v9218_v0  ;;  %8089 = vmatprep.subr.bf16.mxu0 %v9263_v63 }
 0x2bd   : > { %4526 = vmatpush1.bf16.msra.mxu1 %v9216_v2  ;;  %v9264_v2 = vld [vmem:[%s11658_s5 + $0xc8] sm:$0xff]  }
 0x2be   : > { %4527 = vmatprep.subr.bf16.mxu1 %v9221_v21  ;;  %8090 = vmatpush3.bf16.msra.mxu0 %v9264_v2  ;;  %v4676_v2 = vld [vmem:[%s11657_s4] sm:$0x7] }
 0x2c1   : > { %4528 = vmatpush1.bf16.msra.mxu1 %v9219_v3 }
 0x2c2   : > { %4529 = vmatprep.subr.bf16.mxu1 %v9224_v4 }
 0x2c5   : > { %4530 = vmatpush1.bf16.msra.mxu1 %v9222_v6  ;;  %v2969_v9 = vpop.f32.mrb[4].mxu0 }
 0x2c6   : > { %4531 = vmatprep.subr.bf16.mxu1 %v9227_v7  ;;  %v2971_v11 = vpop.f32.mrb[5].mxu0 }
 0x2c7   : > { %v2973_v12 = vpop.f32.mrb[6].mxu0 }
 0x2c8   : > { %v2974_v13 = vpop.f32.mrb[7].mxu0  ;;  %v9266_v12 = vld [vmem:[%s11658_s5 + $0x110] sm:$0xff]  }
 0x2c9   : > { %4532 = vmatpush1.bf16.msra.mxu1 %v9225_v8  ;;  %8091 = vmatprep.subr.bf16.mxu0 %v9266_v12 }
 0x2ca   : > { %4533 = vmatprep.subr.bf16.mxu1 %v9230_v10 }
 0x2cb   : > { %v3010_v17 = vpop.f32.mrb[32].mxu1 }
 0x2cc   : > { %v10999_v18 = vadd.f32 %v3010_v17, %v2969_v9  ;;  %v3012_v19 = vpop.f32.mrb[33].mxu1 }
 0x2cd   : > { %4534 = vmatpush1.bf16.msra.mxu1 %v9228_v15  ;;  %v11001_v20 = vadd.f32 %v3012_v19, %v2971_v11  ;;  %v3014_v22 = vpop.f32.mrb[34].mxu1  ;;  %v9267_v15 = vld [vmem:[%s11658_s5 + $0xd0] sm:$0xff]  }
 0x2ce   : > { %v3015_v25 = vpop.f32.mrb[35].mxu1  ;;  %4535 = vmatprep.subr.bf16.mxu1 %v9233_v16  ;;  %8092 = vmatpush3.bf16.msra.mxu0 %v9267_v15 }
 0x2cf   : > { %v9272_v25 = vld [vmem:[%s11658_s5 + $0x120] sm:$0xff]  }
 0x2d1   : > { %4536 = vmatpush1.bf16.msra.mxu1 %v9231_v23  ;;  %v9270_v23 = vld [vmem:[%s11658_s5 + $0xd8] sm:$0xff]  }
 0x2d2   : > { %4537 = vmatprep.subr.bf16.mxu1 %v9236_v26  ;;  %v9273_v26 = vld [vmem:[%s11658_s5 + $0xe0] sm:$0xff]  }
 0x2d5   : > { %4538 = vmatpush1.bf16.msra.mxu1 %v9234_v27  ;;  %v9275_v27 = vld [vmem:[%s11658_s5 + $0x128] sm:$0xff]  }
 0x2d6   : > { %4539 = vmatprep.subr.bf16.mxu1 %v9239_v5 }
 0x2d9   : > { %4540 = vmatpush1.bf16.msra.mxu1 %v9237_v28 }
 0x2da   : > { %4541 = vmatprep.subr.bf16.mxu1 %v9242_v29 }
 0x2dd   : > { %4542 = vmatpush1.bf16.msra.mxu1 %v9240_v30 }
 0x2de   : > { %8474 = vmatprep.subr.bf16.mxu1 %v9470_v1 }
 0x2e0   : > { %4544 = vmatmul.mubr.bf16.vlgmr.msra.gmra.mrb[68].mxu1 %v10859_v31  ;;  %v9244_v31 = vld [vmem:[%s11658_s5 + $0x148] sm:$0xff]  }
 0x2e1   : > { %8490 = vmatprep.mubr.msk.bf16.mxu1 %vm9471_vm0, %v9470_v1  ;;  %8475 = vmatpush3.bf16.msra.mxu1 %v9243_v40 }
 0x2e2   : > { %8476 = vmatprep.subr.bf16.mxu1 %v9470_v1 }
 0x2e5   : > { %v8028_v14 = vpop.f32.mrb[8].mxu0  ;;  %8477 = vmatpush3.bf16.msra.mxu1 %v9244_v31  ;;  %v9282_v31 = vld [vmem:[%s11658_s5 + $0xf8] sm:$0xff]  }
 0x2e6   : > { %v8029_v33 = vpop.f32.mrb[9].mxu0  ;;  %8478 = vmatprep.subr.bf16.mxu1 %v9470_v1 }
 0x2e7   : > { %v8030_v34 = vadd.f32 %v8029_v33, %v8028_v14  ;;  %v8031_v24 = vpop.f32.mrb[10].mxu0  ;;  %v9276_v14 = vld [vmem:[%s11658_s5 + $0xe8] sm:$0xff]  }
 0x2e8   : > { %v8032_v35 = vpop.f32.mrb[11].mxu0  ;;  %v9279_v24 = vld [vmem:[%s11658_s5 + $0xf0] sm:$0xff]  }
 0x2e9   : > { %8479 = vmatpush3.bf16.msra.mxu1 %v9245_v48  ;;  %v9281_v35 = vld [vmem:[%s11658_s5 + $0x138] sm:$0xff]  }
 0x2ea   : > { %8480 = vmatprep.subr.bf16.mxu1 %v9470_v1 }
 0x2eb   : > { %v8003_v36 = vpop.f32.mrb[36].mxu1 }
 0x2ec   : > { %v8004_v37 = vpop.f32.mrb[37].mxu1 }
 0x2ed   : > { %v8005_v38 = vadd.f32 %v8004_v37, %v8003_v36  ;;  %v8006_v39 = vpop.f32.mrb[38].mxu1  ;;  %8481 = vmatpush3.bf16.msra.mxu1 %v9246_v32 }
 0x2ee   : > { %v8007_v41 = vpop.f32.mrb[39].mxu1  ;;  %8482 = vmatprep.subr.bf16.mxu1 %v9470_v1 }
 0x2f1   : > { %8483 = vmatpush3.bf16.msra.mxu1 %v9247_v49 }
 0x2f2   : > { %8484 = vmatprep.subr.bf16.mxu1 %v9470_v1 }
 0x2f3   : > { %v3091_v42 = vpop.f32.mrb[40].mxu1 }
 0x2f4   : > { %v3092_v43 = vadd.f32 %v8005_v38, %v3091_v42  ;;  %v8448_v44 = vpop.f32.mrb[41].mxu1 }
 0x2f5   : > { %v3094_v45 = vpop.f32.mrb[42].mxu1  ;;  %8485 = vmatpush3.bf16.msra.mxu1 %v9248_v50 }
 0x2f6   : > { %v8449_v46 = vpop.f32.mrb[43].mxu1  ;;  %v3515_v47 = vadd.f32 %v8030_v34, %v3092_v43  ;;  %8486 = vmatprep.subr.bf16.mxu1 %v9470_v1  ;;  %v9278_v34 = vld [vmem:[%s11658_s5 + $0x130] sm:$0xff]   ;;  %v9286_v45 = vld [vmem:[%s11658_s5 + $0x40] sm:$0xff]  }
 0x2f9   : > { %8487 = vmatpush3.bf16.msra.mxu1 %v9249_v53 }
 0x2fa   : > { %8488 = vmatprep.subr.bf16.mxu1 %v9470_v1 }
 0x2fd   : > { %8489 = vmatpush3.bf16.msra.mxu1 %v9250_v57 }
 0x2fe   : > { %8494 = vmatprep.subr.bf16.mxu1 %v9470_v1 }
 0x325   : > { %v3973_v56 = vpop.f32.mrb[12].mxu0 }
 0x326   : > { %v3975_v58 = vpop.f32.mrb[13].mxu0 }
 0x327   : > { %v3977_v59 = vpop.f32.mrb[14].mxu0 }
 0x328   : > { %v3978_v60 = vpop.f32.mrb[15].mxu0 }
 0x32d   : > { %v11069_v0 = vpop.f32.mrb[16].mxu0 }
 0x32e   : > { %v11074_v21 = vpop.f32.mrb[17].mxu0 }
 0x32f   : > { %v4590_v3 = vpop.f32.mrb[18].mxu0 }
 0x330   : > { %v4591_v4 = vpop.f32.mrb[19].mxu0 }
 0x333   : > { %v3432_v6 = vpop.f32.mrb[44].mxu1 }
 0x334   : > { %v3433_v7 = vadd.f32 %v3432_v6, %v10999_v18  ;;  %v3434_v8 = vpop.f32.mrb[45].mxu1 }
 0x335   : > { %v3435_v9 = vadd.f32 %v3434_v8, %v11001_v20  ;;  %v3436_v10 = vpop.f32.mrb[46].mxu1  ;;  %v9269_v20 = vld [vmem:[%s11658_s5 + $0x118] sm:$0xff]   ;;  %v4689_v8 = vrot.slane %v4676_v2, %v2408_v54  ;;  %v9254_v54 = vld [vmem:[%s11658_s5 + $0x90] sm:$0xff]  }
 0x336   : > { %v3437_v11 = vpop.f32.mrb[47].mxu1  ;;  %8093 = vmatprep.subr.bf16.mxu0 %v9269_v20  ;;  %v9257_v20 = vld [vmem:[%s11658_s5 + $0xa8] sm:$0xff]  }
 0x337   : > { %8094 = vmatpush3.bf16.msra.mxu0 %v9270_v23  ;;  %v9258_v23 = vld [vmem:[%s11658_s5 + $0xb0] sm:$0xff]  }
 0x338   : > { %8095 = vmatprep.subr.bf16.mxu0 %v9272_v25  ;;  %v9259_v25 = vld [vmem:[%s11658_s5 + $0xb8] sm:$0xff]  }
 0x33b   : > { %v3473_v13 = vpop.f32.mrb[48].mxu1  ;;  %8096 = vmatpush3.bf16.msra.mxu0 %v9273_v26  ;;  %v9262_v26 = vld [vmem:[%s11658_s5 + $0x200] sm:$0xff]  }
 0x33c   : > { %v3474_v16 = vadd.f32 %v3473_v13, %v3433_v7  ;;  %v3475_v17 = vpop.f32.mrb[49].mxu1  ;;  %8097 = vmatprep.subr.bf16.mxu0 %v9275_v27  ;;  %v9265_v27 = vld [vmem:[%s11658_s5 + $0x208] sm:$0xff]  }
 0x33d   : > { %v3476_v19 = vadd.f32 %v3475_v17, %v3435_v9  ;;  %v3477_v22 = vpop.f32.mrb[50].mxu1 }
 0x33e   : > { %v3478_v18 = vpop.f32.mrb[51].mxu1  ;;  %v9255_v22 = vld [vmem:[%s11658_s5 + $0x98] sm:$0xff]  }
 0x33f   : > { %8098 = vmatpush3.bf16.msra.mxu0 %v9276_v14  ;;  %v9256_v18 = vld [vmem:[%s11658_s5 + $0xa0] sm:$0xff]  }
 0x340   : > { %8099 = vmatprep.subr.bf16.mxu0 %v9278_v34 }
 0x343   : > { %v3554_v5 = vpop.f32.mrb[52].mxu1  ;;  %8100 = vmatpush3.bf16.msra.mxu0 %v9279_v24  ;;  %v4685_v24 = vrot.slane %v4676_v2, %v2404_v55  ;;  %v9277_v55 = vld [vmem:[%s11658_s5 + $0x228] sm:$0xff]  }
 0x344   : > { %v3555_v28 = vadd.f32 %v3554_v5, %v3515_v47  ;;  %v8456_v29 = vpop.f32.mrb[53].mxu1  ;;  %8101 = vmatprep.subr.bf16.mxu0 %v9281_v35  ;;  %v9268_v5 = vld [vmem:[%s11658_s5 + $0x210] sm:$0xff]  }
 0x345   : > { %v3557_v30 = vpop.f32.mrb[54].mxu1 }
 0x346   : > { %v8457_v33 = vpop.f32.mrb[55].mxu1  ;;  %v4681_v30 = vrot.slane %v4676_v2, %v2400_v52  ;;  %v9301_v2 = vld [vmem:[%s11658_s5 + $0x2e0] sm:$0xff]  }
 0x347   : > { %8102 = vmatpush3.bf16.msra.mxu0 %v9282_v31  ;;  %v9271_v33 = vld [vmem:[%s11658_s5 + $0x218] sm:$0xff]  }
 0x348   : > { %8118 = vmatprep.subr.bf16.mxu0 %v9286_v45  ;;  %v9283_v31 = vld [vmem:[%s11658_s5 + $0x238] sm:$0xff]  }
 0x34b   : > { %v4014_v36 = vpop.f32.mrb[56].mxu1 }
 0x34c   : > { %v4015_v37 = vadd.f32 %v4014_v36, %v3973_v56  ;;  %v4016_v38 = vpop.f32.mrb[57].mxu1 }
 0x34d   : > { %v4017_v39 = vadd.f32 %v4016_v38, %v3975_v58  ;;  %v4018_v40 = vpop.f32.mrb[58].mxu1  ;;  %v8078_v41 = vpop.f32.mrb[20].mxu0  ;;  %v9274_v38 = vld [vmem:[%s11658_s5 + $0x220] sm:$0xff]  }
 0x34e   : > { %v11114_v42 = vadd.f32 %v4015_v37, %v3474_v16  ;;  %v4019_v43 = vpop.f32.mrb[59].mxu1  ;;  %v8079_v44 = vpop.f32.mrb[21].mxu0  ;;  %v9252_v16 = vld [vmem:[%s11658_s5 + $0x80] sm:$0xff]  }
 0x34f   : > { %v11119_v46 = vadd.f32 %v4017_v39, %v3476_v19  ;;  %v8080_v47 = vadd.f32 %v8079_v44, %v8078_v41  ;;  %v8081_v48 = vpop.f32.mrb[22].mxu0  ;;  %v9253_v19 = vld [vmem:[%s11658_s5 + $0x88] sm:$0xff]   ;;  %v9280_v41 = vld [vmem:[%s11658_s5 + $0x230] sm:$0xff]  }
 0x350   : > { %v8082_v32 = vpop.f32.mrb[23].mxu0 }
 0x355   : > { %v4667_v49 = vpop.f32.mrb[24].mxu0 }
 0x356   : > { %v4668_v50 = vadd.f32 %v8080_v47, %v4667_v49  ;;  %v8472_v53 = vpop.f32.mrb[25].mxu0  ;;  %v9288_v49 = vld [vmem:[%s11658_s5] sm:$0xff]  }
 0x357   : > { %v4670_v57 = vpop.f32.mrb[26].mxu0  ;;  %v9292_v53 = vld [vmem:[%s11658_s5 + $0x2c8] sm:$0xff]  }
 0x358   : > { %v8473_v56 = vpop.f32.mrb[27].mxu0  ;;  %v9291_v57 = vld [vmem:[%s11658_s5 + $0x8] sm:$0xff]  }
 0x359   : > { %v9293_v56 = vld [vmem:[%s11658_s5 + $0x50] sm:$0xff]  }
 0x36b   : > { %v8053_v58 = vpop.f32.mrb[60].mxu1 }
 0x36c   : > { %v8054_v59 = vpop.f32.mrb[61].mxu1 }
 0x36d   : > { %v8055_v60 = vadd.f32 %v8054_v59, %v8053_v58  ;;  %v8056_v61 = vpop.f32.mrb[62].mxu1  ;;  %v9295_v58 = vld [vmem:[%s11658_s5 + $0x2d0] sm:$0xff]  }
 0x36e   : > { %v8057_v62 = vpop.f32.mrb[63].mxu1  ;;  %v9294_v59 = vld [vmem:[%s11658_s5 + $0x10] sm:$0xff]   ;;  %v9298_v61 = vld [vmem:[%s11658_s5 + $0x2d8] sm:$0xff]  }
 0x36f   : > { %v9297_v62 = vld [vmem:[%s11658_s5 + $0x18] sm:$0xff]  }
 0x373   : > { %v4095_v63 = vpop.f32.mrb[64].mxu1 }
 0x374   : > { %v4096_v3 = vadd.f32 %v8055_v60, %v4095_v63  ;;  %v8464_v4 = vpop.f32.mrb[65].mxu1  ;;  %v9296_v60 = vld [vmem:[%s11658_s5 + $0x58] sm:$0xff]   ;;  %v9299_v63 = vld [vmem:[%s11658_s5 + $0x60] sm:$0xff]  }
 0x375   : > { %v4098_v6 = vpop.f32.mrb[66].mxu1  ;;  %v9302_v4 = vld [vmem:[%s11658_s5 + $0x68] sm:$0xff]  }
 0x376   : > { %v4103_v7 = vadd.f32 %v4096_v3, %v3555_v28  ;;  %v8465_v9 = vpop.f32.mrb[67].mxu1  ;;  %v9300_v3 = vld [vmem:[%s11658_s5 + $0x20] sm:$0xff]   ;;  %v9304_v6 = vld [vmem:[%s11658_s5 + $0x2e8] sm:$0xff]  }
 0x377   : > { %v9307_v9 = vld [vmem:[%s11658_s5 + $0x2f0] sm:$0xff]  }
 0x378   : > { %v4675_v10 = vadd.f32 %v4668_v50, %v4103_v7  ;;  %v9290_v50 = vld [vmem:[%s11658_s5 + $0x48] sm:$0xff]  }
 0x379   : > { %v9303_v7 = vld [vmem:[%s11658_s5 + $0x28] sm:$0xff]  }
 0x37a   : > { %v4695_v11 = vadd.f32 %v4689_v8, %v4675_v10  ;;  %v9305_v8 = vld [vmem:[%s11658_s5 + $0x70] sm:$0xff]  }
 0x37b   : > { %v9306_v10 = vld [vmem:[%s11658_s5 + $0x30] sm:$0xff]  }
 0x37c   : > { %v4698_v12 = vmax.f32 %v4695_v11, 0.0  ;;  %v9308_v11 = vld [vmem:[%s11658_s5 + $0x78] sm:$0xff]  }
 0x37e   : > { %v7914_v13 = vpack.c.bf16 %v4698_v12, %v4698_v12  ;;  %v9310_v12 = vld [vmem:[%s11658_s5 + $0x2f8] sm:$0xff]  }
 0x380   : > { %4713 = vst [vmem:[#allocation3 + $0x8] sm:$0x7] %v7914_v13 }
 0x387   : > { %v9251_v15 = vld [vmem:[#allocation3 + $0x8] ss:$0 sps:$4 sm:$0x11]  }
 0x388   : > { %v4828_v17 = vshrl.u32 %v9251_v15, 16 }
 0x38a   : > { %8491 = vmatmul.mubr.bf16.vlgmr.msra.gmra.mrb[72].mxu1 %v4828_v17  ;;  %v9311_v17 = vld [vmem:[%s11658_s5 + $0x1c0] sm:$0xff]  }
 0x38b   : > { %8495 = vmatpush3.bf16.msra.mxu1 %v9252_v16  ;;  %8510 = vmatprep.mubr.msk.bf16.mxu1 %vm9471_vm0, %v9470_v1 }
 0x38c   : > { %8496 = vmatprep.subr.bf16.mxu1 %v9470_v1 }
 0x38f   : > { %8497 = vmatpush3.bf16.msra.mxu1 %v9253_v19 }
 0x390   : > { %8498 = vmatprep.subr.bf16.mxu1 %v9470_v1 }
 0x393   : > { %8499 = vmatpush3.bf16.msra.mxu1 %v9254_v54  ;;  %v9315_v54 = vld [vmem:[%s11658_s5 + $0x380] sm:$0xff]  }
 0x394   : > { %8500 = vmatprep.subr.bf16.mxu1 %v9470_v1 }
 0x397   : > { %8501 = vmatpush3.bf16.msra.mxu1 %v9255_v22 }
 0x398   : > { %8502 = vmatprep.subr.bf16.mxu1 %v9470_v1 }
 0x39b   : > { %8503 = vmatpush3.bf16.msra.mxu1 %v9256_v18  ;;  %v9312_v18 = vld [vmem:[%s11658_s5 + $0x180] sm:$0xff]  }
 0x39c   : > { %8504 = vmatprep.subr.bf16.mxu1 %v9470_v1 }
 0x39f   : > { %8505 = vmatpush3.bf16.msra.mxu1 %v9257_v20  ;;  %v9316_v20 = vld [vmem:[%s11658_s5 + $0x1c8] sm:$0xff]  }
 0x3a0   : > { %8506 = vmatprep.subr.bf16.mxu1 %v9470_v1 }
 0x3a3   : > { %8507 = vmatpush3.bf16.msra.mxu1 %v9258_v23 }
 0x3a4   : > { %8508 = vmatprep.subr.bf16.mxu1 %v9470_v1 }
 0x3a7   : > { %8509 = vmatpush3.bf16.msra.mxu1 %v9259_v25  ;;  %v9318_v25 = vld [vmem:[%s11658_s5 + $0x388] sm:$0xff]  }
 0x3a8   : > { %8514 = vmatprep.subr.bf16.mxu1 %v9470_v1 }
 0x3aa   : > { %8511 = vmatmul.mubr.bf16.vlgmr.msra.gmra.mrb[76].mxu1 %v9251_v15  ;;  %v9309_v15 = vld [vmem:[%s11658_s5 + $0x38] sm:$0xff]  }
 0x3ab   : > { %8515 = vmatpush3.bf16.msra.mxu1 %v9262_v26  ;;  %8530 = vmatprep.mubr.msk.bf16.mxu1 %vm9471_vm0, %v9470_v1  ;;  %v9317_v26 = vld [vmem:[%s11658_s5 + $0x188] sm:$0xff]  }
 0x3ac   : > { %8516 = vmatprep.subr.bf16.mxu1 %v9470_v1 }
 0x3af   : > { %8517 = vmatpush3.bf16.msra.mxu1 %v9265_v27  ;;  %v9319_v27 = vld [vmem:[%s11658_s5 + $0x1d0] sm:$0xff]  }
 0x3b0   : > { %8518 = vmatprep.subr.bf16.mxu1 %v9470_v1 }
 0x3b3   : > { %v4545_v28 = vpop.f32.mrb[68].mxu1  ;;  %8519 = vmatpush3.bf16.msra.mxu1 %v9268_v5  ;;  %v9321_v5 = vld [vmem:[%s11658_s5 + $0x390] sm:$0xff]  }
 0x3b4   : > { %v4587_v29 = vadd.f32 %v11069_v0, %v4545_v28  ;;  %v4547_v14 = vpop.f32.mrb[69].mxu1  ;;  %8520 = vmatprep.subr.bf16.mxu1 %v9470_v1  ;;  %v9320_v28 = vld [vmem:[%s11658_s5 + $0x190] sm:$0xff]  }
 0x3b5   : > { %v4589_v34 = vadd.f32 %v11074_v21, %v4547_v14  ;;  %v4549_v35 = vpop.f32.mrb[70].mxu1  ;;  %v9323_v14 = vld [vmem:[%s11658_s5 + $0x198] sm:$0xff]  }
 0x3b6   : > { %v4673_v36 = vadd.f32 %v4587_v29, %v11114_v42  ;;  %v4550_v0 = vpop.f32.mrb[71].mxu1  ;;  %v11201_v42 = vld [vmem:[#allocation3 + $0x8] ss:$0 sps:$4 sm:$0x22]   ;;  %v9322_v29 = vld [vmem:[%s11658_s5 + $0x1d8] sm:$0xff]   ;;  %v9328_v35 = vld [vmem:[%s11658_s5 + $0x1e8] sm:$0xff]  }
 0x3b7   : > { %v4674_v37 = vadd.f32 %v4589_v34, %v11119_v46  ;;  %8521 = vmatpush3.bf16.msra.mxu1 %v9271_v33  ;;  %v9289_v46 = vld [vmem:[%s11658_s5 + $0x2c0] sm:$0xff]   ;;  %v5345_v48 = vrot.slane %v11201_v42, 1  ;;  %v5632_v16 = vshrl.u32 %v11201_v42, 16  ;;  %v9329_v0 = vld [vmem:[%s11658_s5 + $0x1a8] sm:$0xff]  }
 0x3b8   : > { %v4693_v52 = vadd.f32 %v4681_v30, %v4673_v36  ;;  %8522 = vmatprep.subr.bf16.mxu1 %v9470_v1  ;;  %v9324_v30 = vld [vmem:[%s11658_s5 + $0x398] sm:$0xff]   ;;  %v9325_v33 = vld [vmem:[%s11658_s5 + $0x1e0] sm:$0xff]   ;;  %v9330_v36 = vld [vmem:[%s11658_s5 + $0x3a8] sm:$0xff]  }
 0x3b9   : > { %v4694_v39 = vadd.f32 %v4685_v24, %v4674_v37  ;;  %v5634_v22 = vrot.slane %v5632_v16, 1  ;;  %v9327_v34 = vld [vmem:[%s11658_s5 + $0x3a0] sm:$0xff]   ;;  %v9331_v37 = vld [vmem:[%s11658_s5 + $0x1f0] sm:$0xff]  }
 0x3ba   : > { %v4696_v21 = vmax.f32 %v4693_v52, 0.0  ;;  %v9326_v24 = vld [vmem:[%s11658_s5 + $0x1a0] sm:$0xff]   ;;  %v9333_v52 = vld [vmem:[%s11658_s5 + $0x3b0] sm:$0xff]  }
 0x3bb   : > { %v4697_v51 = vmax.f32 %v4694_v39, 0.0  ;;  %8523 = vmatpush3.bf16.msra.mxu1 %v9274_v38  ;;  %v9332_v38 = vld [vmem:[%s11658_s5 + $0x1b0] sm:$0xff]   ;;  %v9334_v39 = vld [vmem:[%s11658_s5 + $0x1f8] sm:$0xff]   ;;  %v9340_v42 = vld [vmem:[%s11658_s5 + $0x440] sm:$0xff]  }
 0x3bc   : > { %8524 = vmatprep.subr.bf16.mxu1 %v9470_v1 }
 0x3bd   : > { %v7913_v40 = vpack.c.bf16 %v4697_v51, %v4696_v21  ;;  %v9336_v21 = vld [vmem:[%s11658_s5 + $0x3b8] sm:$0xff]  }
 0x3be   : > { %v9335_v51 = vld [vmem:[%s11658_s5 + $0x1b8] sm:$0xff]  }
 0x3bf   : > { %4712 = vst [vmem:[#allocation3] sm:$0x77] %v7913_v40  ;;  %8525 = vmatpush3.bf16.msra.mxu1 %v9277_v55  ;;  %v11377_v55 = vld [vmem:[#allocation3 + $0x8] ss:$0 sps:$4 sm:$0x44]  }
 0x3c0   : > { %8526 = vmatprep.subr.bf16.mxu1 %v9470_v1 }
 0x3c3   : > { %8527 = vmatpush3.bf16.msra.mxu1 %v9280_v41  ;;  %v9337_v41 = vld [vmem:[%s11658_s5 + $0x280] sm:$0xff]  }
 0x3c4   : > { %8528 = vmatprep.subr.bf16.mxu1 %v9470_v1 }
 0x3c6   : > { %v4714_v43 = vld [vmem:[#allocation3] sm:$0x11]  ;;  %v11282_v13 = vld [vmem:[#allocation3] sm:$0x22] }
 0x3c7   : > { %v11203_v44 = vcombine.low %v4714_v43, %v4714_v43  ;;  %v7553_v45 = vcombine.high %v4714_v43, %v4714_v43  ;;  %8529 = vmatpush3.bf16.msra.mxu1 %v9283_v31  ;;  %v11294_v19 = vcombine.high %v11282_v13, %v11282_v13  ;;  %v11381_v40 = vcombine.low %v11282_v13, %v11282_v13  ;;  %v9362_v13 = vld [vmem:[%s11658_s5 + $0x340] sm:$0xff]  }
 0x3c8   : > { %8534 = vmatprep.subr.bf16.mxu1 %v9470_v1  ;;  %v5924_v43 = vrot.slane %v11377_v55, 2 }
 0x3c9   : > { %v4825_v47 = vshrl.u32 %v7553_v45, 16  ;;  %v4822_v32 = vshrl.u32 %v11203_v44, 16  ;;  %v5344_v23 = vrot.slane %v11294_v19, 1  ;;  %v5628_v31 = vshrl.u32 %v11294_v19, 16 }
 0x3ca   : > { %8531 = vmatmul.mubr.bf16.vlgmr.msra.gmra.mrb[80].mxu1 %v5345_v48  ;;  %v9343_v48 = vld [vmem:[%s11658_s5 + $0x448] sm:$0xff]  }
 0x3cb   : > { %5009 = vmatprep.mubr.bf16.mxu0 %v4825_v47  ;;  %8535 = vmatpush3.bf16.msra.mxu1 %v9289_v46  ;;  %v9341_v46 = vld [vmem:[%s11658_s5 + $0x288] sm:$0xff]   ;;  %v5630_v47 = vrot.slane %v5628_v31, 1  ;;  %v9389_v31 = vld [vmem:[%s11658_s5 + $0x3e0] sm:$0xff]  }
 0x3cc   : > { %5010 = vmatmul.mubr.bf16.vlgmr.msra.gmra.mrb[28].mxu0 %v4822_v32  ;;  %8536 = vmatprep.subr.bf16.mxu1 %v9470_v1  ;;  %v9342_v32 = vld [vmem:[%s11658_s5 + $0x248] sm:$0xff]  }
 0x3cd   : > { %8119 = vmatpush3.bf16.msra.mxu0 %v9288_v49  ;;  %5236 = vmatprep.mubr.bf16.mxu0 %v7553_v45  ;;  %v5343_v45 = vrot.slane %v11381_v40, 1  ;;  %v9344_v49 = vld [vmem:[%s11658_s5 + $0x290] sm:$0xff]  }
 0x3ce   : > { %8120 = vmatprep.subr.bf16.mxu0 %v9290_v50  ;;  %8550 = vmatprep.mubr.msk.bf16.mxu1 %vm9471_vm0, %v9470_v1  ;;  %v9346_v50 = vld [vmem:[%s11658_s5 + $0x450] sm:$0xff]  }
 0x3cf   : > { %8537 = vmatpush3.bf16.msra.mxu1 %v9292_v53  ;;  %v9345_v53 = vld [vmem:[%s11658_s5 + $0x250] sm:$0xff]  }
 0x3d0   : > { %8538 = vmatprep.subr.bf16.mxu1 %v9470_v1 }
 0x3d1   : > { %8121 = vmatpush3.bf16.msra.mxu0 %v9291_v57  ;;  %v9347_v57 = vld [vmem:[%s11658_s5 + $0x298] sm:$0xff]  }
 0x3d2   : > { %8122 = vmatprep.subr.bf16.mxu0 %v9293_v56  ;;  %v9349_v56 = vld [vmem:[%s11658_s5 + $0x458] sm:$0xff]  }
 0x3d3   : > { %8539 = vmatpush3.bf16.msra.mxu1 %v9295_v58  ;;  %v9348_v58 = vld [vmem:[%s11658_s5 + $0x258] sm:$0xff]  }
 0x3d4   : > { %8540 = vmatprep.subr.bf16.mxu1 %v9470_v1 }
 0x3d5   : > { %8123 = vmatpush3.bf16.msra.mxu0 %v9294_v59  ;;  %v9350_v59 = vld [vmem:[%s11658_s5 + $0x2a0] sm:$0xff]  }
 0x3d6   : > { %8124 = vmatprep.subr.bf16.mxu0 %v9296_v60  ;;  %v9352_v60 = vld [vmem:[%s11658_s5 + $0x460] sm:$0xff]  }
 0x3d7   : > { %8541 = vmatpush3.bf16.msra.mxu1 %v9298_v61  ;;  %v9351_v61 = vld [vmem:[%s11658_s5 + $0x260] sm:$0xff]  }
 0x3d8   : > { %8542 = vmatprep.subr.bf16.mxu1 %v9470_v1 }
 0x3d9   : > { %8125 = vmatpush3.bf16.msra.mxu0 %v9297_v62  ;;  %v9353_v62 = vld [vmem:[%s11658_s5 + $0x2a8] sm:$0xff]  }
 0x3da   : > { %8126 = vmatprep.subr.bf16.mxu0 %v9299_v63  ;;  %v9355_v63 = vld [vmem:[%s11658_s5 + $0x468] sm:$0xff]  }
 0x3db   : > { %8543 = vmatpush3.bf16.msra.mxu1 %v9301_v2  ;;  %v9354_v2 = vld [vmem:[%s11658_s5 + $0x268] sm:$0xff]  }
 0x3dc   : > { %8544 = vmatprep.subr.bf16.mxu1 %v9470_v1 }
 0x3dd   : > { %8127 = vmatpush3.bf16.msra.mxu0 %v9300_v3  ;;  %v9356_v3 = vld [vmem:[%s11658_s5 + $0x2b0] sm:$0xff]  }
 0x3de   : > { %8128 = vmatprep.subr.bf16.mxu0 %v9302_v4  ;;  %v9358_v4 = vld [vmem:[%s11658_s5 + $0x470] sm:$0xff]  }
 0x3df   : > { %8545 = vmatpush3.bf16.msra.mxu1 %v9304_v6  ;;  %v9357_v6 = vld [vmem:[%s11658_s5 + $0x270] sm:$0xff]  }
 0x3e0   : > { %8546 = vmatprep.subr.bf16.mxu1 %v9470_v1 }
 0x3e1   : > { %8129 = vmatpush3.bf16.msra.mxu0 %v9303_v7  ;;  %v9359_v7 = vld [vmem:[%s11658_s5 + $0x2b8] sm:$0xff]  }
 0x3e2   : > { %8130 = vmatprep.subr.bf16.mxu0 %v9305_v8  ;;  %v9361_v8 = vld [vmem:[%s11658_s5 + $0x478] sm:$0xff]  }
 0x3e3   : > { %8547 = vmatpush3.bf16.msra.mxu1 %v9307_v9  ;;  %v5863_v9 = vld [vmem:[#allocation3] sm:$0x44] }
 0x3e4   : > { %8548 = vmatprep.subr.bf16.mxu1 %v9470_v1 }
 0x3e5   : > { %8131 = vmatpush3.bf16.msra.mxu0 %v9306_v10  ;;  %v9360_v10 = vld [vmem:[%s11658_s5 + $0x278] sm:$0xff]  }
 0x3e6   : > { %8132 = vmatprep.subr.bf16.mxu0 %v9308_v11  ;;  %v6211_v11 = vshrl.u32 %v11377_v55, 16  ;;  %v9386_v55 = vld [vmem:[%s11658_s5 + $0x418] sm:$0xff]  }
 0x3e7   : > { %8549 = vmatpush3.bf16.msra.mxu1 %v9310_v12  ;;  %v5624_v12 = vshrl.u32 %v11381_v40, 16  ;;  %v9387_v40 = vld [vmem:[%s11658_s5 + $0x3d8] sm:$0xff]  }
 0x3e8   : > { %8554 = vmatprep.subr.bf16.mxu1 %v9470_v1  ;;  %v6213_v16 = vrot.slane %v6211_v11, 2  ;;  %v9397_v11 = vld [vmem:[%s11660_s7 + $0x8] sm:$0xff]  }
 0x3e9   : > { %8133 = vmatpush3.bf16.msra.mxu0 %v9309_v15  ;;  %v7799_v15 = vcombine.high %v5863_v9, %v5863_v9  ;;  %v5626_v19 = vrot.slane %v5624_v12, 1  ;;  %v9398_v12 = vld [vmem:[%s11660_s7 + $0x10] sm:$0xff]  }
 0x3ea   : > { %8149 = vmatprep.subr.bf16.mxu0 %v9311_v17  ;;  %8551 = vmatmul.mubr.bf16.vlgmr.msra.gmra.mrb[84].mxu1 %v5634_v22  ;;  %v9363_v17 = vld [vmem:[%s11658_s5 + $0x300] sm:$0xff]  }
 0x3eb   : > { %8555 = vmatpush3.bf16.msra.mxu1 %v9315_v54  ;;  %8570 = vmatprep.mubr.msk.bf16.mxu1 %vm9471_vm0, %v9470_v1  ;;  %v9366_v54 = vld [vmem:[%s11658_s5 + $0x348] sm:$0xff]   ;;  %v5923_v22 = vrot.slane %v7799_v15, 2 }
 0x3ec   : > { %5237 = vmatmul.mubr.bf16.vlgmr.msra.gmra.mrb[32].mxu0 %v11203_v44  ;;  %8556 = vmatprep.subr.bf16.mxu1 %v9470_v1  ;;  %v9339_v44 = vld [vmem:[%s11658_s5 + $0x240] sm:$0xff]  }
 0x3ed   : > { %8150 = vmatpush3.bf16.msra.mxu0 %v9312_v18  ;;  %5525 = vmatprep.mubr.bf16.mxu0 %v5344_v23  ;;  %v9367_v18 = vld [vmem:[%s11658_s5 + $0x308] sm:$0xff]   ;;  %v9369_v23 = vld [vmem:[%s11658_s5 + $0x310] sm:$0xff]  }
 0x3ee   : > { %8151 = vmatprep.subr.bf16.mxu0 %v9316_v20  ;;  %v9368_v20 = vld [vmem:[%s11658_s5 + $0x350] sm:$0xff]  }
 0x3ef   : > { %8557 = vmatpush3.bf16.msra.mxu1 %v9318_v25  ;;  %v9370_v25 = vld [vmem:[%s11658_s5 + $0x358] sm:$0xff]  }
 0x3f0   : > { %8558 = vmatprep.subr.bf16.mxu1 %v9470_v1 }
 0x3f1   : > { %8152 = vmatpush3.bf16.msra.mxu0 %v9317_v26  ;;  %v9371_v26 = vld [vmem:[%s11658_s5 + $0x318] sm:$0xff]  }
 0x3f2   : > { %8153 = vmatprep.subr.bf16.mxu0 %v9319_v27  ;;  %v9372_v27 = vld [vmem:[%s11658_s5 + $0x360] sm:$0xff]  }
 0x3f3   : > { %8559 = vmatpush3.bf16.msra.mxu1 %v9321_v5  ;;  %v9373_v5 = vld [vmem:[%s11658_s5 + $0x320] sm:$0xff]  }
 0x3f4   : > { %8560 = vmatprep.subr.bf16.mxu1 %v9470_v1 }
 0x3f5   : > { %8154 = vmatpush3.bf16.msra.mxu0 %v9320_v28  ;;  %v9374_v28 = vld [vmem:[%s11658_s5 + $0x368] sm:$0xff]  }
 0x3f6   : > { %8155 = vmatprep.subr.bf16.mxu0 %v9322_v29  ;;  %v9375_v29 = vld [vmem:[%s11658_s5 + $0x328] sm:$0xff]  }
 0x3f7   : > { %8561 = vmatpush3.bf16.msra.mxu1 %v9324_v30  ;;  %v9376_v30 = vld [vmem:[%s11658_s5 + $0x370] sm:$0xff]  }
 0x3f8   : > { %8562 = vmatprep.subr.bf16.mxu1 %v9470_v1 }
 0x3f9   : > { %8156 = vmatpush3.bf16.msra.mxu0 %v9323_v14  ;;  %v9377_v14 = vld [vmem:[%s11658_s5 + $0x330] sm:$0xff]  }
 0x3fa   : > { %8157 = vmatprep.subr.bf16.mxu0 %v9325_v33  ;;  %v9378_v33 = vld [vmem:[%s11658_s5 + $0x378] sm:$0xff]  }
 0x3fb   : > { %8563 = vmatpush3.bf16.msra.mxu1 %v9327_v34  ;;  %v9379_v34 = vld [vmem:[%s11658_s5 + $0x338] sm:$0xff]  }
 0x3fc   : > { %8564 = vmatprep.subr.bf16.mxu1 %v9470_v1 }
 0x3fd   : > { %8158 = vmatpush3.bf16.msra.mxu0 %v9326_v24  ;;  %v7798_v24 = vcombine.low %v5863_v9, %v5863_v9 }
 0x3fe   : > { %8159 = vmatprep.subr.bf16.mxu0 %v9328_v35  ;;  %v9380_v35 = vld [vmem:[%s11658_s5 + $0x400] sm:$0xff]  }
 0x3ff   : > { %8565 = vmatpush3.bf16.msra.mxu1 %v9330_v36  ;;  %v6207_v36 = vshrl.u32 %v7799_v15, 16  ;;  %v9400_v15 = vld [vmem:[%s11660_s7 + $0x20] sm:$0xff]  }
 0x400   : > { %8566 = vmatprep.subr.bf16.mxu1 %v9470_v1 }
 0x401   : > { %8160 = vmatpush3.bf16.msra.mxu0 %v9329_v0  ;;  %v9381_v0 = vld [vmem:[%s11658_s5 + $0x3c0] sm:$0xff]  }
 0x402   : > { %8161 = vmatprep.subr.bf16.mxu0 %v9331_v37  ;;  %v5922_v37 = vrot.slane %v7798_v24, 2 }
 0x403   : > { %8567 = vmatpush3.bf16.msra.mxu1 %v9333_v52  ;;  %v9382_v52 = vld [vmem:[%s11658_s5 + $0x408] sm:$0xff]  }
 0x404   : > { %8568 = vmatprep.subr.bf16.mxu1 %v9470_v1 }
 0x405   : > { %8162 = vmatpush3.bf16.msra.mxu0 %v9332_v38  ;;  %v6209_v38 = vrot.slane %v6207_v36, 2 }
 0x406   : > { %8163 = vmatprep.subr.bf16.mxu0 %v9334_v39  ;;  %v9383_v39 = vld [vmem:[%s11658_s5 + $0x3c8] sm:$0xff]  }
 0x407   : > { %8569 = vmatpush3.bf16.msra.mxu1 %v9336_v21  ;;  %v9384_v21 = vld [vmem:[%s11658_s5 + $0x410] sm:$0xff]  }
 0x408   : > { %8574 = vmatprep.subr.bf16.mxu1 %v9470_v1 }
 0x409   : > { %8164 = vmatpush3.bf16.msra.mxu0 %v9335_v51  ;;  %v9385_v51 = vld [vmem:[%s11658_s5 + $0x3d0] sm:$0xff]  }
 0x40a   : > { %8180 = vmatprep.subr.bf16.mxu0 %v9337_v41  ;;  %8571 = vmatmul.mubr.bf16.vlgmr.msra.gmra.mrb[88].mxu1 %v5924_v43  ;;  %v9388_v41 = vld [vmem:[%s11658_s5 + $0x420] sm:$0xff]   ;;  %v9391_v43 = vld [vmem:[%s11658_s5 + $0x3e8] sm:$0xff]  }
 0x40b   : > { %8575 = vmatpush3.bf16.msra.mxu1 %v9340_v42  ;;  %8590 = vmatprep.mubr.msk.bf16.mxu1 %vm9471_vm0, %v9470_v1  ;;  %v9390_v42 = vld [vmem:[%s11658_s5 + $0x428] sm:$0xff]  }
 0x40c   : > { %5526 = vmatmul.mubr.bf16.vlgmr.msra.gmra.mrb[36].mxu0 %v5343_v45  ;;  %8576 = vmatprep.subr.bf16.mxu1 %v9470_v1  ;;  %v9392_v45 = vld [vmem:[%s11658_s5 + $0x430] sm:$0xff]  }
 0x40d   : > { %8181 = vmatpush3.bf16.msra.mxu0 %v9339_v44  ;;  %5814 = vmatprep.mubr.bf16.mxu0 %v5630_v47 }
 0x40e   : > { %8182 = vmatprep.subr.bf16.mxu0 %v9341_v46 }
 0x40f   : > { %8577 = vmatpush3.bf16.msra.mxu1 %v9343_v48 }
 0x410   : > { %8578 = vmatprep.subr.bf16.mxu1 %v9470_v1 }
 0x411   : > { %8183 = vmatpush3.bf16.msra.mxu0 %v9342_v32  ;;  %v9393_v32 = vld [vmem:[%s11658_s5 + $0x3f0] sm:$0xff]  }
 0x412   : > { %8184 = vmatprep.subr.bf16.mxu0 %v9344_v49  ;;  %v9394_v49 = vld [vmem:[%s11658_s5 + $0x438] sm:$0xff]  }
 0x413   : > { %8579 = vmatpush3.bf16.msra.mxu1 %v9346_v50  ;;  %v9395_v50 = vld [vmem:[%s11658_s5 + $0x3f8] sm:$0xff]  }
 0x414   : > { %8580 = vmatprep.subr.bf16.mxu1 %v9470_v1 }
 0x415   : > { %8185 = vmatpush3.bf16.msra.mxu0 %v9345_v53  ;;  %v6203_v53 = vshrl.u32 %v7798_v24, 16 }
 0x416   : > { %8186 = vmatprep.subr.bf16.mxu0 %v9347_v57 }
 0x417   : > { %8581 = vmatpush3.bf16.msra.mxu1 %v9349_v56  ;;  %v6205_v57 = vrot.slane %v6203_v53, 2 }
 0x418   : > { %8582 = vmatprep.subr.bf16.mxu1 %v9470_v1 }
 0x419   : > { %8187 = vmatpush3.bf16.msra.mxu0 %v9348_v58 }
 0x41a   : > { %8188 = vmatprep.subr.bf16.mxu0 %v9350_v59 }
 0x41b   : > { %8583 = vmatpush3.bf16.msra.mxu1 %v9352_v60 }
 0x41c   : > { %8584 = vmatprep.subr.bf16.mxu1 %v9470_v1 }
 0x41d   : > { %8189 = vmatpush3.bf16.msra.mxu0 %v9351_v61 }
 0x41e   : > { %8190 = vmatprep.subr.bf16.mxu0 %v9353_v62 }
 0x41f   : > { %8585 = vmatpush3.bf16.msra.mxu1 %v9355_v63 }
 0x420   : > { %8586 = vmatprep.subr.bf16.mxu1 %v9470_v1 }
 0x421   : > { %8191 = vmatpush3.bf16.msra.mxu0 %v9354_v2 }
 0x422   : > { %8192 = vmatprep.subr.bf16.mxu0 %v9356_v3 }
 0x423   : > { %8587 = vmatpush3.bf16.msra.mxu1 %v9358_v4 }
 0x424   : > { %8588 = vmatprep.subr.bf16.mxu1 %v9470_v1 }
 0x425   : > { %8193 = vmatpush3.bf16.msra.mxu0 %v9357_v6 }
 0x426   : > { %8194 = vmatprep.subr.bf16.mxu0 %v9359_v7 }
 0x427   : > { %8589 = vmatpush3.bf16.msra.mxu1 %v9361_v8 }
 0x429   : > { %8195 = vmatpush3.bf16.msra.mxu0 %v9360_v10  ;;  %v9396_v10 = vld [vmem:[%s11660_s7] sm:$0xff]  }
 0x42a   : > { %8211 = vmatprep.subr.bf16.mxu0 %v9362_v13  ;;  %8591 = vmatmul.mubr.bf16.vlgmr.msra.gmra.mrb[92].mxu1 %v6213_v16  ;;  %v9399_v13 = vld [vmem:[%s11660_s7 + $0x18] sm:$0xff]  }
 0x42c   : > { %5815 = vmatmul.mubr.bf16.vlgmr.msra.gmra.mrb[40].mxu0 %v5626_v19 }
 0x42d   : > { %8212 = vmatpush3.bf16.msra.mxu0 %v9363_v17  ;;  %6104 = vmatprep.mubr.bf16.mxu0 %v5923_v22 }
 0x42e   : > { %8213 = vmatprep.subr.bf16.mxu0 %v9366_v54 }
 0x431   : > { %8214 = vmatpush3.bf16.msra.mxu0 %v9367_v18 }
 0x432   : > { %8215 = vmatprep.subr.bf16.mxu0 %v9368_v20 }
 0x435   : > { %8216 = vmatpush3.bf16.msra.mxu0 %v9369_v23 }
 0x436   : > { %8217 = vmatprep.subr.bf16.mxu0 %v9370_v25 }
 0x439   : > { %8218 = vmatpush3.bf16.msra.mxu0 %v9371_v26 }
 0x43a   : > { %8219 = vmatprep.subr.bf16.mxu0 %v9372_v27 }
 0x43d   : > { %8220 = vmatpush3.bf16.msra.mxu0 %v9373_v5  ;;  %v9401_v5 = vld [vmem:[%s11660_s7 + $0x28] sm:$0xff]  }
 0x43e   : > { %8221 = vmatprep.subr.bf16.mxu0 %v9374_v28  ;;  %v9402_v28 = vld [vmem:[%s11660_s7 + $0x30] sm:$0xff]  }
 0x441   : > { %8222 = vmatpush3.bf16.msra.mxu0 %v9375_v29  ;;  %v9403_v29 = vld [vmem:[%s11660_s7 + $0x38] sm:$0xff]  }
 0x442   : > { %8223 = vmatprep.subr.bf16.mxu0 %v9376_v30 }
 0x445   : > { %8224 = vmatpush3.bf16.msra.mxu0 %v9377_v14 }
 0x446   : > { %8225 = vmatprep.subr.bf16.mxu0 %v9378_v33 }
 0x449   : > { %8226 = vmatpush3.bf16.msra.mxu0 %v9379_v34 }
 0x44a   : > { %8242 = vmatprep.subr.bf16.mxu0 %v9380_v35 }
 0x44c   : > { %6105 = vmatmul.mubr.bf16.vlgmr.msra.gmra.mrb[44].mxu0 %v5922_v37 }
 0x44d   : > { %8243 = vmatpush3.bf16.msra.mxu0 %v9381_v0  ;;  %6393 = vmatprep.mubr.bf16.mxu0 %v6209_v38 }
 0x44e   : > { %8244 = vmatprep.subr.bf16.mxu0 %v9382_v52 }
 0x451   : > { %8245 = vmatpush3.bf16.msra.mxu0 %v9383_v39 }
 0x452   : > { %8246 = vmatprep.subr.bf16.mxu0 %v9384_v21 }
 0x455   : > { %8247 = vmatpush3.bf16.msra.mxu0 %v9385_v51 }
 0x456   : > { %8248 = vmatprep.subr.bf16.mxu0 %v9386_v55 }
 0x459   : > { %8249 = vmatpush3.bf16.msra.mxu0 %v9387_v40 }
 0x45a   : > { %8250 = vmatprep.subr.bf16.mxu0 %v9388_v41 }
 0x45d   : > { %8251 = vmatpush3.bf16.msra.mxu0 %v9389_v31  ;;  %v5051_v44 = vpop.f32.mrb[72].mxu1 }
 0x45e   : > { %8252 = vmatprep.subr.bf16.mxu0 %v9390_v42  ;;  %v8492_v46 = vpop.f32.mrb[73].mxu1 }
 0x45f   : > { %v5054_v47 = vpop.f32.mrb[74].mxu1 }
 0x460   : > { %v8493_v48 = vpop.f32.mrb[75].mxu1 }
 0x461   : > { %8253 = vmatpush3.bf16.msra.mxu0 %v9391_v43 }
 0x462   : > { %8254 = vmatprep.subr.bf16.mxu0 %v9392_v45 }
 0x465   : > { %8255 = vmatpush3.bf16.msra.mxu0 %v9393_v32 }
 0x466   : > { %8256 = vmatprep.subr.bf16.mxu0 %v9394_v49 }
 0x469   : > { %8257 = vmatpush3.bf16.msra.mxu0 %v9395_v50 }
 0x46a   : > { %8594 = vmatprep.subr.bf16.mxu0 %v9470_v1 }
 0x46c   : > { %6394 = vmatmul.mubr.bf16.vlgmr.msra.gmra.mrb[48].mxu0 %v6205_v57 }
 0x46d   : > { %8610 = vmatprep.mubr.msk.bf16.mxu0 %vm9471_vm0, %v9470_v1  ;;  %8595 = vmatpush3.bf16.msra.mxu0 %v9396_v10 }
 0x46e   : > { %8596 = vmatprep.subr.bf16.mxu0 %v9470_v1 }
 0x471   : > { %8597 = vmatpush3.bf16.msra.mxu0 %v9397_v11 }
 0x472   : > { %8598 = vmatprep.subr.bf16.mxu0 %v9470_v1 }
 0x475   : > { %8599 = vmatpush3.bf16.msra.mxu0 %v9398_v12 }
 0x476   : > { %8600 = vmatprep.subr.bf16.mxu0 %v9470_v1 }
 0x479   : > { %8601 = vmatpush3.bf16.msra.mxu0 %v9399_v13 }
 0x47a   : > { %8602 = vmatprep.subr.bf16.mxu0 %v9470_v1 }
 0x47d   : > { %v5278_v56 = vpop.f32.mrb[76].mxu1  ;;  %8603 = vmatpush3.bf16.msra.mxu0 %v9400_v15 }
 0x47e   : > { %v8512_v58 = vpop.f32.mrb[77].mxu1  ;;  %8604 = vmatprep.subr.bf16.mxu0 %v9470_v1 }
 0x47f   : > { %v5281_v59 = vpop.f32.mrb[78].mxu1 }
 0x480   : > { %v8513_v60 = vpop.f32.mrb[79].mxu1 }
 0x481   : > { %8605 = vmatpush3.bf16.msra.mxu0 %v9401_v5 }
 0x482   : > { %8606 = vmatprep.subr.bf16.mxu0 %v9470_v1 }
 0x485   : > { %8607 = vmatpush3.bf16.msra.mxu0 %v9402_v28 }
 0x486   : > { %8608 = vmatprep.subr.bf16.mxu0 %v9470_v1 }
 0x489   : > { %8609 = vmatpush3.bf16.msra.mxu0 %v9403_v29 }
 0x49d   : > { %v5567_v61 = vpop.f32.mrb[80].mxu1 }
 0x49e   : > { %v8532_v63 = vpop.f32.mrb[81].mxu1 }
 0x49f   : > { %v8103_v62 = vpop.f32.mrb[28].mxu0  ;;  %v5570_v3 = vpop.f32.mrb[82].mxu1 }
 0x4a0   : > { %v8104_v2 = vpop.f32.mrb[29].mxu0  ;;  %v8533_v7 = vpop.f32.mrb[83].mxu1 }
 0x4a1   : > { %v8105_v4 = vadd.f32 %v8104_v2, %v8103_v62  ;;  %v8106_v6 = vpop.f32.mrb[30].mxu0 }
 0x4a2   : > { %v8107_v8 = vpop.f32.mrb[31].mxu0 }
 0x4a3   : > { %v5052_v9 = vadd.f32 %v8105_v4, %v5051_v44  ;;  %v6462_v4 = vld [vmem:[%s11661_s8] sm:$0x1] }
 0x4bd   : > { %v5856_v16 = vpop.f32.mrb[84].mxu1 }
 0x4be   : > { %v8552_v19 = vpop.f32.mrb[85].mxu1 }
 0x4bf   : > { %v8134_v17 = vpop.f32.mrb[32].mxu0  ;;  %v5859_v22 = vpop.f32.mrb[86].mxu1 }
 0x4c0   : > { %v8135_v54 = vpop.f32.mrb[33].mxu0  ;;  %v8553_v23 = vpop.f32.mrb[87].mxu1 }
 0x4c1   : > { %v8136_v18 = vadd.f32 %v8135_v54, %v8134_v17  ;;  %v8137_v20 = vpop.f32.mrb[34].mxu0 }
 0x4c2   : > { %v8138_v25 = vpop.f32.mrb[35].mxu0 }
 0x4c3   : > { %v5239_v26 = vadd.f32 %v8136_v18, %v5052_v9 }
 0x4c5   : > { %v5279_v27 = vadd.f32 %v5278_v56, %v5239_v26 }
 0x4dd   : > { %v6146_v30 = vpop.f32.mrb[88].mxu1 }
 0x4de   : > { %v8572_v33 = vpop.f32.mrb[89].mxu1 }
 0x4df   : > { %v8165_v14 = vpop.f32.mrb[36].mxu0  ;;  %v6149_v24 = vpop.f32.mrb[90].mxu1 }
 0x4e0   : > { %v8166_v34 = vpop.f32.mrb[37].mxu0  ;;  %v8573_v0 = vpop.f32.mrb[91].mxu1 }
 0x4e1   : > { %v8167_v35 = vadd.f32 %v8166_v34, %v8165_v14  ;;  %v8168_v36 = vpop.f32.mrb[38].mxu0 }
 0x4e2   : > { %v8169_v37 = vpop.f32.mrb[39].mxu0 }
 0x4e3   : > { %v5568_v52 = vadd.f32 %v8167_v35, %v5567_v61  ;;  %v6442_v61 = vld [vmem:[%s11659_s6] sm:$0x1] }
 0x4e5   : > { %v5573_v38 = vadd.f32 %v5568_v52, %v5279_v27 }
 0x4fd   : > { %v6435_v39 = vpop.f32.mrb[92].mxu1 }
 0x4fe   : > { %v8592_v51 = vpop.f32.mrb[93].mxu1 }
 0x4ff   : > { %v8196_v21 = vpop.f32.mrb[40].mxu0  ;;  %v6438_v40 = vpop.f32.mrb[94].mxu1 }
 0x500   : > { %v8197_v55 = vpop.f32.mrb[41].mxu0  ;;  %v8593_v1 = vpop.f32.mrb[95].mxu1 }
 0x501   : > { %v8198_v41 = vadd.f32 %v8197_v55, %v8196_v21  ;;  %v8199_v31 = vpop.f32.mrb[42].mxu0 }
 0x502   : > { %v8200_v42 = vpop.f32.mrb[43].mxu0 }
 0x503   : > { %v5857_v43 = vadd.f32 %v8198_v41, %v5856_v16 }
 0x505   : > { %v5862_v44 = vadd.f32 %v5857_v43, %v5573_v38 }
 0x51f   : > { %v8227_v45 = vpop.f32.mrb[44].mxu0 }
 0x520   : > { %v8228_v46 = vpop.f32.mrb[45].mxu0 }
 0x521   : > { %v8229_v47 = vadd.f32 %v8228_v46, %v8227_v45  ;;  %v8230_v48 = vpop.f32.mrb[46].mxu0 }
 0x522   : > { %v8231_v32 = vpop.f32.mrb[47].mxu0 }
 0x523   : > { %v6147_v49 = vadd.f32 %v8229_v47, %v6146_v30 }
 0x525   : > { %v6152_v50 = vadd.f32 %v6147_v49, %v5862_v44 }
 0x53f   : > { %v8258_v53 = vpop.f32.mrb[48].mxu0 }
 0x540   : > { %v8259_v57 = vpop.f32.mrb[49].mxu0 }
 0x541   : > { %v8260_v56 = vadd.f32 %v8259_v57, %v8258_v53  ;;  %v8261_v58 = vpop.f32.mrb[50].mxu0 }
 0x542   : > { %v8262_v59 = vpop.f32.mrb[51].mxu0 }
 0x543   : > { %v6436_v60 = vadd.f32 %v8260_v56, %v6435_v39 }
 0x545   : > { %v6441_v62 = vadd.f32 %v6436_v60, %v6152_v50 }
 0x547   : > { %v6443_v63 = vadd.f32 %v6442_v61, %v6441_v62 }
 0x549   : > { %v6444_v2 = vmax.f32 %v6443_v63, 0.0 }
 0x54b   : > { %v6445_v3 = vpack.c.bf16 %v6444_v2, %v6444_v2 }
 0x54d   : > { %8611 = vmatmul.mubr.bf16.vlgmr.msra.gmra.mrb[52].mxu0 %v6445_v3 }
 0x620   : > { %v6545_v6 = vpop.f32.mrb[52].mxu0 }
 0x621   : > { %v6546_v7 = vadd.f32 %v6545_v6, %v6462_v4  ;;  %v8612_v8 = vpop.f32.mrb[53].mxu0 }
 0x622   : > { %v6548_v9 = vpop.f32.mrb[54].mxu0 }
 0x623   : > { %6551 = vst [vmem:[%s324_s17] sm:$0x1] %v6546_v7  ;;  %v8613_v10 = vpop.f32.mrb[55].mxu0 }
 0x624   : > { %9419 = shalt.err (!%p9416_p3)
}
 0x625   : > { %s9420_s27 = scalar_lea.hbm %s11611_s23, 16  ;;  %s9424_s17 = scalar_lea.hbm %s11662_s9, 32 }
 0x626   : > { %p9421_p4 = scmp.ne.s32.totalorder %s11611_s23, %s9420_s27  ;;  %p9425_p9 = scmp.lt.u32.totalorder %s11611_s23, %s11662_s9 }
 0x627   : > { %p9426_p10 = scmp.lt.u32.totalorder %s9424_s17, %s9420_s27  ;;  %p9428_p12 = scmp.lt.u32.totalorder %s9420_s27, %s11611_s23 }
 0x628   : > { %p9422_p7 = pnand %p9421_p4, %p9562_p5 }
 0x629   : > { %p9427_p11 = por %p9426_p10, %p9425_p9 }
 0x62a   : > { %p9423_p8 = pneg %p9422_p7 }
 0x62b   : > { %p9429_p13 = por %p9428_p12, %p9427_p11 }
 0x62d   : > { %p9430_p0 = pnand %p9429_p13, %p9423_p8 }
 0x62f   : > { %9433 = shalt.err (!%p9430_p0)
}
 0x630   : > { %8642 = dma.vmem_to_hbm [thread:$0]  (%p9562_p5), %s11613_s29, 16, %s11611_s23, %s6553_s25  }
 0x631 PF: > { %p8648_p1 = scmp.ge.s32.totalorder %s9468_s12, 2  ;;  %s6577_s13 = sand.u32 1, %s9456_s30  }
 0x632   : > { %s6578_s26 = scalar_lea.sflag [#allocation5], %s6577_s13 }
 0x633   : > { %p8645_p2 = pnand %p8648_p1, %p9566_p6 }
 0x635   : > { %9451 = dma.done.wait (!%p8645_p2), %s6578_s26, 16  }
 0x636   : > { %9453 = vsyncadd (!%p8645_p2), %s6578_s26, 4294967280  ;;  %p19_p3 = scmp.ge.s32.totalorder %s9549_s15, 4   ;;  %s11669_s30 = smov %s9460_s10 }
 0x637   : > { %s11670_s10 = smov %s9464_s11  ;;  %s11671_s11 = smov %s9560_s18 }
 0x638   : > { %s11672_s12 = smov %s9549_s15  ;;  %21 = sbr.rel (!%p19_p3) target bundleno = 3 (0x3), region = 106 }
 0x63f   :  { %6582 = vsyncpa [#allocation5], 1 }
 0x640   :  { %6584 = vsyncpa [#allocation5 + $0x1], 1 }

</bundles_post_ra>
